<compile_context>
chip_gen: v7x
topology: tpu7x:2x2x1
jax: 0.10.0
libtpu: 0.0.40
codegen_flags: <defaults>
</compile_context>

<pallas_src>
import functools

import jax
import jax.numpy as jnp
from jax.experimental import pallas as pl
from jax.experimental.pallas import tpu as pltpu

EPS = 1e-5  # PyTorch BatchNorm2d default


# ---------------------------------------------------------------------------
# Fused Pallas kernel: whole Bottleneck block, grid = (phase, image).
# ---------------------------------------------------------------------------
def _bottleneck_kernel(x_ref, w1_ref, g1_ref, b1_ref,
                       w2_ref, g2_ref, b2_ref,
                       w3_ref, g3_ref, b3_ref,
                       o_ref,
                       y1_s, y2_s, y3_s,
                       mu1_s, ss1_s, mu2_s, ss2_s, mu3_s, ss3_s,
                       *, H, W, M_total):
    p = pl.program_id(0)          # phase (outermost grid axis)
    i = pl.program_id(1)          # image index
    HW = H * W
    width = w1_ref.shape[1]

    row0 = pl.multiple_of(i * HW, HW)
    rows = pl.ds(row0, HW)        # this image's rows in the resident scratch

    # ---- helpers -------------------------------------------------------------
    def accum_stats(mu_ref, ss_ref, y):
        # Chan/Welford parallel combine across image tiles (numerically safer
        # than a one-pass E[y^2] - mean^2).  All f32.
        n_b = float(HW)
        mu_b = jnp.sum(y, axis=0, keepdims=True) * (1.0 / HW)
        d = y - mu_b
        ss_b = jnp.sum(d * d, axis=0, keepdims=True)
        n_a = (i * HW).astype(jnp.float32)
        tot = n_a + n_b
        delta = mu_b - mu_ref[...]
        mu_ref[...] = mu_ref[...] + delta * (n_b / tot)
        ss_ref[...] = ss_ref[...] + ss_b + delta * delta * (n_a * n_b / tot)

    def bn(y, mu_ref, ss_ref, g_ref, b_ref):
        var = ss_ref[...] * (1.0 / M_total)            # biased (training-mode BN)
        inv = jax.lax.rsqrt(var + EPS)
        return (y - mu_ref[...]) * inv * g_ref[...] + b_ref[...]

    # ---- init: zero the statistics accumulators ------------------------------
    @pl.when((p == 0) & (i == 0))
    def _init():
        mu1_s[...] = jnp.zeros_like(mu1_s)
        ss1_s[...] = jnp.zeros_like(ss1_s)
        mu2_s[...] = jnp.zeros_like(mu2_s)
        ss2_s[...] = jnp.zeros_like(ss2_s)
        mu3_s[...] = jnp.zeros_like(mu3_s)
        ss3_s[...] = jnp.zeros_like(ss3_s)

    # ---- phase 0: conv1 (1x1) + BN1 statistics --------------------------------
    @pl.when(p == 0)
    def _phase0():
        y1 = jnp.dot(x_ref[...].astype(jnp.bfloat16), w1_ref[...],
                     preferred_element_type=jnp.float32)        # (HW, width) f32
        y1_s[rows, :] = y1
        accum_stats(mu1_s, ss1_s, y1)

    # ---- phase 1: BN1+ReLU, conv2 (3x3) as ONE im2col matmul, BN2 stats -------
    @pl.when(p == 1)
    def _phase1():
        h1 = jnp.maximum(bn(y1_s[rows, :], mu1_s, ss1_s, g1_ref, b1_ref), 0.0)
        h1 = h1.astype(jnp.bfloat16)
        # Per-image zero-padded (H+2, W+2, width) buffer: the zeros supply the
        # conv padding, so there are no per-tap validity selects.
        h3 = h1.reshape(H, W, width)
        zw = jnp.zeros((H, 1, width), jnp.bfloat16)
        hp = jnp.concatenate([zw, h3, zw], axis=1)               # (H, W+2, width)
        zh = jnp.zeros((1, W + 2, width), jnp.bfloat16)
        hp = jnp.concatenate([zh, hp, zh], axis=0)               # (H+2, W+2, width)

        taps = []
        for kh in range(3):                                      # static unroll
            for kw in range(3):
                taps.append(hp[kh:kh + H, kw:kw + W, :].reshape(HW, width))
        cols = jnp.concatenate(taps, axis=1)                     # (HW, 9*width) bf16

        y2 = jnp.dot(cols, w2_ref[...],
                     preferred_element_type=jnp.float32)         # (HW, width) f32
        y2_s[rows, :] = y2
        accum_stats(mu2_s, ss2_s, y2)

    # ---- phase 2: BN2+ReLU, conv3 (1x1), BN3 statistics ------------------------
    @pl.when(p == 2)
    def _phase2():
        h2 = jnp.maximum(bn(y2_s[rows, :], mu2_s, ss2_s, g2_ref, b2_ref), 0.0)
        y3 = jnp.dot(h2.astype(jnp.bfloat16), w3_ref[...],
                     preferred_element_type=jnp.float32)         # (HW, Cout) f32
        y3_s[rows, :] = y3
        accum_stats(mu3_s, ss3_s, y3)

    # ---- phase 3: BN3 + residual (x re-streamed) + ReLU, lane-dense store -----
    @pl.when(p == 3)
    def _phase3():
        y3 = y3_s[rows, :]
        o_ref[...] = jnp.maximum(
            bn(y3, mu3_s, ss3_s, g3_ref, b3_ref) + x_ref[...], 0.0)


# ---------------------------------------------------------------------------
# Wrapper: NCHW in/out, one gridded pallas_call.
# ---------------------------------------------------------------------------
def bottleneck_forward(x_nchw, params):
    N, Cin, H, W = x_nchw.shape
    width = params["w1"].shape[1]
    Cout = params["w3"].shape[1]
    assert Cout == Cin, "downsample=None requires inplanes == planes*expansion"
    HW = H * W
    assert HW % 8 == 0
    M = N * HW

    x2d = jnp.transpose(x_nchw, (0, 2, 3, 1)).reshape(M, Cin).astype(jnp.float32)
    # bf16 MXU operands; HWIO (3,3,w,w) -> (9*w, w) so row index = (kh*3+kw)*w + cin.
    w1 = params["w1"].astype(jnp.bfloat16)
    w2 = params["w2"].reshape(9 * width, width).astype(jnp.bfloat16)
    w3 = params["w3"].astype(jnp.bfloat16)

    flops = 2 * M * (Cin * width + 9 * width * width + width * Cout)
    bytes_accessed = (4 * M * Cin * 2 + 4 * M * Cout                      # x twice, out
                      + 2 * (Cin * width + 9 * width * width + width * Cout)
                      + 4 * (4 * width + 2 * Cout))

    kernel = functools.partial(_bottleneck_kernel, H=H, W=W, M_total=M)

    def x_map(p, i):      # x only needed in phases 0 (conv1) and 3 (residual)
        return (jnp.where((p == 0) | (p == 3), i, 0), 0)

    def out_map(p, i):    # written only in phase 3; held resident otherwise
        return (jnp.where(p == 3, i, 0), 0)

    const = lambda p, i: (0, 0)   # weights / gamma / beta: VMEM-resident

    out2d = pl.pallas_call(
        kernel,
        out_shape=jax.ShapeDtypeStruct((M, Cout), jnp.float32),
        grid=(4, N),                                   # (phase, image)
        in_specs=[
            pl.BlockSpec((HW, Cin), x_map),
            pl.BlockSpec((Cin, width), const),         # w1 (bf16)
            pl.BlockSpec((1, width), const),           # g1
            pl.BlockSpec((1, width), const),           # b1
            pl.BlockSpec((9 * width, width), const),   # w2 (bf16, im2col layout)
            pl.BlockSpec((1, width), const),           # g2
            pl.BlockSpec((1, width), const),           # b2
            pl.BlockSpec((width, Cout), const),        # w3 (bf16)
            pl.BlockSpec((1, Cout), const),            # g3
            pl.BlockSpec((1, Cout), const),            # b3
        ],
        out_specs=pl.BlockSpec((HW, Cout), out_map),
        scratch_shapes=[
            pltpu.VMEM((M, width), jnp.float32),       # y1 (pre-BN conv1 out)
            pltpu.VMEM((M, width), jnp.float32),       # y2 (pre-BN conv2 out)
            pltpu.VMEM((M, Cout), jnp.float32),        # y3 (pre-BN conv3 out)
            pltpu.VMEM((1, width), jnp.float32),       # BN1 running mean
            pltpu.VMEM((1, width), jnp.float32),       # BN1 running sum-sq-dev
            pltpu.VMEM((1, width), jnp.float32),       # BN2 mean
            pltpu.VMEM((1, width), jnp.float32),       # BN2 sum-sq-dev
            pltpu.VMEM((1, Cout), jnp.float32),        # BN3 mean
            pltpu.VMEM((1, Cout), jnp.float32),        # BN3 sum-sq-dev
        ],
        compiler_params=pltpu.CompilerParams(
            # image axis kept "arbitrary": BN stats accumulate in shared scratch.
            dimension_semantics=("arbitrary", "arbitrary"),
            # 48 MiB: above the 16/32 MiB scoped defaults, within v7x's 64 MiB
            # physical VMEM (working set here is only a few MiB).
            vmem_limit_bytes=48 * 1024 * 1024),
        cost_estimate=pl.CostEstimate(flops=flops,
                                      transcendentals=2 * width + Cout,
                                      bytes_accessed=bytes_accessed),
    )(x2d,
      w1, params["g1"], params["b1"],
      w2, params["g2"], params["b2"],
      w3, params["g3"], params["b3"])

    return jnp.transpose(out2d.reshape(N, H, W, Cout), (0, 3, 1, 2))  # back to NCHW


# ---------------------------------------------------------------------------
# Pure-JAX reference (no Pallas).  matmul_dtype=bfloat16 mirrors the kernel's
# bf16-operand / f32-accumulate math; matmul_dtype=float32 is the exact module.
# ---------------------------------------------------------------------------
def bottleneck_reference(x_nchw, params, matmul_dtype=jnp.float32):
    x = jnp.transpose(x_nchw, (0, 2, 3, 1)).astype(jnp.float32)
    hi = jax.lax.Precision.HIGHEST

    def bn(y, g, b):
        mean = jnp.mean(y, axis=(0, 1, 2), keepdims=True)
        var = jnp.mean((y - mean) ** 2, axis=(0, 1, 2), keepdims=True)
        return (y - mean) * jax.lax.rsqrt(var + EPS) * g.reshape(1, 1, 1, -1) \
            + b.reshape(1, 1, 1, -1)

    def mm(a, w):
        return jnp.einsum("nhwc,cd->nhwd", a.astype(matmul_dtype),
                          w.astype(matmul_dtype), precision=hi,
                          preferred_element_type=jnp.float32)

    h = jnp.maximum(bn(mm(x, params["w1"]), params["g1"], params["b1"]), 0.0)
    h = jax.lax.conv_general_dilated(
        h.astype(matmul_dtype), params["w2"].astype(matmul_dtype),
        window_strides=(1, 1), padding=((1, 1), (1, 1)),
        dimension_numbers=("NHWC", "HWIO", "NHWC"), precision=hi,
        preferred_element_type=jnp.float32)
    h = jnp.maximum(bn(h, params["g2"], params["b2"]), 0.0)
    h = jnp.maximum(bn(mm(h, params["w3"]), params["g3"], params["b3"]) + x, 0.0)
    return jnp.transpose(h, (0, 3, 1, 2))


# ---------------------------------------------------------------------------
if __name__ == "__main__":
    # Canonical Bottleneck(inplanes=256, planes=64): width=64, out=256,
    # identity residual (downsample=None).  Small batch/spatial keep the script
    # fast; realistic channel widths keep the MXU / 128-lane stores dense.
    N, Cin, H, W = 2, 256, 16, 16
    planes = 64
    width = int(planes * (64 / 64.0)) * 1          # base_width=64, groups=1
    Cexp = planes * 4                              # expansion = 4
    assert Cexp == Cin, "downsample=None requires inplanes == planes*expansion"

    key = jax.random.PRNGKey(0)
    ks = jax.random.split(key, 10)
    params = {
        "w1": jax.random.normal(ks[0], (Cin, width), jnp.float32) * 0.05,
        "w2": jax.random.normal(ks[1], (3, 3, width, width), jnp.float32) * 0.05,  # HWIO
        "w3": jax.random.normal(ks[2], (width, Cexp), jnp.float32) * 0.05,
        "g1": jax.random.uniform(ks[3], (1, width), jnp.float32, 0.5, 1.5),
        "b1": jax.random.normal(ks[4], (1, width), jnp.float32) * 0.1,
        "g2": jax.random.uniform(ks[5], (1, width), jnp.float32, 0.5, 1.5),
        "b2": jax.random.normal(ks[6], (1, width), jnp.float32) * 0.1,
        "g3": jax.random.uniform(ks[7], (1, Cexp), jnp.float32, 0.5, 1.5),
        "b3": jax.random.normal(ks[8], (1, Cexp), jnp.float32) * 0.1,
    }
    x = jax.random.normal(ks[9], (N, Cin, H, W), jnp.float32)

    out = jax.block_until_ready(bottleneck_forward(x, params))
    assert out.shape == (N, Cexp, H, W)
    assert bool(jnp.all(jnp.isfinite(out)))

    # Tight check vs a reference doing the same bf16-operand / f32-accumulate math.
    ref_bf16 = bottleneck_reference(x, params, matmul_dtype=jnp.bfloat16)
    assert jnp.allclose(out, ref_bf16, atol=2e-2, rtol=2e-2), \
        "mismatch vs bf16-operand JAX reference"

    # Loose check vs the full-f32 reference (difference = bf16 MXU operand rounding).
    ref_f32 = bottleneck_reference(x, params, matmul_dtype=jnp.float32)
    assert jnp.allclose(out, ref_f32, atol=1e-1, rtol=1e-1), \
        "mismatch vs f32 JAX reference"

    print("KERNEL_OK")
</pallas_src>

<mosaic_0001>
module attributes {stable_mosaic.version = 11 : i64} {
  func.func @_bottleneck_kernel(%arg0: i32, %arg1: i32, %arg2: memref<256x256xf32, #tpu.memory_space<vmem>>, %arg3: memref<256x64xbf16, #tpu.memory_space<vmem>>, %arg4: memref<1x64xf32, #tpu.memory_space<vmem>>, %arg5: memref<1x64xf32, #tpu.memory_space<vmem>>, %arg6: memref<576x64xbf16, #tpu.memory_space<vmem>>, %arg7: memref<1x64xf32, #tpu.memory_space<vmem>>, %arg8: memref<1x64xf32, #tpu.memory_space<vmem>>, %arg9: memref<64x256xbf16, #tpu.memory_space<vmem>>, %arg10: memref<1x256xf32, #tpu.memory_space<vmem>>, %arg11: memref<1x256xf32, #tpu.memory_space<vmem>>, %arg12: memref<256x256xf32, #tpu.memory_space<vmem>>, %arg13: memref<512x64xf32, #tpu.memory_space<vmem>>, %arg14: memref<512x64xf32, #tpu.memory_space<vmem>>, %arg15: memref<512x256xf32, #tpu.memory_space<vmem>>, %arg16: memref<1x64xf32, #tpu.memory_space<vmem>>, %arg17: memref<1x64xf32, #tpu.memory_space<vmem>>, %arg18: memref<1x64xf32, #tpu.memory_space<vmem>>, %arg19: memref<1x64xf32, #tpu.memory_space<vmem>>, %arg20: memref<1x256xf32, #tpu.memory_space<vmem>>, %arg21: memref<1x256xf32, #tpu.memory_space<vmem>>) attributes {dimension_semantics = [#tpu.dimension_semantics<arbitrary>, #tpu.dimension_semantics<arbitrary>], iteration_bounds = array<i64: 4, 2>, scalar_prefetch = 0 : i64, scratch_operands = 9 : i64, tpu.core_type = #tpu.core_type<tc>, window_params = [{transform_indices = @transform_0, window_bounds = array<i64: 256, 256>}, {pipeline_mode = #tpu.pipeline_mode<synchronous>, transform_indices = @transform_1, window_bounds = array<i64: 256, 64>}, {pipeline_mode = #tpu.pipeline_mode<synchronous>, transform_indices = @transform_2, window_bounds = array<i64: 1, 64>}, {pipeline_mode = #tpu.pipeline_mode<synchronous>, transform_indices = @transform_3, window_bounds = array<i64: 1, 64>}, {pipeline_mode = #tpu.pipeline_mode<synchronous>, transform_indices = @transform_4, window_bounds = array<i64: 576, 64>}, {pipeline_mode = #tpu.pipeline_mode<synchronous>, transform_indices = @transform_5, window_bounds = array<i64: 1, 64>}, {pipeline_mode = #tpu.pipeline_mode<synchronous>, transform_indices = @transform_6, window_bounds = array<i64: 1, 64>}, {pipeline_mode = #tpu.pipeline_mode<synchronous>, transform_indices = @transform_7, window_bounds = array<i64: 64, 256>}, {pipeline_mode = #tpu.pipeline_mode<synchronous>, transform_indices = @transform_8, window_bounds = array<i64: 1, 256>}, {pipeline_mode = #tpu.pipeline_mode<synchronous>, transform_indices = @transform_9, window_bounds = array<i64: 1, 256>}, {transform_indices = @transform_10, window_bounds = array<i64: 256, 256>}]} {
    %c256_i32 = arith.constant 256 : i32
    %0 = arith.muli %arg1, %c256_i32 : i32
    %1 = tpu.assume_multiple %0, 256 : i32
    %c0_i32 = arith.constant 0 : i32
    %2 = arith.cmpi eq, %arg0, %c0_i32 : i32
    %c0_i32_0 = arith.constant 0 : i32
    %3 = arith.cmpi eq, %arg1, %c0_i32_0 : i32
    %4 = arith.andi %2, %3 : i1
    %5 = arith.extui %4 : i1 to i32
    %c0_i32_1 = arith.constant 0 : i32
    %6 = arith.cmpi ne, %5, %c0_i32_1 : i32
    scf.if %6 {
      %cst = arith.constant 0.000000e+00 : f32
      %19 = vector.broadcast %cst : f32 to vector<1x64xf32>
      %c0 = arith.constant 0 : index
      %c0_7 = arith.constant 0 : index
      %20 = vector.load %arg16[%c0, %c0_7] : memref<1x64xf32, #tpu.memory_space<vmem>>, vector<1x64xf32>
      tpu.vector_store %arg16[%c0, %c0_7], %19 {strides = array<i32>} : memref<1x64xf32, #tpu.memory_space<vmem>>, vector<1x64xf32>,
      %cst_8 = arith.constant 0.000000e+00 : f32
      %21 = vector.broadcast %cst_8 : f32 to vector<1x64xf32>
      %c0_9 = arith.constant 0 : index
      %c0_10 = arith.constant 0 : index
      %22 = vector.load %arg17[%c0_9, %c0_10] : memref<1x64xf32, #tpu.memory_space<vmem>>, vector<1x64xf32>
      tpu.vector_store %arg17[%c0_9, %c0_10], %21 {strides = array<i32>} : memref<1x64xf32, #tpu.memory_space<vmem>>, vector<1x64xf32>,
      %cst_11 = arith.constant 0.000000e+00 : f32
      %23 = vector.broadcast %cst_11 : f32 to vector<1x64xf32>
      %c0_12 = arith.constant 0 : index
      %c0_13 = arith.constant 0 : index
      %24 = vector.load %arg18[%c0_12, %c0_13] : memref<1x64xf32, #tpu.memory_space<vmem>>, vector<1x64xf32>
      tpu.vector_store %arg18[%c0_12, %c0_13], %23 {strides = array<i32>} : memref<1x64xf32, #tpu.memory_space<vmem>>, vector<1x64xf32>,
      %cst_14 = arith.constant 0.000000e+00 : f32
      %25 = vector.broadcast %cst_14 : f32 to vector<1x64xf32>
      %c0_15 = arith.constant 0 : index
      %c0_16 = arith.constant 0 : index
      %26 = vector.load %arg19[%c0_15, %c0_16] : memref<1x64xf32, #tpu.memory_space<vmem>>, vector<1x64xf32>
      tpu.vector_store %arg19[%c0_15, %c0_16], %25 {strides = array<i32>} : memref<1x64xf32, #tpu.memory_space<vmem>>, vector<1x64xf32>,
      %cst_17 = arith.constant 0.000000e+00 : f32
      %27 = vector.broadcast %cst_17 : f32 to vector<1x256xf32>
      %c0_18 = arith.constant 0 : index
      %c0_19 = arith.constant 0 : index
      %28 = vector.load %arg20[%c0_18, %c0_19] : memref<1x256xf32, #tpu.memory_space<vmem>>, vector<1x256xf32>
      tpu.vector_store %arg20[%c0_18, %c0_19], %27 {strides = array<i32>} : memref<1x256xf32, #tpu.memory_space<vmem>>, vector<1x256xf32>,
      %cst_20 = arith.constant 0.000000e+00 : f32
      %29 = vector.broadcast %cst_20 : f32 to vector<1x256xf32>
      %c0_21 = arith.constant 0 : index
      %c0_22 = arith.constant 0 : index
      %30 = vector.load %arg21[%c0_21, %c0_22] : memref<1x256xf32, #tpu.memory_space<vmem>>, vector<1x256xf32>
      tpu.vector_store %arg21[%c0_21, %c0_22], %29 {strides = array<i32>} : memref<1x256xf32, #tpu.memory_space<vmem>>, vector<1x256xf32>,
    } else {
    }
    %c0_i32_2 = arith.constant 0 : i32
    %7 = arith.cmpi eq, %arg0, %c0_i32_2 : i32
    %8 = arith.extui %7 : i1 to i32
    %c0_i32_3 = arith.constant 0 : i32
    %9 = arith.cmpi ne, %8, %c0_i32_3 : i32
    scf.if %9 {
      %c0 = arith.constant 0 : index
      %c0_7 = arith.constant 0 : index
      %19 = vector.load %arg2[%c0, %c0_7] : memref<256x256xf32, #tpu.memory_space<vmem>>, vector<256x256xf32>
      %20 = arith.truncf %19 : vector<256x256xf32> to vector<256x256xbf16>
      %c0_8 = arith.constant 0 : index
      %c0_9 = arith.constant 0 : index
      %21 = vector.load %arg3[%c0_8, %c0_9] : memref<256x64xbf16, #tpu.memory_space<vmem>>, vector<256x64xbf16>
      %cst = arith.constant dense<0.000000e+00> : vector<256x64xf32>
      %22 = tpu.matmul %20, %21, %cst {dimension_numbers = #tpu.dot_dimension_numbers<[1], [0], [0], [1], [0, 0, 1, 1], [], []>} : vector<256x256xbf16>, vector<256x64xbf16>, vector<256x64xf32> -> vector<256x64xf32>
      %23 = arith.index_cast %1 : i32 to index
      %c0_10 = arith.constant 0 : index
      %24 = vector.load %arg13[%23, %c0_10] : memref<512x64xf32, #tpu.memory_space<vmem>>, vector<256x64xf32>
      tpu.vector_store %arg13[%23, %c0_10], %22 {strides = array<i32>} : memref<512x64xf32, #tpu.memory_space<vmem>>, vector<256x64xf32>,
      %cst_11 = arith.constant dense<0.000000e+00> : vector<64xf32>
      %25 = vector.multi_reduction <add>, %22, %cst_11 [0] : vector<256x64xf32> to vector<64xf32>
      %26 = vector.shape_cast %25 : vector<64xf32> to vector<1x64xf32>
      %cst_12 = arith.constant 3.906250e-03 : f32
      %27 = vector.broadcast %cst_12 : f32 to vector<1x64xf32>
      %28 = arith.mulf %26, %27 : vector<1x64xf32>
      %29 = vector.broadcast %28 : vector<1x64xf32> to vector<256x64xf32>
      %30 = arith.subf %22, %29 : vector<256x64xf32>
      %31 = arith.mulf %30, %30 : vector<256x64xf32>
      %cst_13 = arith.constant dense<0.000000e+00> : vector<64xf32>
      %32 = vector.multi_reduction <add>, %31, %cst_13 [0] : vector<256x64xf32> to vector<64xf32>
      %33 = vector.shape_cast %32 : vector<64xf32> to vector<1x64xf32>
      %c256_i32_14 = arith.constant 256 : i32
      %34 = arith.muli %arg1, %c256_i32_14 : i32
      %35 = arith.sitofp %34 : i32 to f32
      %cst_15 = arith.constant 2.560000e+02 : f32
      %36 = arith.addf %35, %cst_15 : f32
      %c0_16 = arith.constant 0 : index
      %c0_17 = arith.constant 0 : index
      %37 = vector.load %arg16[%c0_16, %c0_17] : memref<1x64xf32, #tpu.memory_space<vmem>>, vector<1x64xf32>
      %38 = arith.subf %28, %37 : vector<1x64xf32>
      %c0_18 = arith.constant 0 : index
      %c0_19 = arith.constant 0 : index
      %39 = vector.load %arg16[%c0_18, %c0_19] : memref<1x64xf32, #tpu.memory_space<vmem>>, vector<1x64xf32>
      %cst_20 = arith.constant 2.560000e+02 : f32
      %40 = arith.divf %cst_20, %36 : f32
      %41 = vector.broadcast %40 : f32 to vector<1x64xf32>
      %42 = arith.mulf %38, %41 : vector<1x64xf32>
      %43 = arith.addf %39, %42 : vector<1x64xf32>
      %c0_21 = arith.constant 0 : index
      %c0_22 = arith.constant 0 : index
      %44 = vector.load %arg16[%c0_21, %c0_22] : memref<1x64xf32, #tpu.memory_space<vmem>>, vector<1x64xf32>
      tpu.vector_store %arg16[%c0_21, %c0_22], %43 {strides = array<i32>} : memref<1x64xf32, #tpu.memory_space<vmem>>, vector<1x64xf32>,
      %c0_23 = arith.constant 0 : index
      %c0_24 = arith.constant 0 : index
      %45 = vector.load %arg17[%c0_23, %c0_24] : memref<1x64xf32, #tpu.memory_space<vmem>>, vector<1x64xf32>
      %46 = arith.addf %45, %33 : vector<1x64xf32>
      %47 = arith.mulf %38, %38 : vector<1x64xf32>
      %cst_25 = arith.constant 2.560000e+02 : f32
      %48 = arith.mulf %35, %cst_25 : f32
      %49 = arith.divf %48, %36 : f32
      %50 = vector.broadcast %49 : f32 to vector<1x64xf32>
      %51 = arith.mulf %47, %50 : vector<1x64xf32>
      %52 = arith.addf %46, %51 : vector<1x64xf32>
      %c0_26 = arith.constant 0 : index
      %c0_27 = arith.constant 0 : index
      %53 = vector.load %arg17[%c0_26, %c0_27] : memref<1x64xf32, #tpu.memory_space<vmem>>, vector<1x64xf32>
      tpu.vector_store %arg17[%c0_26, %c0_27], %52 {strides = array<i32>} : memref<1x64xf32, #tpu.memory_space<vmem>>, vector<1x64xf32>,
    } else {
    }
    %c1_i32 = arith.constant 1 : i32
    %10 = arith.cmpi eq, %arg0, %c1_i32 : i32
    %11 = arith.extui %10 : i1 to i32
    %c0_i32_4 = arith.constant 0 : i32
    %12 = arith.cmpi ne, %11, %c0_i32_4 : i32
    scf.if %12 {
      %19 = arith.index_cast %1 : i32 to index
      %c0 = arith.constant 0 : index
      %20 = vector.load %arg13[%19, %c0] : memref<512x64xf32, #tpu.memory_space<vmem>>, vector<256x64xf32>
      %c0_7 = arith.constant 0 : index
      %c0_8 = arith.constant 0 : index
      %21 = vector.load %arg17[%c0_7, %c0_8] : memref<1x64xf32, #tpu.memory_space<vmem>>, vector<1x64xf32>
      %cst = arith.constant 0.001953125 : f32
      %22 = vector.broadcast %cst : f32 to vector<1x64xf32>
      %23 = arith.mulf %21, %22 : vector<1x64xf32>
      %cst_9 = arith.constant 9.99999974E-6 : f32
      %24 = vector.broadcast %cst_9 : f32 to vector<1x64xf32>
      %25 = arith.addf %23, %24 : vector<1x64xf32>
      %26 = math.rsqrt %25 : vector<1x64xf32>
      %c0_10 = arith.constant 0 : index
      %c0_11 = arith.constant 0 : index
      %27 = vector.load %arg16[%c0_10, %c0_11] : memref<1x64xf32, #tpu.memory_space<vmem>>, vector<1x64xf32>
      %28 = vector.broadcast %27 : vector<1x64xf32> to vector<256x64xf32>
      %29 = arith.subf %20, %28 : vector<256x64xf32>
      %30 = vector.broadcast %26 : vector<1x64xf32> to vector<256x64xf32>
      %31 = arith.mulf %29, %30 : vector<256x64xf32>
      %c0_12 = arith.constant 0 : index
      %c0_13 = arith.constant 0 : index
      %32 = vector.load %arg4[%c0_12, %c0_13] : memref<1x64xf32, #tpu.memory_space<vmem>>, vector<1x64xf32>
      %33 = vector.broadcast %32 : vector<1x64xf32> to vector<256x64xf32>
      %34 = arith.mulf %31, %33 : vector<256x64xf32>
      %c0_14 = arith.constant 0 : index
      %c0_15 = arith.constant 0 : index
      %35 = vector.load %arg5[%c0_14, %c0_15] : memref<1x64xf32, #tpu.memory_space<vmem>>, vector<1x64xf32>
      %36 = vector.broadcast %35 : vector<1x64xf32> to vector<256x64xf32>
      %37 = arith.addf %34, %36 : vector<256x64xf32>
      %cst_16 = arith.constant 0.000000e+00 : f32
      %38 = vector.broadcast %cst_16 : f32 to vector<256x64xf32>
      %39 = arith.maximumf %37, %38 : vector<256x64xf32>
      %40 = arith.truncf %39 : vector<256x64xf32> to vector<256x64xbf16>
      %41 = vector.shape_cast %40 : vector<256x64xbf16> to vector<16x16x64xbf16>
      %cst_17 = arith.constant 0.000000e+00 : bf16
      %42 = vector.broadcast %cst_17 : bf16 to vector<16x1x64xbf16>
      %43 = tpu.concatenate %42, %41, %42 in 1 : vector<16x1x64xbf16>, vector<16x16x64xbf16>, vector<16x1x64xbf16> -> vector<16x18x64xbf16>
      %cst_18 = arith.constant 0.000000e+00 : bf16
      %44 = vector.broadcast %cst_18 : bf16 to vector<1x18x64xbf16>
      %45 = tpu.concatenate %44, %43, %44 in 0 : vector<1x18x64xbf16>, vector<16x18x64xbf16>, vector<1x18x64xbf16> -> vector<18x18x64xbf16>
      %46 = vector.extract_strided_slice %45 {offsets = [0, 0, 0], sizes = [16, 16, 64], strides = [1, 1, 1]} : vector<18x18x64xbf16> to vector<16x16x64xbf16>
      %47 = vector.shape_cast %46 : vector<16x16x64xbf16> to vector<256x64xbf16>
      %48 = vector.extract_strided_slice %45 {offsets = [0, 1, 0], sizes = [16, 16, 64], strides = [1, 1, 1]} : vector<18x18x64xbf16> to vector<16x16x64xbf16>
      %49 = vector.shape_cast %48 : vector<16x16x64xbf16> to vector<256x64xbf16>
      %50 = vector.extract_strided_slice %45 {offsets = [0, 2, 0], sizes = [16, 16, 64], strides = [1, 1, 1]} : vector<18x18x64xbf16> to vector<16x16x64xbf16>
      %51 = vector.shape_cast %50 : vector<16x16x64xbf16> to vector<256x64xbf16>
      %52 = vector.extract_strided_slice %45 {offsets = [1, 0, 0], sizes = [16, 16, 64], strides = [1, 1, 1]} : vector<18x18x64xbf16> to vector<16x16x64xbf16>
      %53 = vector.shape_cast %52 : vector<16x16x64xbf16> to vector<256x64xbf16>
      %54 = vector.extract_strided_slice %45 {offsets = [1, 1, 0], sizes = [16, 16, 64], strides = [1, 1, 1]} : vector<18x18x64xbf16> to vector<16x16x64xbf16>
      %55 = vector.shape_cast %54 : vector<16x16x64xbf16> to vector<256x64xbf16>
      %56 = vector.extract_strided_slice %45 {offsets = [1, 2, 0], sizes = [16, 16, 64], strides = [1, 1, 1]} : vector<18x18x64xbf16> to vector<16x16x64xbf16>
      %57 = vector.shape_cast %56 : vector<16x16x64xbf16> to vector<256x64xbf16>
      %58 = vector.extract_strided_slice %45 {offsets = [2, 0, 0], sizes = [16, 16, 64], strides = [1, 1, 1]} : vector<18x18x64xbf16> to vector<16x16x64xbf16>
      %59 = vector.shape_cast %58 : vector<16x16x64xbf16> to vector<256x64xbf16>
      %60 = vector.extract_strided_slice %45 {offsets = [2, 1, 0], sizes = [16, 16, 64], strides = [1, 1, 1]} : vector<18x18x64xbf16> to vector<16x16x64xbf16>
      %61 = vector.shape_cast %60 : vector<16x16x64xbf16> to vector<256x64xbf16>
      %62 = vector.extract_strided_slice %45 {offsets = [2, 2, 0], sizes = [16, 16, 64], strides = [1, 1, 1]} : vector<18x18x64xbf16> to vector<16x16x64xbf16>
      %63 = vector.shape_cast %62 : vector<16x16x64xbf16> to vector<256x64xbf16>
      %64 = tpu.concatenate %47, %49, %51, %53, %55, %57, %59, %61, %63 in 1 : vector<256x64xbf16>, vector<256x64xbf16>, vector<256x64xbf16>, vector<256x64xbf16>, vector<256x64xbf16>, vector<256x64xbf16>, vector<256x64xbf16>, vector<256x64xbf16>, vector<256x64xbf16> -> vector<256x576xbf16>
      %c0_19 = arith.constant 0 : index
      %c0_20 = arith.constant 0 : index
      %65 = vector.load %arg6[%c0_19, %c0_20] : memref<576x64xbf16, #tpu.memory_space<vmem>>, vector<576x64xbf16>
      %cst_21 = arith.constant dense<0.000000e+00> : vector<256x64xf32>
      %66 = tpu.matmul %64, %65, %cst_21 {dimension_numbers = #tpu.dot_dimension_numbers<[1], [0], [0], [1], [0, 0, 1, 1], [], []>} : vector<256x576xbf16>, vector<576x64xbf16>, vector<256x64xf32> -> vector<256x64xf32>
      %67 = arith.index_cast %1 : i32 to index
      %c0_22 = arith.constant 0 : index
      %68 = vector.load %arg14[%67, %c0_22] : memref<512x64xf32, #tpu.memory_space<vmem>>, vector<256x64xf32>
      tpu.vector_store %arg14[%67, %c0_22], %66 {strides = array<i32>} : memref<512x64xf32, #tpu.memory_space<vmem>>, vector<256x64xf32>,
      %cst_23 = arith.constant dense<0.000000e+00> : vector<64xf32>
      %69 = vector.multi_reduction <add>, %66, %cst_23 [0] : vector<256x64xf32> to vector<64xf32>
      %70 = vector.shape_cast %69 : vector<64xf32> to vector<1x64xf32>
      %cst_24 = arith.constant 3.906250e-03 : f32
      %71 = vector.broadcast %cst_24 : f32 to vector<1x64xf32>
      %72 = arith.mulf %70, %71 : vector<1x64xf32>
      %73 = vector.broadcast %72 : vector<1x64xf32> to vector<256x64xf32>
      %74 = arith.subf %66, %73 : vector<256x64xf32>
      %75 = arith.mulf %74, %74 : vector<256x64xf32>
      %cst_25 = arith.constant dense<0.000000e+00> : vector<64xf32>
      %76 = vector.multi_reduction <add>, %75, %cst_25 [0] : vector<256x64xf32> to vector<64xf32>
      %77 = vector.shape_cast %76 : vector<64xf32> to vector<1x64xf32>
      %c256_i32_26 = arith.constant 256 : i32
      %78 = arith.muli %arg1, %c256_i32_26 : i32
      %79 = arith.sitofp %78 : i32 to f32
      %cst_27 = arith.constant 2.560000e+02 : f32
      %80 = arith.addf %79, %cst_27 : f32
      %c0_28 = arith.constant 0 : index
      %c0_29 = arith.constant 0 : index
      %81 = vector.load %arg18[%c0_28, %c0_29] : memref<1x64xf32, #tpu.memory_space<vmem>>, vector<1x64xf32>
      %82 = arith.subf %72, %81 : vector<1x64xf32>
      %c0_30 = arith.constant 0 : index
      %c0_31 = arith.constant 0 : index
      %83 = vector.load %arg18[%c0_30, %c0_31] : memref<1x64xf32, #tpu.memory_space<vmem>>, vector<1x64xf32>
      %cst_32 = arith.constant 2.560000e+02 : f32
      %84 = arith.divf %cst_32, %80 : f32
      %85 = vector.broadcast %84 : f32 to vector<1x64xf32>
      %86 = arith.mulf %82, %85 : vector<1x64xf32>
      %87 = arith.addf %83, %86 : vector<1x64xf32>
      %c0_33 = arith.constant 0 : index
      %c0_34 = arith.constant 0 : index
      %88 = vector.load %arg18[%c0_33, %c0_34] : memref<1x64xf32, #tpu.memory_space<vmem>>, vector<1x64xf32>
      tpu.vector_store %arg18[%c0_33, %c0_34], %87 {strides = array<i32>} : memref<1x64xf32, #tpu.memory_space<vmem>>, vector<1x64xf32>,
      %c0_35 = arith.constant 0 : index
      %c0_36 = arith.constant 0 : index
      %89 = vector.load %arg19[%c0_35, %c0_36] : memref<1x64xf32, #tpu.memory_space<vmem>>, vector<1x64xf32>
      %90 = arith.addf %89, %77 : vector<1x64xf32>
      %91 = arith.mulf %82, %82 : vector<1x64xf32>
      %cst_37 = arith.constant 2.560000e+02 : f32
      %92 = arith.mulf %79, %cst_37 : f32
      %93 = arith.divf %92, %80 : f32
      %94 = vector.broadcast %93 : f32 to vector<1x64xf32>
      %95 = arith.mulf %91, %94 : vector<1x64xf32>
      %96 = arith.addf %90, %95 : vector<1x64xf32>
      %c0_38 = arith.constant 0 : index
      %c0_39 = arith.constant 0 : index
      %97 = vector.load %arg19[%c0_38, %c0_39] : memref<1x64xf32, #tpu.memory_space<vmem>>, vector<1x64xf32>
      tpu.vector_store %arg19[%c0_38, %c0_39], %96 {strides = array<i32>} : memref<1x64xf32, #tpu.memory_space<vmem>>, vector<1x64xf32>,
    } else {
    }
    %c2_i32 = arith.constant 2 : i32
    %13 = arith.cmpi eq, %arg0, %c2_i32 : i32
    %14 = arith.extui %13 : i1 to i32
    %c0_i32_5 = arith.constant 0 : i32
    %15 = arith.cmpi ne, %14, %c0_i32_5 : i32
    scf.if %15 {
      %19 = arith.index_cast %1 : i32 to index
      %c0 = arith.constant 0 : index
      %20 = vector.load %arg14[%19, %c0] : memref<512x64xf32, #tpu.memory_space<vmem>>, vector<256x64xf32>
      %c0_7 = arith.constant 0 : index
      %c0_8 = arith.constant 0 : index
      %21 = vector.load %arg19[%c0_7, %c0_8] : memref<1x64xf32, #tpu.memory_space<vmem>>, vector<1x64xf32>
      %cst = arith.constant 0.001953125 : f32
      %22 = vector.broadcast %cst : f32 to vector<1x64xf32>
      %23 = arith.mulf %21, %22 : vector<1x64xf32>
      %cst_9 = arith.constant 9.99999974E-6 : f32
      %24 = vector.broadcast %cst_9 : f32 to vector<1x64xf32>
      %25 = arith.addf %23, %24 : vector<1x64xf32>
      %26 = math.rsqrt %25 : vector<1x64xf32>
      %c0_10 = arith.constant 0 : index
      %c0_11 = arith.constant 0 : index
      %27 = vector.load %arg18[%c0_10, %c0_11] : memref<1x64xf32, #tpu.memory_space<vmem>>, vector<1x64xf32>
      %28 = vector.broadcast %27 : vector<1x64xf32> to vector<256x64xf32>
      %29 = arith.subf %20, %28 : vector<256x64xf32>
      %30 = vector.broadcast %26 : vector<1x64xf32> to vector<256x64xf32>
      %31 = arith.mulf %29, %30 : vector<256x64xf32>
      %c0_12 = arith.constant 0 : index
      %c0_13 = arith.constant 0 : index
      %32 = vector.load %arg7[%c0_12, %c0_13] : memref<1x64xf32, #tpu.memory_space<vmem>>, vector<1x64xf32>
      %33 = vector.broadcast %32 : vector<1x64xf32> to vector<256x64xf32>
      %34 = arith.mulf %31, %33 : vector<256x64xf32>
      %c0_14 = arith.constant 0 : index
      %c0_15 = arith.constant 0 : index
      %35 = vector.load %arg8[%c0_14, %c0_15] : memref<1x64xf32, #tpu.memory_space<vmem>>, vector<1x64xf32>
      %36 = vector.broadcast %35 : vector<1x64xf32> to vector<256x64xf32>
      %37 = arith.addf %34, %36 : vector<256x64xf32>
      %cst_16 = arith.constant 0.000000e+00 : f32
      %38 = vector.broadcast %cst_16 : f32 to vector<256x64xf32>
      %39 = arith.maximumf %37, %38 : vector<256x64xf32>
      %40 = arith.truncf %39 : vector<256x64xf32> to vector<256x64xbf16>
      %c0_17 = arith.constant 0 : index
      %c0_18 = arith.constant 0 : index
      %41 = vector.load %arg9[%c0_17, %c0_18] : memref<64x256xbf16, #tpu.memory_space<vmem>>, vector<64x256xbf16>
      %cst_19 = arith.constant dense<0.000000e+00> : vector<256x256xf32>
      %42 = tpu.matmul %40, %41, %cst_19 {dimension_numbers = #tpu.dot_dimension_numbers<[1], [0], [0], [1], [0, 0, 1, 1], [], []>} : vector<256x64xbf16>, vector<64x256xbf16>, vector<256x256xf32> -> vector<256x256xf32>
      %43 = arith.index_cast %1 : i32 to index
      %c0_20 = arith.constant 0 : index
      %44 = vector.load %arg15[%43, %c0_20] : memref<512x256xf32, #tpu.memory_space<vmem>>, vector<256x256xf32>
      tpu.vector_store %arg15[%43, %c0_20], %42 {strides = array<i32>} : memref<512x256xf32, #tpu.memory_space<vmem>>, vector<256x256xf32>,
      %cst_21 = arith.constant dense<0.000000e+00> : vector<256xf32>
      %45 = vector.multi_reduction <add>, %42, %cst_21 [0] : vector<256x256xf32> to vector<256xf32>
      %46 = vector.shape_cast %45 : vector<256xf32> to vector<1x256xf32>
      %cst_22 = arith.constant 3.906250e-03 : f32
      %47 = vector.broadcast %cst_22 : f32 to vector<1x256xf32>
      %48 = arith.mulf %46, %47 : vector<1x256xf32>
      %49 = vector.broadcast %48 : vector<1x256xf32> to vector<256x256xf32>
      %50 = arith.subf %42, %49 : vector<256x256xf32>
      %51 = arith.mulf %50, %50 : vector<256x256xf32>
      %cst_23 = arith.constant dense<0.000000e+00> : vector<256xf32>
      %52 = vector.multi_reduction <add>, %51, %cst_23 [0] : vector<256x256xf32> to vector<256xf32>
      %53 = vector.shape_cast %52 : vector<256xf32> to vector<1x256xf32>
      %c256_i32_24 = arith.constant 256 : i32
      %54 = arith.muli %arg1, %c256_i32_24 : i32
      %55 = arith.sitofp %54 : i32 to f32
      %cst_25 = arith.constant 2.560000e+02 : f32
      %56 = arith.addf %55, %cst_25 : f32
      %c0_26 = arith.constant 0 : index
      %c0_27 = arith.constant 0 : index
      %57 = vector.load %arg20[%c0_26, %c0_27] : memref<1x256xf32, #tpu.memory_space<vmem>>, vector<1x256xf32>
      %58 = arith.subf %48, %57 : vector<1x256xf32>
      %c0_28 = arith.constant 0 : index
      %c0_29 = arith.constant 0 : index
      %59 = vector.load %arg20[%c0_28, %c0_29] : memref<1x256xf32, #tpu.memory_space<vmem>>, vector<1x256xf32>
      %cst_30 = arith.constant 2.560000e+02 : f32
      %60 = arith.divf %cst_30, %56 : f32
      %61 = vector.broadcast %60 : f32 to vector<1x256xf32>
      %62 = arith.mulf %58, %61 : vector<1x256xf32>
      %63 = arith.addf %59, %62 : vector<1x256xf32>
      %c0_31 = arith.constant 0 : index
      %c0_32 = arith.constant 0 : index
      %64 = vector.load %arg20[%c0_31, %c0_32] : memref<1x256xf32, #tpu.memory_space<vmem>>, vector<1x256xf32>
      tpu.vector_store %arg20[%c0_31, %c0_32], %63 {strides = array<i32>} : memref<1x256xf32, #tpu.memory_space<vmem>>, vector<1x256xf32>,
      %c0_33 = arith.constant 0 : index
      %c0_34 = arith.constant 0 : index
      %65 = vector.load %arg21[%c0_33, %c0_34] : memref<1x256xf32, #tpu.memory_space<vmem>>, vector<1x256xf32>
      %66 = arith.addf %65, %53 : vector<1x256xf32>
      %67 = arith.mulf %58, %58 : vector<1x256xf32>
      %cst_35 = arith.constant 2.560000e+02 : f32
      %68 = arith.mulf %55, %cst_35 : f32
      %69 = arith.divf %68, %56 : f32
      %70 = vector.broadcast %69 : f32 to vector<1x256xf32>
      %71 = arith.mulf %67, %70 : vector<1x256xf32>
      %72 = arith.addf %66, %71 : vector<1x256xf32>
      %c0_36 = arith.constant 0 : index
      %c0_37 = arith.constant 0 : index
      %73 = vector.load %arg21[%c0_36, %c0_37] : memref<1x256xf32, #tpu.memory_space<vmem>>, vector<1x256xf32>
      tpu.vector_store %arg21[%c0_36, %c0_37], %72 {strides = array<i32>} : memref<1x256xf32, #tpu.memory_space<vmem>>, vector<1x256xf32>,
    } else {
    }
    %c3_i32 = arith.constant 3 : i32
    %16 = arith.cmpi eq, %arg0, %c3_i32 : i32
    %17 = arith.extui %16 : i1 to i32
    %c0_i32_6 = arith.constant 0 : i32
    %18 = arith.cmpi ne, %17, %c0_i32_6 : i32
    scf.if %18 {
      %19 = arith.index_cast %1 : i32 to index
      %c0 = arith.constant 0 : index
      %20 = vector.load %arg15[%19, %c0] : memref<512x256xf32, #tpu.memory_space<vmem>>, vector<256x256xf32>
      %c0_7 = arith.constant 0 : index
      %c0_8 = arith.constant 0 : index
      %21 = vector.load %arg21[%c0_7, %c0_8] : memref<1x256xf32, #tpu.memory_space<vmem>>, vector<1x256xf32>
      %cst = arith.constant 0.001953125 : f32
      %22 = vector.broadcast %cst : f32 to vector<1x256xf32>
      %23 = arith.mulf %21, %22 : vector<1x256xf32>
      %cst_9 = arith.constant 9.99999974E-6 : f32
      %24 = vector.broadcast %cst_9 : f32 to vector<1x256xf32>
      %25 = arith.addf %23, %24 : vector<1x256xf32>
      %26 = math.rsqrt %25 : vector<1x256xf32>
      %c0_10 = arith.constant 0 : index
      %c0_11 = arith.constant 0 : index
      %27 = vector.load %arg20[%c0_10, %c0_11] : memref<1x256xf32, #tpu.memory_space<vmem>>, vector<1x256xf32>
      %28 = vector.broadcast %27 : vector<1x256xf32> to vector<256x256xf32>
      %29 = arith.subf %20, %28 : vector<256x256xf32>
      %30 = vector.broadcast %26 : vector<1x256xf32> to vector<256x256xf32>
      %31 = arith.mulf %29, %30 : vector<256x256xf32>
      %c0_12 = arith.constant 0 : index
      %c0_13 = arith.constant 0 : index
      %32 = vector.load %arg10[%c0_12, %c0_13] : memref<1x256xf32, #tpu.memory_space<vmem>>, vector<1x256xf32>
      %33 = vector.broadcast %32 : vector<1x256xf32> to vector<256x256xf32>
      %34 = arith.mulf %31, %33 : vector<256x256xf32>
      %c0_14 = arith.constant 0 : index
      %c0_15 = arith.constant 0 : index
      %35 = vector.load %arg11[%c0_14, %c0_15] : memref<1x256xf32, #tpu.memory_space<vmem>>, vector<1x256xf32>
      %36 = vector.broadcast %35 : vector<1x256xf32> to vector<256x256xf32>
      %37 = arith.addf %34, %36 : vector<256x256xf32>
      %c0_16 = arith.constant 0 : index
      %c0_17 = arith.constant 0 : index
      %38 = vector.load %arg2[%c0_16, %c0_17] : memref<256x256xf32, #tpu.memory_space<vmem>>, vector<256x256xf32>
      %39 = arith.addf %37, %38 : vector<256x256xf32>
      %cst_18 = arith.constant 0.000000e+00 : f32
      %40 = vector.broadcast %cst_18 : f32 to vector<256x256xf32>
      %41 = arith.maximumf %39, %40 : vector<256x256xf32>
      %c0_19 = arith.constant 0 : index
      %c0_20 = arith.constant 0 : index
      %42 = vector.load %arg12[%c0_19, %c0_20] : memref<256x256xf32, #tpu.memory_space<vmem>>, vector<256x256xf32>
      tpu.vector_store %arg12[%c0_19, %c0_20], %41 {strides = array<i32>} : memref<256x256xf32, #tpu.memory_space<vmem>>, vector<256x256xf32>,
    } else {
    }
    return
  }
  func.func @transform_0(%arg0: i32, %arg1: i32) -> (i32, i32) {
    %c0_i32 = arith.constant 0 : i32
    %0 = arith.cmpi eq, %arg0, %c0_i32 : i32
    %c3_i32 = arith.constant 3 : i32
    %1 = arith.cmpi eq, %arg0, %c3_i32 : i32
    %2 = arith.ori %0, %1 : i1
    %c0_i32_0 = arith.constant 0 : i32
    %3 = arith.select %2, %arg1, %c0_i32_0 : i32
    %c0_i32_1 = arith.constant 0 : i32
    %c0_i32_2 = arith.constant 0 : i32
    return %3, %c0_i32_1 : i32, i32
  }
  func.func @transform_1(%arg0: i32, %arg1: i32) -> (i32, i32) {
    %c0_i32 = arith.constant 0 : i32
    %c0_i32_0 = arith.constant 0 : i32
    %c0_i32_1 = arith.constant 0 : i32
    return %c0_i32, %c0_i32_0 : i32, i32
  }
  func.func @transform_2(%arg0: i32, %arg1: i32) -> (i32, i32) {
    %c0_i32 = arith.constant 0 : i32
    %c0_i32_0 = arith.constant 0 : i32
    %c0_i32_1 = arith.constant 0 : i32
    return %c0_i32, %c0_i32_0 : i32, i32
  }
  func.func @transform_3(%arg0: i32, %arg1: i32) -> (i32, i32) {
    %c0_i32 = arith.constant 0 : i32
    %c0_i32_0 = arith.constant 0 : i32
    %c0_i32_1 = arith.constant 0 : i32
    return %c0_i32, %c0_i32_0 : i32, i32
  }
  func.func @transform_4(%arg0: i32, %arg1: i32) -> (i32, i32) {
    %c0_i32 = arith.constant 0 : i32
    %c0_i32_0 = arith.constant 0 : i32
    %c0_i32_1 = arith.constant 0 : i32
    return %c0_i32, %c0_i32_0 : i32, i32
  }
  func.func @transform_5(%arg0: i32, %arg1: i32) -> (i32, i32) {
    %c0_i32 = arith.constant 0 : i32
    %c0_i32_0 = arith.constant 0 : i32
    %c0_i32_1 = arith.constant 0 : i32
    return %c0_i32, %c0_i32_0 : i32, i32
  }
  func.func @transform_6(%arg0: i32, %arg1: i32) -> (i32, i32) {
    %c0_i32 = arith.constant 0 : i32
    %c0_i32_0 = arith.constant 0 : i32
    %c0_i32_1 = arith.constant 0 : i32
    return %c0_i32, %c0_i32_0 : i32, i32
  }
  func.func @transform_7(%arg0: i32, %arg1: i32) -> (i32, i32) {
    %c0_i32 = arith.constant 0 : i32
    %c0_i32_0 = arith.constant 0 : i32
    %c0_i32_1 = arith.constant 0 : i32
    return %c0_i32, %c0_i32_0 : i32, i32
  }
  func.func @transform_8(%arg0: i32, %arg1: i32) -> (i32, i32) {
    %c0_i32 = arith.constant 0 : i32
    %c0_i32_0 = arith.constant 0 : i32
    %c0_i32_1 = arith.constant 0 : i32
    return %c0_i32, %c0_i32_0 : i32, i32
  }
  func.func @transform_9(%arg0: i32, %arg1: i32) -> (i32, i32) {
    %c0_i32 = arith.constant 0 : i32
    %c0_i32_0 = arith.constant 0 : i32
    %c0_i32_1 = arith.constant 0 : i32
    return %c0_i32, %c0_i32_0 : i32, i32
  }
  func.func @transform_10(%arg0: i32, %arg1: i32) -> (i32, i32) {
    %c3_i32 = arith.constant 3 : i32
    %0 = arith.cmpi eq, %arg0, %c3_i32 : i32
    %c0_i32 = arith.constant 0 : i32
    %1 = arith.select %0, %arg1, %c0_i32 : i32
    %c0_i32_0 = arith.constant 0 : i32
    %c0_i32_1 = arith.constant 0 : i32
    return %1, %c0_i32_0 : i32, i32
  }
}

</mosaic_0001>

<bundles_post_ra>
// kernel: tpu_custom_call.1
= control target key start
LH: loop header
LB: loop body
LE: loop exit
PB: predicated region body
PF: predicated region fallthrough
CT: control target
= control target key end

     0   :  { %s9618_s0 = inlined_call_operand.hbm [shape: f32[512,256], index: 0, kind: input, shape index: {}]   ;;  %s9619_s1 = inlined_call_operand.vmem [shape: bf16[256,64], index: 1, kind: input, shape index: {}]   ;;  %s9620_s2 = inlined_call_operand.vmem [shape: f32[1,64], index: 2, kind: input, shape index: {}]   ;;  %s9621_s3 = inlined_call_operand.vmem [shape: f32[1,64], index: 3, kind: input, shape index: {}]   ;;  %s9622_s4 = inlined_call_operand.vmem [shape: bf16[576,64], index: 4, kind: input, shape index: {}]   ;;  %s9623_s5 = inlined_call_operand.vmem [shape: f32[1,64], index: 5, kind: input, shape index: {}]   ;;  %s9624_s6 = inlined_call_operand.vmem [shape: f32[1,64], index: 6, kind: input, shape index: {}]   ;;  %s9625_s7 = inlined_call_operand.vmem [shape: bf16[64,256], index: 7, kind: input, shape index: {}]   ;;  %s9626_s8 = inlined_call_operand.vmem [shape: f32[1,256], index: 8, kind: input, shape index: {}]   ;;  %s9627_s9 = inlined_call_operand.vmem [shape: f32[1,256], index: 9, kind: input, shape index: {}]   ;;  %s9628_s10 = inlined_call_operand.hbm [shape: f32[512,256], index: 10, kind: output, shape index: {}]  }
   0x1   :  { %9660 = sst [smem:[#allocation43_spill]] %s9623_s5 }
   0x2   :  { %9661 = sst [smem:[#allocation44_spill]] %s9624_s6 }
   0x3   :  { %9662 = sst [smem:[#allocation45_spill]] %s9625_s7 }
   0x4   :  { %9663 = sst [smem:[#allocation46_spill]] %s9626_s8 }
   0x5   :  { %9664 = sst [smem:[#allocation47_spill]] %s9627_s9 }
   0x6   :  { %9665 = sst [smem:[#allocation48_spill]] %s9628_s10 }
   0x7   :  { %15 = vsyncpa [#allocation12], 0 }
   0x8   :  { %17 = vsyncpa [#allocation12 + $0x1], 0 }
   0x9   :  { %18 = vsyncpa [#allocation13], 0 }
   0xa   :  { %20 = vsyncpa [#allocation13 + $0x1], 0  ;;  %s5845_s13 = smov 0   ;;  %s5847_s14 = smov 0  }
   0xb   :  { %s5849_s15 = smov 0   ;;  %s5851_s16 = smov 0  }
   0xc   :  { %s5853_s17 = smov 0   ;;  %s5855_s18 = smov 0  }
   0xd   :  { %s5857_s19 = smov 0   ;;  %s5859_s20 = smov 0  }
   0xe   :  { %s5861_s21 = smov 0   ;;  %s5863_s22 = smov 0  }
   0xf   :  { %s5865_s23 = smov 0  }
  0x10 LB: > { %9666 = sst [smem:[#allocation17_spill]] %s5769_s21  ;;  %s4862_s24 = sadd.s32 4294967295, %s5777_s23   ;;  %s5777_s23 = sphi %s5865_s23, %s26_s23   ;;  %s5773_s22 = sphi %s5863_s22, %s9777_s22   ;;  %s5769_s21 = sphi %s5861_s21, %s9776_s21   ;;  %s5765_s20 = sphi %s5859_s20, %s9775_s20   ;;  %s5761_s19 = sphi %s5857_s19, %s9774_s19   ;;  %s5757_s18 = sphi %s5855_s18, %s9783_s18   ;;  %s5753_s17 = sphi %s5853_s17, %s9782_s17   ;;  %s5749_s16 = sphi %s5851_s16, %s9781_s16   ;;  %s5745_s15 = sphi %s5849_s15, %s9780_s15   ;;  %s5741_s14 = sphi %s5847_s14, %s9779_s14   ;;  %s5737_s13 = sphi %s5845_s13, %s9778_s13  }
  0x11   : > { %9667 = sst [smem:[#allocation18_spill]] %s5773_s22  ;;  %s35_s26 = sadd.s32 1, %s5769_s21 }
  0x12   : > { %s38_s27 = sadd.s32 1, %s5773_s22  ;;  %p36_p0 = scmp.ge.s32.totalorder %s35_s26, 2 }
  0x13   : > { %p42_p1 = scmp.eq.s32.totalorder %s5773_s22, 0  ;;  %p43_p2 = scmp.eq.s32.totalorder %s5773_s22, 3 }
  0x14   : > { %s53_s28 = sadd.s32 1, %s5757_s18  ;;  %s9785_s26 = smov (%p36_p0, %s35_s26), 0 }
  0x15   : > { %9668 = sst [smem:[#allocation19_spill]] %s9785_s26  ;;  %s9787_s27 = smov (!%p36_p0, %s38_s27), %s5773_s22 }
  0x16   : > { %p44_p3 = por %p43_p2, %p42_p1  ;;  %p60_p4 = scmp.ne.s32.totalorder %s5757_s18, %s5753_s17 }
  0x17   : > { %p40_p5 = scmp.ge.s32.totalorder %s9787_s27, 4  ;;  %p61_p6 = scmp.eq.s32.totalorder %s5777_s23, 0 }
  0x18   : > { %s5916_s29 = scalar_select %p44_p3, %s5769_s21, 0 }
  0x19   : > { %s9789_s27 = smov (%p40_p5, %s9787_s27), 0  ;;  %p5920_p7 = por %p61_p6, %p60_p4 }
  0x1a   : > { %9669 = sst [smem:[#allocation20_spill]] %s9789_s27  ;;  %p66_p8 = scmp.ne.s32.totalorder %s5753_s17, %s5749_s16 }
  0x1b   : > { %p46_p9 = scmp.eq.s32.totalorder %s9789_s27, 0  ;;  %p47_p10 = scmp.eq.s32.totalorder %s9789_s27, 3 }
  0x1c   : > { %p67_p11 = scmp.eq.s32.totalorder %s4862_s24, 0  ;;  %s272_s11 = sadd.s32 1, %s5745_s15 }
  0x1d   : > { %p48_p12 = por %p47_p10, %p46_p9  ;;  %p282_p13 = scmp.ne.s32.totalorder %s5745_s15, %s5741_s14 }
  0x1e   : > { %p5931_p0 = por %p67_p11, %p66_p8  ;;  %p283_p1 = scmp.eq.s32.totalorder %s4862_s24, 7 }
  0x1f   : > { %s49_s25 = scalar_select %p48_p12, %s9785_s26, 0 }
  0x20   : > { %s266_s16 = scalar_select %p43_p2, %s5769_s21, 0 }
  0x21   : > { %s50_s10 = ssub.s32 %s5916_s29, %s49_s25  ;;  %p5940_p3 = por %p283_p1, %p282_p13 }
  0x22   : > { %p51_p4 = scmp.eq.s32.totalorder %s50_s10, 0  ;;  %p288_p5 = scmp.ne.s32.totalorder %s5741_s14, %s5737_s13 }
  0x23   : > { %s9672_s27 = scalar_select %p5940_p3, 1, 0 }
  0x24   : > { %s268_s9 = scalar_select %p47_p10, %s9785_s26, 0 }
  0x25   : > { %9673 = sst [smem:[#allocation21_spill]] %s9672_s27  ;;  %s9674_s5 = sadd.s32 4294967294, %s5777_s23  }
  0x26   : > { %s5948_s8 = scalar_select %p51_p4, %s5757_s18, %s53_s28  }
  0x27   : > { %s269_s6 = ssub.s32 %s266_s16, %s268_s9  ;;  %p289_p6 = scmp.eq.s32.totalorder %s9674_s5, 7 }
  0x28   : > { %p270_p8 = scmp.eq.s32.totalorder %s269_s6, 0  ;;  %p5450_p2 = scmp.lt.s32.totalorder %s5777_s23, 8 }
  0x29   : > { %p5952_p9 = por %p289_p6, %p288_p5  ;;  %s336_s22 = sand.u32 1, %s5757_s18  }
  0x2a   : > { %s5958_s25 = scalar_select %p270_p8, %s5745_s15, %s272_s11  }
  0x2b   : > { %s9675_s24 = scalar_select %p5952_p9, 1, 0 }
  0x2c   : > { %s4991_s21 = sshll.u32 %s5916_s29, 13  ;;  %s4866_s27 = sshll.u32 %s336_s22, 9 }
  0x2d   : > { %s5965_s26 = scalar_lea.hbm %s9618_s0, %s4991_s21  ;;  %s340_s5 = scalar_lea.vmem [#allocation11], %s4866_s27 }
  0x2e   : > { %s352_s6 = sshll.u32 %s340_s5, 4  ;;  %p5969_p10 = pnand %p5450_p2, %p5920_p7  ;;  %s5973_s6 = int_to_ptr.vmem [resolvable:$true] %s352_s6 }
  0x2f   : > { %s5975_s28 = scalar_lea.sflag [#allocation12], %s336_s22  ;;  %s5625_s7 = scalar_lea.hbm %s5965_s26, 8192 }
  0x30   : > { %p5626_p11 = scmp.ne.s32.totalorder %s5965_s26, %s5625_s7  ;;  %p5627_p12 = pneg %p5969_p10 }
  0x31   : > { %s5630_s29 = scalar_lea.hbm %s9618_s0, 16384  ;;  %p5631_p7 = scmp.lt.u32.totalorder %s5965_s26, %s9618_s0 }
  0x32   : > { %p5628_p13 = pnand %p5627_p12, %p5626_p11  ;;  %p5632_p4 = scmp.lt.u32.totalorder %s5630_s29, %s5625_s7 }
  0x33   : > { %p5634_p6 = scmp.lt.u32.totalorder %s5625_s7, %s5965_s26 }
  0x34   : > { %p5629_p1 = pneg %p5628_p13  ;;  %p5633_p5 = por %p5632_p4, %p5631_p7 }
  0x36   : > { %p5635_p8 = por %p5634_p6, %p5633_p5 }
  0x38   : > { %p5636_p2 = pnand %p5635_p8, %p5629_p1 }
  0x3a   : > { %5639 = shalt.err (!%p5636_p2)
}
  0x3b   : > { %s5640_s22 = scalar_lea.vmem %s5973_s6, 8192  ;;  %s5779_s16 = smov [#allocation11]  }
  0x3c   : > { %p5641_p11 = scmp.ne.s32.totalorder %s5973_s6, %s5640_s22  ;;  %s5645_s10 = sshll.u32 %s5779_s16, 4  ;;  %s5646_s10 = int_to_ptr.vmem [resolvable:$false] %s5645_s10 }
  0x3d   : > { %s5647_s5 = scalar_lea.vmem %s5646_s10, 16384  ;;  %p5648_p3 = scmp.lt.s32.totalorder %s5973_s6, %s5646_s10 }
  0x3e   : > { %p5643_p13 = pnand %p5641_p11, %p5627_p12  ;;  %p5649_p7 = scmp.lt.s32.totalorder %s5647_s5, %s5640_s22 }
  0x40   : > { %p5644_p9 = pneg %p5643_p13  ;;  %p5650_p4 = por %p5649_p7, %p5648_p3 }
  0x42   : > { %p5651_p5 = pnand %p5650_p4, %p5644_p9 }
  0x44   : > { %5654 = shalt.err (!%p5651_p5)
}
  0x45   : > { %s5780_s7 = smov 256   ;;  %s5781_s21 = smov 16  }
  0x46   : > { %5445 = dma.hbm_to_vmem [thread:$0]  (!%p5969_p10), %s5965_s26, 8192, %s5973_s6, %s5975_s28, %s5780_s7, %s5780_s7, %s5781_s21  }
  0x47   : > { %p4870_p12 = scmp.ge.s32.totalorder %s5777_s23, 1  ;;  %p360_p1 = scmp.lt.s32.totalorder %s5777_s23, 9 }
  0x49   : > { %p361_p6 = pnand %p4870_p12, %p360_p1 }
  0x4a   : > { %s366_s27 = sand.u32 (!%p361_p6), 1, %s5753_s17  }
  0x4b   : > { %364 = sbr.rel (%p361_p6) target bundleno = 1809 (0x711), region = 60  ;;  %s4871_s29 = sshll.u32 (!%p361_p6), %s366_s27, 9 }
  0x4c   : > { %s367_s30 = scalar_lea.sflag (!%p361_p6), [#allocation12], %s366_s27  ;;  %s6006_s11 = scalar_lea.vmem (!%p361_p6), [#allocation11], %s4871_s29 }
  0x52   : > { %5728 = dma.done.wait (%p5931_p0), %s367_s30, 8192  }
  0x53   : > { %5730 = vsyncadd (%p5931_p0), %s367_s30, 4294959104  ;;  %s404_s26 = sand.u32 1, %s5741_s14   ;;  %s6014_s6 = sshll.u32 %s5761_s19, 8 }
  0x54   : > { %s4872_s9 = sshll.u32 %s404_s26, 9  ;;  %p417_p3 = scmp.eq.s32.totalorder %s5765_s20, 0 }
  0x55   : > { %p418_p9 = scmp.eq.s32.totalorder %s5761_s19, 0  ;;  %s6020_s28 = scalar_lea.vmem [#allocation14], %s4872_s9 }
  0x57   : > { %p419_p10 = pnand %p418_p9, %p417_p3 }
  0x58   : > { %vm423_vm0 = vcmask (!%p419_p10), 516096   ;;  %v428_v0 = vlaneseq (!%p419_p10)  ;;  %v5782_v1 = vmov (!%p419_p10), 0.0  }
  0x59   : > { %422 = sbr.rel (%p419_p10) target bundleno = 96 (0x60), region = 68  ;;  %424 = vst.msk [vmem:[#allocation5] sm:$0x1] (!%p419_p10), %vm423_vm0, %v5782_v1  ;;  %425 = vst.msk [vmem:[#allocation6] sm:$0x1] (!%p419_p10), %vm423_vm0, %v5782_v1 }
  0x5a   : > { %426 = vst.msk [vmem:[#allocation7] sm:$0x1] (!%p419_p10), %vm423_vm0, %v5782_v1  ;;  %427 = vst.msk [vmem:[#allocation8] sm:$0x1] (!%p419_p10), %vm423_vm0, %v5782_v1  ;;  %vm430_vm1 = vcmp.lt.s32.totalorder (!%p419_p10), %v428_v0, 256 }
  0x5b   : > { %432 = vst.msk [vmem:[#allocation9] sm:$0x3] (!%p419_p10), %vm430_vm1, %v5782_v1  ;;  %433 = vst.msk [vmem:[#allocation10] sm:$0x3] (!%p419_p10), %vm430_vm1, %v5782_v1 }
  0x60 PF: > { %p4874_p0 = scmp.ne.s32.totalorder %s5765_s20, 0 }
  0x61   : > { %v5549_v2 = vld [vmem:[%s9619_s1 + $0x40] sm:$0xff] (!%p4874_p0)   ;;  %v5551_v4 = vld [vmem:[%s9619_s1 + $0x48] sm:$0xff] (!%p4874_p0)   ;;  %v5553_v6 = vld [vmem:[%s9619_s1 + $0x50] sm:$0xff] (!%p4874_p0)   ;;  %s1059_s9 = scvt.s32.f32 (!%p4874_p0), %s6014_s6  ;;  %vm823_vm2 = vcmask (!%p4874_p0), 523264   ;;  %s6143_s22 = scalar_lea.vmem (!%p4874_p0), [#allocation2], %s6014_s6  ;;  %vm1070_vm3 = vcmask (!%p4874_p0), 516096  }
  0x62   : > { %436 = sbr.rel (%p4874_p0) target bundleno = 538 (0x21a), region = 72  ;;  %v5550_v3 = vld [vmem:[%s9619_s1] sm:$0xff] (!%p4874_p0)   ;;  %4996 = vmatprep.subr.bf16.mxu0 (!%p4874_p0), %v5549_v2  ;;  %5392 = vmatprep.subr.bf16.mxu1 (!%p4874_p0), %v5549_v2  ;;  %v5552_v5 = vld [vmem:[%s9619_s1 + $0x8] sm:$0xff] (!%p4874_p0)   ;;  %v5554_v7 = vld [vmem:[%s9619_s1 + $0x10] sm:$0xff] (!%p4874_p0)  }
  0x63   : > { %4997 = vmatpush3.bf16.msra.mxu0 (!%p4874_p0), %v5550_v3  ;;  %5400 = vmatpush3.bf16.msra.mxu1 (!%p4874_p0), %v5550_v3  ;;  %v5555_v8 = vld [vmem:[%s9619_s1 + $0x58] sm:$0xff] (!%p4874_p0)   ;;  %v5557_v10 = vld [vmem:[%s9619_s1 + $0x60] sm:$0xff] (!%p4874_p0)   ;;  %v5559_v12 = vld [vmem:[%s9619_s1 + $0x68] sm:$0xff] (!%p4874_p0)   ;;  %s1060_s12 = sadd.f32 (!%p4874_p0), 256.0, %s1059_s9  ;;  %s1075_s10 = smul.f32 (!%p4874_p0), 256.0, %s1059_s9 }
  0x64   : > { %4998 = vmatprep.subr.bf16.mxu0 (!%p4874_p0), %v5551_v4  ;;  %5393 = vmatprep.subr.bf16.mxu1 (!%p4874_p0), %v5551_v4  ;;  %v5556_v9 = vld [vmem:[%s9619_s1 + $0x18] sm:$0xff] (!%p4874_p0)   ;;  %v5558_v11 = vld [vmem:[%s9619_s1 + $0x20] sm:$0xff] (!%p4874_p0)   ;;  %v438_v13 = vld [vmem:[%s6006_s11 + $0x8] sm:$0xff] (!%p4874_p0) }
  0x65   : > { %v440_v14 = vld [vmem:[%s6006_s11 + $0x18] sm:$0xff] (!%p4874_p0)  ;;  %v5560_v16 = vld [vmem:[%s9619_s1 + $0x28] sm:$0xff] (!%p4874_p0)   ;;  %v5561_v17 = vld [vmem:[%s9619_s1 + $0x70] sm:$0xff] (!%p4874_p0)  }
  0x66   : > { %v502_v15 = vpack.c.bf16 (!%p4874_p0), %v440_v14, %v438_v13  ;;  %v470_v18 = vld [vmem:[%s6006_s11 + $0x108] sm:$0xff] (!%p4874_p0)  ;;  %v472_v19 = vld [vmem:[%s6006_s11 + $0x118] sm:$0xff] (!%p4874_p0)  ;;  %v5563_v22 = vld [vmem:[%s9619_s1 + $0x78] sm:$0xff] (!%p4874_p0)  }
  0x67   : > { %4999 = vmatpush3.bf16.msra.mxu0 (!%p4874_p0), %v5552_v5  ;;  %5401 = vmatpush3.bf16.msra.mxu1 (!%p4874_p0), %v5552_v5  ;;  %v518_v20 = vpack.c.bf16 (!%p4874_p0), %v472_v19, %v470_v18  ;;  %v5562_v21 = vld [vmem:[%s9619_s1 + $0x30] sm:$0xff] (!%p4874_p0)   ;;  %v5564_v23 = vld [vmem:[%s9619_s1 + $0x38] sm:$0xff] (!%p4874_p0)   ;;  %v437_v24 = vld [vmem:[%s6006_s11] sm:$0xff] (!%p4874_p0) }
  0x68   : > { %5000 = vmatprep.subr.bf16.mxu0 (!%p4874_p0), %v5553_v6  ;;  %5394 = vmatprep.subr.bf16.mxu1 (!%p4874_p0), %v5553_v6  ;;  %v439_v25 = vld [vmem:[%s6006_s11 + $0x10] sm:$0xff] (!%p4874_p0)  ;;  %v442_v26 = vld [vmem:[%s6006_s11 + $0x28] sm:$0xff] (!%p4874_p0)  ;;  %v444_v27 = vld [vmem:[%s6006_s11 + $0x38] sm:$0xff] (!%p4874_p0) }
  0x69   : > { %693 = vmatprep.mubr.bf16.mxu0 %v502_v15  ;;  %757 = vmatprep.mubr.bf16.mxu1 %v518_v20  ;;  %v469_v28 = vld [vmem:[%s6006_s11 + $0x100] sm:$0xff]  ;;  %v471_v29 = vld [vmem:[%s6006_s11 + $0x110] sm:$0xff]  ;;  %v474_v30 = vld [vmem:[%s6006_s11 + $0x128] sm:$0xff]  ;;  %v501_v32 = vpack.c.bf16 %v439_v25, %v437_v24  ;;  %v504_v33 = vpack.c.bf16 %v444_v27, %v442_v26 }
  0x6a   : > { %v476_v31 = vld [vmem:[%s6006_s11 + $0x138] sm:$0xff]  ;;  %v517_v34 = vpack.c.bf16 %v471_v29, %v469_v28  ;;  %v441_v36 = vld [vmem:[%s6006_s11 + $0x20] sm:$0xff]  ;;  %v443_v37 = vld [vmem:[%s6006_s11 + $0x30] sm:$0xff] }
  0x6b   : > { %5001 = vmatpush3.bf16.msra.mxu0 %v5554_v7  ;;  %5402 = vmatpush3.bf16.msra.mxu1 %v5554_v7  ;;  %v520_v35 = vpack.c.bf16 %v476_v31, %v474_v30  ;;  %v446_v38 = vld [vmem:[%s6006_s11 + $0x48] sm:$0xff]  ;;  %v448_v39 = vld [vmem:[%s6006_s11 + $0x58] sm:$0xff]  ;;  %v473_v40 = vld [vmem:[%s6006_s11 + $0x120] sm:$0xff]  ;;  %v503_v44 = vpack.c.bf16 %v443_v37, %v441_v36 }
  0x6c   : > { %5002 = vmatprep.subr.bf16.mxu0 %v5555_v8  ;;  %5395 = vmatprep.subr.bf16.mxu1 %v5555_v8  ;;  %v475_v41 = vld [vmem:[%s6006_s11 + $0x130] sm:$0xff]  ;;  %v478_v42 = vld [vmem:[%s6006_s11 + $0x148] sm:$0xff]  ;;  %v480_v43 = vld [vmem:[%s6006_s11 + $0x158] sm:$0xff]  ;;  %v506_v45 = vpack.c.bf16 %v448_v39, %v446_v38 }
  0x6d   : > { %v519_v46 = vpack.c.bf16 %v475_v41, %v473_v40  ;;  %v522_v47 = vpack.c.bf16 %v480_v43, %v478_v42  ;;  %v445_v48 = vld [vmem:[%s6006_s11 + $0x40] sm:$0xff]  ;;  %v447_v49 = vld [vmem:[%s6006_s11 + $0x50] sm:$0xff]  ;;  %v450_v50 = vld [vmem:[%s6006_s11 + $0x68] sm:$0xff] }
  0x6e   : > { %v452_v51 = vld [vmem:[%s6006_s11 + $0x78] sm:$0xff]  ;;  %v477_v52 = vld [vmem:[%s6006_s11 + $0x140] sm:$0xff]  ;;  %v479_v53 = vld [vmem:[%s6006_s11 + $0x150] sm:$0xff]  ;;  %v505_v56 = vpack.c.bf16 %v447_v49, %v445_v48 }
  0x6f   : > { %5003 = vmatpush3.bf16.msra.mxu0 %v5556_v9  ;;  %5403 = vmatpush3.bf16.msra.mxu1 %v5556_v9  ;;  %v482_v54 = vld [vmem:[%s6006_s11 + $0x168] sm:$0xff]  ;;  %v484_v55 = vld [vmem:[%s6006_s11 + $0x178] sm:$0xff]  ;;  %v508_v57 = vpack.c.bf16 %v452_v51, %v450_v50  ;;  %v521_v58 = vpack.c.bf16 %v479_v53, %v477_v52  ;;  %v449_v60 = vld [vmem:[%s6006_s11 + $0x60] sm:$0xff]  ;;  %v1063_v50 = vstv %s1060_s12 }
  0x70   : > { %5004 = vmatprep.subr.bf16.mxu0 %v5557_v10  ;;  %5396 = vmatprep.subr.bf16.mxu1 %v5557_v10  ;;  %v524_v59 = vpack.c.bf16 %v484_v55, %v482_v54  ;;  %v451_v61 = vld [vmem:[%s6006_s11 + $0x70] sm:$0xff]  ;;  %v454_v62 = vld [vmem:[%s6006_s11 + $0x88] sm:$0xff]  ;;  %v456_v63 = vld [vmem:[%s6006_s11 + $0x98] sm:$0xff]  ;;  %5565 = vrcp.f32 %v1063_v50 }
  0x71   : > { %v481_v0 = vld [vmem:[%s6006_s11 + $0x160] sm:$0xff]  ;;  %v483_v1 = vld [vmem:[%s6006_s11 + $0x170] sm:$0xff]  ;;  %v486_v2 = vld [vmem:[%s6006_s11 + $0x188] sm:$0xff]  ;;  %v507_v4 = vpack.c.bf16 %v451_v61, %v449_v60  ;;  %v510_v5 = vpack.c.bf16 %v456_v63, %v454_v62 }
  0x72   : > { %v488_v3 = vld [vmem:[%s6006_s11 + $0x198] sm:$0xff]  ;;  %v523_v6 = vpack.c.bf16 %v483_v1, %v481_v0  ;;  %v453_v8 = vld [vmem:[%s6006_s11 + $0x80] sm:$0xff]  ;;  %v455_v9 = vld [vmem:[%s6006_s11 + $0x90] sm:$0xff] }
  0x73   : > { %5005 = vmatpush3.bf16.msra.mxu0 %v5558_v11  ;;  %5404 = vmatpush3.bf16.msra.mxu1 %v5558_v11  ;;  %v526_v7 = vpack.c.bf16 %v488_v3, %v486_v2  ;;  %v458_v10 = vld [vmem:[%s6006_s11 + $0xa8] sm:$0xff]  ;;  %v460_v11 = vld [vmem:[%s6006_s11 + $0xb8] sm:$0xff]  ;;  %v487_v13 = vld [vmem:[%s6006_s11 + $0x190] sm:$0xff] }
  0x74   : > { %5006 = vmatprep.subr.bf16.mxu0 %v5559_v12  ;;  %5397 = vmatprep.subr.bf16.mxu1 %v5559_v12  ;;  %v485_v12 = vld [vmem:[%s6006_s11 + $0x180] sm:$0xff]  ;;  %v490_v14 = vld [vmem:[%s6006_s11 + $0x1a8] sm:$0xff]  ;;  %v492_v15 = vld [vmem:[%s6006_s11 + $0x1b8] sm:$0xff] }
  0x75   : > { %v525_v18 = vpack.c.bf16 %v487_v13, %v485_v12  ;;  %v528_v19 = vpack.c.bf16 %v492_v15, %v490_v14  ;;  %v457_v20 = vld [vmem:[%s6006_s11 + $0xa0] sm:$0xff]  ;;  %v491_v25 = vld [vmem:[%s6006_s11 + $0x1b0] sm:$0xff]  ;;  %v494_v26 = vld [vmem:[%s6006_s11 + $0x1c8] sm:$0xff] }
  0x76   : > { %v489_v24 = vld [vmem:[%s6006_s11 + $0x1a0] sm:$0xff]  ;;  %v496_v27 = vld [vmem:[%s6006_s11 + $0x1d8] sm:$0xff]  ;;  %v495_v37 = vld [vmem:[%s6006_s11 + $0x1d0] sm:$0xff] }
  0x77   : > { %5007 = vmatpush3.bf16.msra.mxu0 %v5560_v16  ;;  %5405 = vmatpush3.bf16.msra.mxu1 %v5560_v16  ;;  %v509_v16 = vpack.c.bf16 %v455_v9, %v453_v8  ;;  %v527_v30 = vpack.c.bf16 %v491_v25, %v489_v24  ;;  %v530_v31 = vpack.c.bf16 %v496_v27, %v494_v26  ;;  %v493_v36 = vld [vmem:[%s6006_s11 + $0x1c0] sm:$0xff]  ;;  %v498_v38 = vld [vmem:[%s6006_s11 + $0x1e8] sm:$0xff]  ;;  %v500_v39 = vld [vmem:[%s6006_s11 + $0x1f8] sm:$0xff] }
  0x78   : > { %5008 = vmatprep.subr.bf16.mxu0 %v5561_v17  ;;  %5398 = vmatprep.subr.bf16.mxu1 %v5561_v17  ;;  %v512_v17 = vpack.c.bf16 %v460_v11, %v458_v10  ;;  %v529_v42 = vpack.c.bf16 %v495_v37, %v493_v36  ;;  %v532_v43 = vpack.c.bf16 %v500_v39, %v498_v38 }
  0x7a   : > { %v5566_v51 = vpop.eup %5565 }
  0x7b   : > { %5009 = vmatpush3.bf16.msra.mxu0 %v5562_v21  ;;  %5406 = vmatpush3.bf16.msra.mxu1 %v5562_v21  ;;  %v459_v21 = vld [vmem:[%s6006_s11 + $0xb0] sm:$0xff]  ;;  %5432 = vpush %v5566_v51 }
  0x7c   : > { %5010 = vmatprep.subr.bf16.mxu0 %v5563_v22  ;;  %5399 = vmatprep.subr.bf16.mxu1 %v5563_v22  ;;  %v462_v22 = vld [vmem:[%s6006_s11 + $0xc8] sm:$0xff]  ;;  %v511_v28 = vpack.c.bf16 %v459_v21, %v457_v20 }
  0x7f   : > { %5011 = vmatpush3.bf16.msra.mxu0 %v5564_v23  ;;  %5407 = vmatpush3.bf16.msra.mxu1 %v5564_v23  ;;  %v464_v23 = vld [vmem:[%s6006_s11 + $0xd8] sm:$0xff] }
  0x80   : > { %v514_v29 = vpack.c.bf16 %v464_v23, %v462_v22 }
  0x82   : > { %694 = vmatmul.mubr.bf16.vlgmr.msra.gmra.mrb[0].mxu0 %v501_v32  ;;  %758 = vmatmul.mubr.bf16.vlgmr.msra.gmra.mrb[0].mxu1 %v517_v34  ;;  %v461_v32 = vld [vmem:[%s6006_s11 + $0xc0] sm:$0xff]  ;;  %v466_v34 = vld [vmem:[%s6006_s11 + $0xe8] sm:$0xff] }
  0x83   : > { %701 = vmatprep.mubr.bf16.mxu0 %v504_v33  ;;  %765 = vmatprep.mubr.bf16.mxu1 %v520_v35  ;;  %v463_v33 = vld [vmem:[%s6006_s11 + $0xd0] sm:$0xff]  ;;  %v468_v35 = vld [vmem:[%s6006_s11 + $0xf8] sm:$0xff] }
  0x84   : > { %v513_v40 = vpack.c.bf16 %v463_v33, %v461_v32  ;;  %v516_v41 = vpack.c.bf16 %v468_v35, %v466_v34 }
  0x8a   : > { %702 = vmatmul.mubr.bf16.gmra.mrb[4].mxu0 %v503_v44  ;;  %766 = vmatmul.mubr.bf16.gmra.mrb[4].mxu1 %v519_v46  ;;  %v465_v44 = vld [vmem:[%s6006_s11 + $0xe0] sm:$0xff] }
  0x8b   : > { %709 = vmatprep.mubr.bf16.mxu0 %v506_v45  ;;  %773 = vmatprep.mubr.bf16.mxu1 %v522_v47  ;;  %v467_v45 = vld [vmem:[%s6006_s11 + $0xf0] sm:$0xff]  ;;  %v497_v46 = vld [vmem:[%s6006_s11 + $0x1e0] sm:$0xff] }
  0x8c   : > { %v499_v47 = vld [vmem:[%s6006_s11 + $0x1f0] sm:$0xff]  ;;  %v515_v48 = vpack.c.bf16 %v467_v45, %v465_v44 }
  0x8d   : > { %v531_v49 = vpack.c.bf16 %v499_v47, %v497_v46 }
  0x92   : > { %710 = vmatmul.mubr.bf16.gmra.mrb[8].mxu0 %v505_v56  ;;  %774 = vmatmul.mubr.bf16.gmra.mrb[8].mxu1 %v521_v58 }
  0x93   : > { %717 = vmatprep.mubr.bf16.mxu0 %v508_v57  ;;  %781 = vmatprep.mubr.bf16.mxu1 %v524_v59 }
  0x9a   : > { %718 = vmatmul.mubr.bf16.gmra.mrb[12].mxu0 %v507_v4  ;;  %782 = vmatmul.mubr.bf16.gmra.mrb[12].mxu1 %v523_v6 }
  0x9b   : > { %725 = vmatprep.mubr.bf16.mxu0 %v510_v5  ;;  %789 = vmatprep.mubr.bf16.mxu1 %v526_v7 }
  0xa2   : > { %726 = vmatmul.mubr.bf16.gmra.mrb[16].mxu0 %v509_v16  ;;  %790 = vmatmul.mubr.bf16.gmra.mrb[16].mxu1 %v525_v18 }
  0xa3   : > { %733 = vmatprep.mubr.bf16.mxu0 %v512_v17  ;;  %797 = vmatprep.mubr.bf16.mxu1 %v528_v19 }
  0xaa   : > { %734 = vmatmul.mubr.bf16.gmra.mrb[20].mxu0 %v511_v28  ;;  %798 = vmatmul.mubr.bf16.gmra.mrb[20].mxu1 %v527_v30 }
  0xab   : > { %741 = vmatprep.mubr.bf16.mxu0 %v514_v29  ;;  %805 = vmatprep.mubr.bf16.mxu1 %v530_v31 }
  0xac   : > { %s5433_s16 = spop %5432 }
  0xad   : > { %s1066_s5 = smul.f32 256.0, %s5433_s16 }
  0xae   : > { %s1079_s7 = smul.f32 %s5433_s16, %s1075_s10 }
  0xb2   : > { %742 = vmatmul.mubr.bf16.gmra.mrb[24].mxu0 %v513_v40  ;;  %806 = vmatmul.mubr.bf16.gmra.mrb[24].mxu1 %v529_v42 }
  0xb3   : > { %749 = vmatprep.mubr.bf16.mxu0 %v516_v41  ;;  %813 = vmatprep.mubr.bf16.mxu1 %v532_v43 }
  0xba   : > { %750 = vmatmul.mubr.bf16.gmra.mrb[28].mxu0 %v515_v48  ;;  %814 = vmatmul.mubr.bf16.gmra.mrb[28].mxu1 %v531_v49 }
 0x155   : > { %v5012_v52 = vpop.f32.mrb[0].mxu0  ;;  %v5060_v54 = vpop.f32.mrb[0].mxu1 }
 0x156   : > { %v5013_v53 = vpop.f32.mrb[1].mxu0  ;;  %v5061_v57 = vpop.f32.mrb[1].mxu1 }
 0x157   : > { %v6138_v55 = vadd.f32 %v5013_v53, %v5012_v52  ;;  %v5015_v56 = vpop.f32.mrb[2].mxu0  ;;  %v6140_v59 = vadd.f32 %v5061_v57, %v5060_v54  ;;  %v5063_v60 = vpop.f32.mrb[2].mxu1 }
 0x158   : > { %v5016_v58 = vpop.f32.mrb[3].mxu0  ;;  %v5064_v62 = vpop.f32.mrb[3].mxu1 }
 0x159   : > { %824 = vst.msk [vmem:[%s6143_s22] sm:$0xff] %vm823_vm2, %v6138_v55  ;;  %v6148_v61 = vadd.f32 %v5016_v58, %v5015_v56  ;;  %840 = vst.msk [vmem:[%s6143_s22 + $0x80] sm:$0xff] %vm823_vm2, %v6140_v59  ;;  %v6153_v63 = vadd.f32 %v5064_v62, %v5063_v60  ;;  %v856_v22 = vsel %vm823_vm2, %v6138_v55, 0.0 }
 0x15b   : > { %825 = vst.msk [vmem:[%s6143_s22 + $0x8] sm:$0xff] %vm823_vm2, %v6148_v61  ;;  %841 = vst.msk [vmem:[%s6143_s22 + $0x88] sm:$0xff] %vm823_vm2, %v6153_v63  ;;  %v857_v15 = vsel %vm823_vm2, %v6148_v61, 0.0 }
 0x15c   : > { %v858_v26 = vadd.f32 %v857_v15, %v856_v22 }
 0x15d   : > { %v5018_v0 = vpop.f32.mrb[4].mxu0  ;;  %v5066_v2 = vpop.f32.mrb[4].mxu1 }
 0x15e   : > { %v5019_v1 = vpop.f32.mrb[5].mxu0  ;;  %v5067_v5 = vpop.f32.mrb[5].mxu1 }
 0x15f   : > { %v6161_v3 = vadd.f32 %v5019_v1, %v5018_v0  ;;  %v5021_v4 = vpop.f32.mrb[6].mxu0  ;;  %v6163_v7 = vadd.f32 %v5067_v5, %v5066_v2  ;;  %v5069_v8 = vpop.f32.mrb[6].mxu1 }
 0x160   : > { %v5022_v6 = vpop.f32.mrb[7].mxu0  ;;  %v5070_v10 = vpop.f32.mrb[7].mxu1 }
 0x161   : > { %826 = vst.msk [vmem:[%s6143_s22 + $0x10] sm:$0xff] %vm823_vm2, %v6161_v3  ;;  %v6168_v9 = vadd.f32 %v5022_v6, %v5021_v4  ;;  %842 = vst.msk [vmem:[%s6143_s22 + $0x90] sm:$0xff] %vm823_vm2, %v6163_v7  ;;  %v6173_v11 = vadd.f32 %v5070_v10, %v5069_v8  ;;  %v859_v23 = vsel %vm823_vm2, %v6161_v3, 0.0 }
 0x162   : > { %v860_v28 = vadd.f32 %v859_v23, %v858_v26 }
 0x163   : > { %827 = vst.msk [vmem:[%s6143_s22 + $0x18] sm:$0xff] %vm823_vm2, %v6168_v9  ;;  %843 = vst.msk [vmem:[%s6143_s22 + $0x98] sm:$0xff] %vm823_vm2, %v6173_v11  ;;  %v861_v29 = vsel %vm823_vm2, %v6168_v9, 0.0 }
 0x164   : > { %v862_v37 = vadd.f32 %v861_v29, %v860_v28 }
 0x165   : > { %v5024_v12 = vpop.f32.mrb[8].mxu0  ;;  %v5072_v14 = vpop.f32.mrb[8].mxu1 }
 0x166   : > { %v5025_v13 = vpop.f32.mrb[9].mxu0  ;;  %v5073_v18 = vpop.f32.mrb[9].mxu1 }
 0x167   : > { %v6183_v16 = vadd.f32 %v5025_v13, %v5024_v12  ;;  %v5027_v17 = vpop.f32.mrb[10].mxu0  ;;  %v6185_v20 = vadd.f32 %v5073_v18, %v5072_v14  ;;  %v5075_v21 = vpop.f32.mrb[10].mxu1 }
 0x168   : > { %v5028_v19 = vpop.f32.mrb[11].mxu0  ;;  %v5076_v25 = vpop.f32.mrb[11].mxu1 }
 0x169   : > { %828 = vst.msk [vmem:[%s6143_s22 + $0x20] sm:$0xff] %vm823_vm2, %v6183_v16  ;;  %v6194_v24 = vadd.f32 %v5028_v19, %v5027_v17  ;;  %844 = vst.msk [vmem:[%s6143_s22 + $0xa0] sm:$0xff] %vm823_vm2, %v6185_v20  ;;  %v6199_v27 = vadd.f32 %v5076_v25, %v5075_v21  ;;  %v863_v33 = vsel %vm823_vm2, %v6183_v16, 0.0 }
 0x16a   : > { %v864_v43 = vadd.f32 %v863_v33, %v862_v37 }
 0x16b   : > { %829 = vst.msk [vmem:[%s6143_s22 + $0x28] sm:$0xff] %vm823_vm2, %v6194_v24  ;;  %845 = vst.msk [vmem:[%s6143_s22 + $0xa8] sm:$0xff] %vm823_vm2, %v6199_v27  ;;  %v865_v45 = vsel %vm823_vm2, %v6194_v24, 0.0 }
 0x16c   : > { %v866_v48 = vadd.f32 %v865_v45, %v864_v43 }
 0x16d   : > { %v5030_v30 = vpop.f32.mrb[12].mxu0  ;;  %v5078_v32 = vpop.f32.mrb[12].mxu1 }
 0x16e   : > { %v5031_v31 = vpop.f32.mrb[13].mxu0  ;;  %v5079_v36 = vpop.f32.mrb[13].mxu1 }
 0x16f   : > { %v6211_v34 = vadd.f32 %v5031_v31, %v5030_v30  ;;  %v5033_v35 = vpop.f32.mrb[14].mxu0  ;;  %v6213_v39 = vadd.f32 %v5079_v36, %v5078_v32  ;;  %v5081_v40 = vpop.f32.mrb[14].mxu1 }
 0x170   : > { %v5034_v38 = vpop.f32.mrb[15].mxu0  ;;  %v5082_v42 = vpop.f32.mrb[15].mxu1 }
 0x171   : > { %830 = vst.msk [vmem:[%s6143_s22 + $0x30] sm:$0xff] %vm823_vm2, %v6211_v34  ;;  %v6218_v41 = vadd.f32 %v5034_v38, %v5033_v35  ;;  %846 = vst.msk [vmem:[%s6143_s22 + $0xb0] sm:$0xff] %vm823_vm2, %v6213_v39  ;;  %v6223_v44 = vadd.f32 %v5082_v42, %v5081_v40  ;;  %v867_v46 = vsel %vm823_vm2, %v6211_v34, 0.0 }
 0x172   : > { %v868_v54 = vadd.f32 %v867_v46, %v866_v48 }
 0x173   : > { %831 = vst.msk [vmem:[%s6143_s22 + $0x38] sm:$0xff] %vm823_vm2, %v6218_v41  ;;  %847 = vst.msk [vmem:[%s6143_s22 + $0xb8] sm:$0xff] %vm823_vm2, %v6223_v44  ;;  %v869_v60 = vsel %vm823_vm2, %v6218_v41, 0.0 }
 0x174   : > { %v870_v4 = vadd.f32 %v869_v60, %v868_v54 }
 0x175   : > { %v5036_v47 = vpop.f32.mrb[16].mxu0  ;;  %v5084_v50 = vpop.f32.mrb[16].mxu1 }
 0x176   : > { %v5037_v49 = vpop.f32.mrb[17].mxu0  ;;  %v5085_v53 = vpop.f32.mrb[17].mxu1 }
 0x177   : > { %v6235_v51 = vadd.f32 %v5037_v49, %v5036_v47  ;;  %v5039_v52 = vpop.f32.mrb[18].mxu0  ;;  %v6237_v57 = vadd.f32 %v5085_v53, %v5084_v50  ;;  %v5087_v58 = vpop.f32.mrb[18].mxu1 }
 0x178   : > { %v5040_v56 = vpop.f32.mrb[19].mxu0  ;;  %v5088_v0 = vpop.f32.mrb[19].mxu1 }
 0x179   : > { %832 = vst.msk [vmem:[%s6143_s22 + $0x40] sm:$0xff] %vm823_vm2, %v6235_v51  ;;  %v6244_v62 = vadd.f32 %v5040_v56, %v5039_v52  ;;  %848 = vst.msk [vmem:[%s6143_s22 + $0xc0] sm:$0xff] %vm823_vm2, %v6237_v57  ;;  %v6249_v1 = vadd.f32 %v5088_v0, %v5087_v58  ;;  %v871_v2 = vsel %vm823_vm2, %v6235_v51, 0.0 }
 0x17a   : > { %v872_v6 = vadd.f32 %v871_v2, %v870_v4 }
 0x17b   : > { %833 = vst.msk [vmem:[%s6143_s22 + $0x48] sm:$0xff] %vm823_vm2, %v6244_v62  ;;  %849 = vst.msk [vmem:[%s6143_s22 + $0xc8] sm:$0xff] %vm823_vm2, %v6249_v1  ;;  %v873_v12 = vsel %vm823_vm2, %v6244_v62, 0.0 }
 0x17c   : > { %v874_v25 = vadd.f32 %v873_v12, %v872_v6 }
 0x17d   : > { %v5042_v5 = vpop.f32.mrb[20].mxu0  ;;  %v5090_v10 = vpop.f32.mrb[20].mxu1 }
 0x17e   : > { %v5043_v8 = vpop.f32.mrb[21].mxu0  ;;  %v5091_v15 = vpop.f32.mrb[21].mxu1 }
 0x17f   : > { %v6261_v13 = vadd.f32 %v5043_v8, %v5042_v5  ;;  %v5045_v14 = vpop.f32.mrb[22].mxu0  ;;  %v6263_v18 = vadd.f32 %v5091_v15, %v5090_v10  ;;  %v5093_v19 = vpop.f32.mrb[22].mxu1 }
 0x180   : > { %v5046_v17 = vpop.f32.mrb[23].mxu0  ;;  %v5094_v23 = vpop.f32.mrb[23].mxu1 }
 0x181   : > { %834 = vst.msk [vmem:[%s6143_s22 + $0x50] sm:$0xff] %vm823_vm2, %v6261_v13  ;;  %v875_v21 = vsel %vm823_vm2, %v6261_v13, 0.0  ;;  %v6270_v22 = vadd.f32 %v5046_v17, %v5045_v14  ;;  %850 = vst.msk [vmem:[%s6143_s22 + $0xd0] sm:$0xff] %vm823_vm2, %v6263_v18  ;;  %v6275_v26 = vadd.f32 %v5094_v23, %v5093_v19  ;;  %v887_v17 = vsel %vm823_vm2, %v6140_v59, 0.0 }
 0x182   : > { %v876_v28 = vadd.f32 %v875_v21, %v874_v25  ;;  %v889_v21 = vsel %vm823_vm2, %v6153_v63, 0.0  ;;  %v891_v25 = vsel %vm823_vm2, %v6163_v7, 0.0 }
 0x183   : > { %835 = vst.msk [vmem:[%s6143_s22 + $0x58] sm:$0xff] %vm823_vm2, %v6270_v22  ;;  %851 = vst.msk [vmem:[%s6143_s22 + $0xd8] sm:$0xff] %vm823_vm2, %v6275_v26  ;;  %v877_v29 = vsel %vm823_vm2, %v6270_v22, 0.0 }
 0x184   : > { %v878_v37 = vadd.f32 %v877_v29, %v876_v28  ;;  %v893_v29 = vsel %vm823_vm2, %v6173_v11, 0.0 }
 0x185   : > { %v5048_v30 = vpop.f32.mrb[24].mxu0  ;;  %v5096_v32 = vpop.f32.mrb[24].mxu1 }
 0x186   : > { %v5049_v31 = vpop.f32.mrb[25].mxu0  ;;  %v5097_v36 = vpop.f32.mrb[25].mxu1 }
 0x187   : > { %v6285_v33 = vadd.f32 %v5049_v31, %v5048_v30  ;;  %v5051_v35 = vpop.f32.mrb[26].mxu0  ;;  %v6287_v40 = vadd.f32 %v5097_v36, %v5096_v32  ;;  %v5099_v42 = vpop.f32.mrb[26].mxu1  ;;  %v895_v31 = vsel %vm823_vm2, %v6185_v20, 0.0 }
 0x188   : > { %v5052_v38 = vpop.f32.mrb[27].mxu0  ;;  %v5100_v46 = vpop.f32.mrb[27].mxu1 }
 0x189   : > { %836 = vst.msk [vmem:[%s6143_s22 + $0x60] sm:$0xff] %vm823_vm2, %v6285_v33  ;;  %v879_v43 = vsel %vm823_vm2, %v6285_v33, 0.0  ;;  %v6294_v45 = vadd.f32 %v5052_v38, %v5051_v35  ;;  %852 = vst.msk [vmem:[%s6143_s22 + $0xe0] sm:$0xff] %vm823_vm2, %v6287_v40  ;;  %v6299_v48 = vadd.f32 %v5100_v46, %v5099_v42  ;;  %v897_v35 = vsel %vm823_vm2, %v6199_v27, 0.0 }
 0x18a   : > { %v880_v47 = vadd.f32 %v879_v43, %v878_v37  ;;  %v899_v37 = vsel %vm823_vm2, %v6213_v39, 0.0  ;;  %v901_v42 = vsel %vm823_vm2, %v6223_v44, 0.0  ;;  %v903_v46 = vsel %vm823_vm2, %v6237_v57, 0.0 }
 0x18b   : > { %837 = vst.msk [vmem:[%s6143_s22 + $0x68] sm:$0xff] %vm823_vm2, %v6294_v45  ;;  %v881_v49 = vsel %vm823_vm2, %v6294_v45, 0.0  ;;  %853 = vst.msk [vmem:[%s6143_s22 + $0xe8] sm:$0xff] %vm823_vm2, %v6299_v48 }
 0x18c   : > { %v882_v50 = vadd.f32 %v881_v49, %v880_v47  ;;  %v905_v49 = vsel %vm823_vm2, %v6249_v1, 0.0 }
 0x18d   : > { %v5054_v52 = vpop.f32.mrb[28].mxu0  ;;  %v5102_v54 = vpop.f32.mrb[28].mxu1 }
 0x18e   : > { %v5055_v53 = vpop.f32.mrb[29].mxu0  ;;  %v5103_v60 = vpop.f32.mrb[29].mxu1 }
 0x18f   : > { %v5056_v56 = vadd.f32 %v5055_v53, %v5054_v52  ;;  %v5057_v58 = vpop.f32.mrb[30].mxu0  ;;  %v5104_v2 = vadd.f32 %v5103_v60, %v5102_v54  ;;  %v5105_v4 = vpop.f32.mrb[30].mxu1  ;;  %v907_v52 = vsel %vm823_vm2, %v6263_v18, 0.0  ;;  %v909_v54 = vsel %vm823_vm2, %v6275_v26, 0.0 }
 0x190   : > { %v5058_v0 = vpop.f32.mrb[31].mxu0  ;;  %v5106_v8 = vpop.f32.mrb[31].mxu1  ;;  %v911_v60 = vsel %vm823_vm2, %v6287_v40, 0.0 }
 0x191   : > { %838 = vst.msk [vmem:[%s6143_s22 + $0x70] sm:$0xff] %vm823_vm2, %v5056_v56  ;;  %v883_v5 = vsel %vm823_vm2, %v5056_v56, 0.0  ;;  %v5059_v6 = vadd.f32 %v5058_v0, %v5057_v58  ;;  %854 = vst.msk [vmem:[%s6143_s22 + $0xf0] sm:$0xff] %vm823_vm2, %v5104_v2  ;;  %v5107_v12 = vadd.f32 %v5106_v8, %v5105_v4  ;;  %v913_v4 = vsel %vm823_vm2, %v6299_v48, 0.0 }
 0x192   : > { %v884_v10 = vadd.f32 %v883_v5, %v882_v50  ;;  %v915_v5 = vsel %vm823_vm2, %v5104_v2, 0.0 }
 0x193   : > { %839 = vst.msk [vmem:[%s6143_s22 + $0x78] sm:$0xff] %vm823_vm2, %v5059_v6  ;;  %v885_v14 = vsel %vm823_vm2, %v5059_v6, 0.0  ;;  %855 = vst.msk [vmem:[%s6143_s22 + $0xf8] sm:$0xff] %vm823_vm2, %v5107_v12 }
 0x194   : > { %v886_v15 = vadd.f32 %v885_v14, %v884_v10  ;;  %v917_v14 = vsel %vm823_vm2, %v5107_v12, 0.0 }
 0x196   : > { %v888_v19 = vadd.f32 %v887_v17, %v886_v15 }
 0x198   : > { %v890_v23 = vadd.f32 %v889_v21, %v888_v19 }
 0x19a   : > { %v892_v28 = vadd.f32 %v891_v25, %v890_v23 }
 0x19c   : > { %v894_v30 = vadd.f32 %v893_v29, %v892_v28 }
 0x19e   : > { %v896_v32 = vadd.f32 %v895_v31, %v894_v30 }
 0x1a0   : > { %v898_v36 = vadd.f32 %v897_v35, %v896_v32 }
 0x1a2   : > { %v900_v38 = vadd.f32 %v899_v37, %v898_v36 }
 0x1a4   : > { %v902_v43 = vadd.f32 %v901_v42, %v900_v38 }
 0x1a6   : > { %v904_v47 = vadd.f32 %v903_v46, %v902_v43 }
 0x1a8   : > { %v906_v50 = vadd.f32 %v905_v49, %v904_v47 }
 0x1aa   : > { %v908_v53 = vadd.f32 %v907_v52, %v906_v50 }
 0x1ac   : > { %v910_v58 = vadd.f32 %v909_v54, %v908_v53 }
 0x1ae   : > { %v912_v0 = vadd.f32 %v911_v60, %v910_v58  ;;  %v1061_v60 = vld [vmem:[#allocation5] sm:$0x1] }
 0x1b0   : > { %v914_v8 = vadd.f32 %v913_v4, %v912_v0 }
 0x1b2   : > { %v916_v10 = vadd.f32 %v915_v5, %v914_v8  ;;  %v1067_v8 = vstv %s1066_s5 }
 0x1b4   : > { %v918_v15 = vadd.f32 %v917_v14, %v916_v10 }
 0x1b6   : > { %v919_v17 = vrot.slane %v918_v15, 4 }
 0x1b8   : > { %v920_v19 = vadd.f32 %v919_v17, %v918_v15 }
 0x1ba   : > { %v921_v21 = vrot.slane %v920_v19, 2 }
 0x1bc   : > { %v922_v23 = vadd.f32 %v921_v21, %v920_v19  ;;  %v1080_v19 = vstv %s1079_s7 }
 0x1be   : > { %v923_v25 = vrot.slane %v922_v23, 1 }
 0x1c0   : > { %v924_v28 = vadd.f32 %v923_v25, %v922_v23 }
 0x1c2   : > { %v6349_v29 = vmul.f32 0.00390625, %v924_v28 }
 0x1c4   : > { %v6353_v30 = vsub.f32 %v6285_v33, %v6349_v29  ;;  %v6357_v31 = vsub.f32 %v6294_v45, %v6349_v29  ;;  %v6360_v32 = vsub.f32 %v5056_v56, %v6349_v29  ;;  %v6363_v35 = vsub.f32 %v5059_v6, %v6349_v29 }
 0x1c5   : > { %v6367_v36 = vsub.f32 %v6299_v48, %v6349_v29  ;;  %v6370_v37 = vsub.f32 %v5104_v2, %v6349_v29  ;;  %v6373_v33 = vsub.f32 %v5107_v12, %v6349_v29  ;;  %v926_v45 = vsub.f32 %v6138_v55, %v6349_v29 }
 0x1c6   : > { %v927_v56 = vsub.f32 %v6148_v61, %v6349_v29  ;;  %v928_v6 = vsub.f32 %v6161_v3, %v6349_v29  ;;  %v929_v48 = vsub.f32 %v6168_v9, %v6349_v29  ;;  %v930_v2 = vsub.f32 %v6183_v16, %v6349_v29 }
 0x1c7   : > { %v958_v38 = vmul.f32 %v926_v45, %v926_v45  ;;  %v931_v43 = vsub.f32 %v6194_v24, %v6349_v29  ;;  %v932_v3 = vsub.f32 %v6211_v34, %v6349_v29  ;;  %v933_v50 = vsub.f32 %v6218_v41, %v6349_v29 }
 0x1c8   : > { %v959_v42 = vmul.f32 %v927_v56, %v927_v56  ;;  %v960_v12 = vmul.f32 %v928_v6, %v928_v6  ;;  %v961_v55 = vmul.f32 %v929_v48, %v929_v48  ;;  %v962_v9 = vmul.f32 %v930_v2, %v930_v2 }
 0x1c9   : > { %v990_v46 = vsel %vm823_vm2, %v958_v38, 0.0  ;;  %v963_v24 = vmul.f32 %v931_v43, %v931_v43  ;;  %v934_v54 = vsub.f32 %v6235_v51, %v6349_v29  ;;  %v964_v58 = vmul.f32 %v932_v3, %v932_v3 }
 0x1ca   : > { %v991_v61 = vsel %vm823_vm2, %v959_v42, 0.0  ;;  %v993_v49 = vsel %vm823_vm2, %v960_v12, 0.0  ;;  %v995_v52 = vsel %vm823_vm2, %v961_v55, 0.0  ;;  %v997_v34 = vsel %vm823_vm2, %v962_v9, 0.0 }
 0x1cb   : > { %v992_v47 = vadd.f32 %v991_v61, %v990_v46  ;;  %v935_v4 = vsub.f32 %v6244_v62, %v6349_v29  ;;  %v965_v5 = vmul.f32 %v933_v50, %v933_v50  ;;  %v999_v41 = vsel %vm823_vm2, %v963_v24, 0.0 }
 0x1cc   : > { %v1062_v14 = vsub.f32 %v6349_v29, %v1061_v60  ;;  %v936_v15 = vsub.f32 %v6261_v13, %v6349_v29  ;;  %v966_v51 = vmul.f32 %v934_v54, %v934_v54  ;;  %v1001_v17 = vsel %vm823_vm2, %v964_v58, 0.0 }
 0x1cd   : > { %v994_v16 = vadd.f32 %v993_v49, %v992_v47  ;;  %v937_v62 = vsub.f32 %v6270_v22, %v6349_v29  ;;  %v967_v28 = vmul.f32 %v935_v4, %v935_v4  ;;  %v1003_v45 = vsel %vm823_vm2, %v965_v5, 0.0 }
 0x1ce   : > { %v1068_v23 = vmul.f32 %v1067_v8, %v1062_v14  ;;  %v1074_v25 = vmul.f32 %v1062_v14, %v1062_v14  ;;  %v968_v38 = vmul.f32 %v936_v15, %v936_v15  ;;  %v1005_v13 = vsel %vm823_vm2, %v966_v51, 0.0 }
 0x1cf   : > { %v996_v53 = vadd.f32 %v995_v52, %v994_v16  ;;  %v969_v2 = vmul.f32 %v937_v62, %v937_v62  ;;  %v1007_v12 = vsel %vm823_vm2, %v967_v28, 0.0  ;;  %v970_v22 = vmul.f32 %v6353_v30, %v6353_v30 }
 0x1d0   : > { %v1069_v6 = vadd.f32 %v1068_v23, %v1061_v60  ;;  %v6410_v48 = vmul.f32 %v1080_v19, %v1074_v25  ;;  %v1009_v55 = vsel %vm823_vm2, %v968_v38, 0.0  ;;  %v971_v61 = vmul.f32 %v6357_v31, %v6357_v31 }
 0x1d1   : > { %v998_v0 = vadd.f32 %v997_v34, %v996_v53  ;;  %v1011_v47 = vsel %vm823_vm2, %v969_v2, 0.0  ;;  %v942_v9 = vsub.f32 %v6140_v59, %v6349_v29  ;;  %v972_v49 = vmul.f32 %v6360_v32, %v6360_v32 }
 0x1d2   : > { %1071 = vst.msk [vmem:[#allocation5] sm:$0x1] %vm1070_vm3, %v1069_v6  ;;  %v1013_v16 = vsel %vm823_vm2, %v970_v22, 0.0  ;;  %v943_v30 = vsub.f32 %v6153_v63, %v6349_v29  ;;  %v973_v24 = vmul.f32 %v6363_v35, %v6363_v35  ;;  %v1015_v31 = vsel %vm823_vm2, %v971_v61, 0.0 }
 0x1d3   : > { %v1000_v10 = vadd.f32 %v999_v41, %v998_v0  ;;  %v944_v53 = vsub.f32 %v6163_v7, %v6349_v29  ;;  %v974_v54 = vmul.f32 %v942_v9, %v942_v9  ;;  %v1017_v59 = vsel %vm823_vm2, %v972_v49, 0.0 }
 0x1d4   : > { %v945_v32 = vsub.f32 %v6173_v11, %v6349_v29  ;;  %v975_v34 = vmul.f32 %v943_v30, %v943_v30  ;;  %v1019_v60 = vsel %vm823_vm2, %v973_v24, 0.0  ;;  %v946_v35 = vsub.f32 %v6185_v20, %v6349_v29 }
 0x1d5   : > { %v1002_v21 = vadd.f32 %v1001_v17, %v1000_v10  ;;  %v976_v0 = vmul.f32 %v944_v53, %v944_v53  ;;  %v1021_v4 = vsel %vm823_vm2, %v974_v54, 0.0  ;;  %v947_v7 = vsub.f32 %v6199_v27, %v6349_v29 }
 0x1d6   : > { %v977_v41 = vmul.f32 %v945_v32, %v945_v32  ;;  %v1023_v8 = vsel %vm823_vm2, %v975_v34, 0.0  ;;  %v948_v11 = vsub.f32 %v6213_v39, %v6349_v29  ;;  %v978_v14 = vmul.f32 %v946_v35, %v946_v35 }
 0x1d7   : > { %v1004_v56 = vadd.f32 %v1003_v45, %v1002_v21  ;;  %v1025_v15 = vsel %vm823_vm2, %v976_v0, 0.0  ;;  %v949_v20 = vsub.f32 %v6223_v44, %v6349_v29  ;;  %v979_v17 = vmul.f32 %v947_v7, %v947_v7 }
 0x1d8   : > { %v1027_v19 = vsel %vm823_vm2, %v977_v41, 0.0  ;;  %v950_v27 = vsub.f32 %v6237_v57, %v6349_v29  ;;  %v980_v23 = vmul.f32 %v948_v11, %v948_v11  ;;  %v1029_v25 = vsel %vm823_vm2, %v978_v14, 0.0 }
 0x1d9   : > { %v1006_v42 = vadd.f32 %v1005_v13, %v1004_v56  ;;  %v951_v39 = vsub.f32 %v6249_v1, %v6349_v29  ;;  %v981_v28 = vmul.f32 %v949_v20, %v949_v20  ;;  %v1031_v45 = vsel %vm823_vm2, %v979_v17, 0.0 }
 0x1da   : > { %v952_v44 = vsub.f32 %v6263_v18, %v6349_v29  ;;  %v982_v6 = vmul.f32 %v950_v27, %v950_v27  ;;  %v1033_v38 = vsel %vm823_vm2, %v980_v23, 0.0  ;;  %v953_v57 = vsub.f32 %v6275_v26, %v6349_v29 }
 0x1db   : > { %v1008_v43 = vadd.f32 %v1007_v12, %v1006_v42  ;;  %v983_v42 = vmul.f32 %v951_v39, %v951_v39  ;;  %v1035_v2 = vsel %vm823_vm2, %v981_v28, 0.0  ;;  %v954_v1 = vsub.f32 %v6287_v40, %v6349_v29 }
 0x1dc   : > { %v1037_v22 = vsel %vm823_vm2, %v982_v6, 0.0  ;;  %v987_v26 = vmul.f32 %v6367_v36, %v6367_v36  ;;  %v988_v40 = vmul.f32 %v6370_v37, %v6370_v37  ;;  %v989_v30 = vmul.f32 %v6373_v33, %v6373_v33 }
 0x1dd   : > { %v1010_v46 = vadd.f32 %v1009_v55, %v1008_v43  ;;  %v984_v43 = vmul.f32 %v952_v44, %v952_v44  ;;  %v1039_v18 = vsel %vm823_vm2, %v983_v42, 0.0 }
 0x1de   : > { %v1047_v24 = vsel %vm823_vm2, %v987_v26, 0.0  ;;  %v1051_v36 = vsel %vm823_vm2, %v989_v30, 0.0 }
 0x1df   : > { %v1012_v3 = vadd.f32 %v1011_v47, %v1010_v46  ;;  %v985_v46 = vmul.f32 %v953_v57, %v953_v57  ;;  %v986_v47 = vmul.f32 %v954_v1, %v954_v1 }
 0x1e1   : > { %v1014_v50 = vadd.f32 %v1013_v16, %v1012_v3  ;;  %v1041_v3 = vsel %vm823_vm2, %v984_v43, 0.0  ;;  %v1043_v49 = vsel %vm823_vm2, %v985_v46, 0.0  ;;  %v1045_v29 = vsel %vm823_vm2, %v986_v47, 0.0 }
 0x1e3   : > { %v1016_v52 = vadd.f32 %v1015_v31, %v1014_v50 }
 0x1e5   : > { %v1018_v58 = vadd.f32 %v1017_v59, %v1016_v52  ;;  %v1049_v52 = vsel %vm823_vm2, %v988_v40, 0.0 }
 0x1e7   : > { %v1020_v63 = vadd.f32 %v1019_v60, %v1018_v58  ;;  %v1072_v60 = vld [vmem:[#allocation6] sm:$0x1] }
 0x1e9   : > { %v1022_v5 = vadd.f32 %v1021_v4, %v1020_v63 }
 0x1eb   : > { %v1024_v10 = vadd.f32 %v1023_v8, %v1022_v5 }
 0x1ed   : > { %v1026_v51 = vadd.f32 %v1025_v15, %v1024_v10 }
 0x1ef   : > { %v1028_v21 = vadd.f32 %v1027_v19, %v1026_v51 }
 0x1f1   : > { %v1030_v62 = vadd.f32 %v1029_v25, %v1028_v21 }
 0x1f3   : > { %v1032_v56 = vadd.f32 %v1031_v45, %v1030_v62 }
 0x1f5   : > { %v1034_v13 = vadd.f32 %v1033_v38, %v1032_v56 }
 0x1f7   : > { %v1036_v12 = vadd.f32 %v1035_v2, %v1034_v13 }
 0x1f9   : > { %v1038_v55 = vadd.f32 %v1037_v22, %v1036_v12 }
 0x1fb   : > { %v1040_v61 = vadd.f32 %v1039_v18, %v1038_v55 }
 0x1fd   : > { %v1042_v9 = vadd.f32 %v1041_v3, %v1040_v61 }
 0x1ff   : > { %v1044_v16 = vadd.f32 %v1043_v49, %v1042_v9 }
 0x201   : > { %v1046_v50 = vadd.f32 %v1045_v29, %v1044_v16 }
 0x203   : > { %v1048_v31 = vadd.f32 %v1047_v24, %v1046_v50 }
 0x205   : > { %v1050_v53 = vadd.f32 %v1049_v52, %v1048_v31 }
 0x207   : > { %v1052_v54 = vadd.f32 %v1051_v36, %v1050_v53 }
 0x209   : > { %v1053_v59 = vrot.slane %v1052_v54, 4 }
 0x20b   : > { %v1054_v58 = vadd.f32 %v1053_v59, %v1052_v54 }
 0x20d   : > { %v1055_v32 = vrot.slane %v1054_v58, 2 }
 0x20f   : > { %v1056_v34 = vadd.f32 %v1055_v32, %v1054_v58 }
 0x211   : > { %v1057_v37 = vrot.slane %v1056_v34, 1 }
 0x213   : > { %v1058_v63 = vadd.f32 %v1057_v37, %v1056_v34 }
 0x215   : > { %v1073_v35 = vadd.f32 %v1072_v60, %v1058_v63 }
 0x217   : > { %v1082_v0 = vadd.f32 %v6410_v48, %v1073_v35 }
 0x219   : > { %1083 = vst.msk [vmem:[#allocation6] sm:$0x1] %vm1070_vm3, %v1082_v0 }
 0x21a PF: > { %p4891_p8 = scmp.ne.s32.totalorder %s5765_s20, 1 }
 0x21b   : > { %v1165_v5 = vlaneseq (!%p4891_p8)  ;;  %v5783_v41 = vmov (!%p4891_p8), 0   ;;  %s6483_s21 = scalar_lea.vmem (!%p4891_p8), [#allocation2], %s6014_s6  ;;  %v6488_v10 = vld [vmem:[#allocation5] ss:$0 sm:$0xff] (!%p4891_p8)  ;;  %s5784_s27 = smov (!%p4891_p8), 64   ;;  %vm1472_vm4 = vcmask (!%p4891_p8), 1040384  }
 0x21c   : > { %1087 = sbr.rel (%p4891_p8) target bundleno = 1191 (0x4a7), region = 76  ;;  %v6480_v8 = vrot.slane (!%p4891_p8), %v5783_v41, 1  ;;  %v6486_v48 = vld [vmem:[%s6483_s21] sm:$0xff] (!%p4891_p8)  ;;  %v6491_v11 = vld [vmem:[%s6483_s21 + $0x8] sm:$0xff] (!%p4891_p8)  ;;  %v6502_v20 = vld [vmem:[%s6483_s21 + $0xb0] sm:$0xff] (!%p4891_p8)  ;;  %vm1727_vm8 = vcmask (!%p4891_p8), 1046528   ;;  %s3110_s16 = scvt.s32.f32 (!%p4891_p8), %s6014_s6 }
 0x21d   : > { %v1166_v14 = vshrl.u32 (!%p4891_p8), %v1165_v5, 7  ;;  %v6496_v15 = vld [vmem:[%s6483_s21 + $0xc0] sm:$0xff] (!%p4891_p8)  ;;  %v6499_v51 = vld [vmem:[%s6483_s21 + $0xc8] sm:$0xff] (!%p4891_p8)  ;;  %v6505_v17 = vld [vmem:[%s6483_s21 + $0xb8] sm:$0xff] (!%p4891_p8)  ;;  %v1132_v25 = vsub.f32 (!%p4891_p8), %v6486_v48, %v6488_v10  ;;  %v1133_v56 = vsub.f32 (!%p4891_p8), %v6491_v11, %v6488_v10  ;;  %v1154_v2 = vsub.f32 (!%p4891_p8), %v6502_v20, %v6488_v10  ;;  %s7595_s5 = scalar_lea.vmem (!%p4891_p8), [#allocation3], %s6014_s6 }
 0x21e   : > { %1792 = vrot.lane.b32.xlu1 (!%p4891_p8), %v6480_v8, %s5784_s27  ;;  %v6508_v19 = vld [vmem:[%s6483_s21 + $0x10] sm:$0xff] (!%p4891_p8)  ;;  %v6511_v21 = vld [vmem:[%s6483_s21 + $0x18] sm:$0xff] (!%p4891_p8)  ;;  %v6522_v62 = vld [vmem:[%s6483_s21 + $0x20] sm:$0xff] (!%p4891_p8)  ;;  %v1156_v6 = vsub.f32 (!%p4891_p8), %v6496_v15, %v6488_v10  ;;  %v1157_v38 = vsub.f32 (!%p4891_p8), %v6499_v51, %v6488_v10  ;;  %v1155_v12 = vsub.f32 (!%p4891_p8), %v6505_v17, %v6488_v10  ;;  %vm1473_vm5 = vsmask.f32 (!%p4891_p8), 256  ;;  %s3111_s10 = sadd.f32 (!%p4891_p8), 256.0, %s3110_s16 }
 0x21f   : > { %v6514_v27 = vld [vmem:[%s6483_s21 + $0xd0] sm:$0xff] (!%p4891_p8)  ;;  %v6517_v23 = vld [vmem:[%s6483_s21 + $0xd8] sm:$0xff] (!%p4891_p8)  ;;  %v6525_v39 = vld [vmem:[%s6483_s21 + $0x28] sm:$0xff] (!%p4891_p8)  ;;  %v1167_v44 = vsub.s32 (!%p4891_p8), 0, %v1166_v14  ;;  %v1134_v1 = vsub.f32 (!%p4891_p8), %v6508_v19, %v6488_v10  ;;  %v1135_v43 = vsub.f32 (!%p4891_p8), %v6511_v21, %v6488_v10  ;;  %v1136_v54 = vsub.f32 (!%p4891_p8), %v6522_v62, %v6488_v10  ;;  %s3126_s29 = smul.f32 (!%p4891_p8), 256.0, %s3110_s16 }
 0x220   : > { %v1121_v33 = vld [vmem:[#allocation6] sm:$0x1] (!%p4891_p8)  ;;  %v6531_v45 = vld [vmem:[%s6483_s21 + $0xe8] sm:$0xff] (!%p4891_p8)  ;;  %v6540_v13 = vld [vmem:[%s6483_s21 + $0x30] sm:$0xff] (!%p4891_p8)  ;;  %v1158_v47 = vsub.f32 (!%p4891_p8), %v6514_v27, %v6488_v10  ;;  %v1159_v24 = vsub.f32 (!%p4891_p8), %v6517_v23, %v6488_v10  ;;  %v1137_v59 = vsub.f32 (!%p4891_p8), %v6525_v39, %v6488_v10  ;;  %vm1507_vm7 = vsmask.f32 (!%p4891_p8), 7424 }
 0x221   : > { %v1122_v4 = vmul.f32 (!%p4891_p8), 0.001953125, %v1121_v33  ;;  %v6528_v28 = vld [vmem:[%s6483_s21 + $0xe0] sm:$0xff] (!%p4891_p8)  ;;  %v6543_v57 = vld [vmem:[%s6483_s21 + $0x38] sm:$0xff] (!%p4891_p8)  ;;  %v6546_v42 = vld [vmem:[%s6483_s21 + $0xf0] sm:$0xff] (!%p4891_p8)  ;;  %v1161_v32 = vsub.f32 (!%p4891_p8), %v6531_v45, %v6488_v10  ;;  %v1138_v63 = vsub.f32 (!%p4891_p8), %v6540_v13, %v6488_v10  ;;  %vm1890_vm9 = vcmask (!%p4891_p8), 523264  }
 0x222   : > { %v6557_v22 = vld [vmem:[%s6483_s21 + $0xf8] sm:$0xff] (!%p4891_p8)  ;;  %v6560_v55 = vld [vmem:[%s6483_s21 + $0x40] sm:$0xff] (!%p4891_p8)  ;;  %v6566_v18 = vld [vmem:[%s6483_s21 + $0x88] sm:$0xff] (!%p4891_p8)  ;;  %v1160_v58 = vsub.f32 (!%p4891_p8), %v6528_v28, %v6488_v10  ;;  %v1139_v35 = vsub.f32 (!%p4891_p8), %v6543_v57, %v6488_v10  ;;  %v1162_v0 = vsub.f32 (!%p4891_p8), %v6546_v42, %v6488_v10  ;;  %vm3121_vm11 = vcmask (!%p4891_p8), 516096  }
 0x223   : > { %v1123_v7 = vadd.f32 1e-05, %v1122_v4  ;;  %v6563_v46 = vld [vmem:[%s6483_s21 + $0x80] sm:$0xff]  ;;  %v6569_v61 = vld [vmem:[%s6483_s21 + $0x90] sm:$0xff]  ;;  %v6574_v3 = vld [vmem:[%s6483_s21 + $0x48] sm:$0xff]  ;;  %v1163_v5 = vsub.f32 %v6557_v22, %v6488_v10 }
 0x224   : > { %v6577_v9 = vld [vmem:[%s6483_s21 + $0x50] sm:$0xff]  ;;  %v6580_v26 = vld [vmem:[%s6483_s21 + $0x58] sm:$0xff]  ;;  %v6592_v50 = vld [vmem:[%s6483_s21 + $0xa0] sm:$0xff] }
 0x225   : > { %5603 = vrsqrt.f32 %v1123_v7  ;;  %v6587_v40 = vld [vmem:[%s6483_s21 + $0x98] sm:$0xff]  ;;  %v6595_v30 = vld [vmem:[%s6483_s21 + $0xa8] sm:$0xff]  ;;  %v5567_v36 = vld [vmem:[%s9622_s4 + $0x40] sm:$0xff]  }
 0x226   : > { %v5568_v34 = vld [vmem:[%s9622_s4] sm:$0xff]   ;;  %5108 = vmatprep.subr.bf16.mxu0 %v5567_v36  ;;  %v5569_v33 = vld [vmem:[%s9622_s4 + $0x48] sm:$0xff]   ;;  %5408 = vmatprep.subr.bf16.mxu1 %v5567_v36  ;;  %v5571_v15 = vld [vmem:[%s9622_s4 + $0x50] sm:$0xff]  }
 0x227   : > { %v6622_v60 = vld [vmem:[%s9620_s2] ss:$0 sm:$0xff]  ;;  %5109 = vmatpush3.bf16.msra.mxu0 %v5568_v34  ;;  %v5570_v41 = vld [vmem:[%s9622_s4 + $0x8] sm:$0xff]   ;;  %5416 = vmatpush3.bf16.msra.mxu1 %v5568_v34  ;;  %vm6718_vm6 = vmand %vm1472_vm4, %vm1473_vm5 }
 0x228   : > { %5110 = vmatprep.subr.bf16.mxu0 %v5569_v33  ;;  %5409 = vmatprep.subr.bf16.mxu1 %v5569_v33  ;;  %v6658_v21 = vld [vmem:[%s9621_s3] ss:$0 sm:$0xff]  ;;  %v5577_v62 = vld [vmem:[%s9622_s4 + $0x68] sm:$0xff]   ;;  %v6886_v22 = vld [vmem:[%s6483_s21 + $0x70] sm:$0xff] }
 0x229   : > { %vm7285_vm10 = vmneg %vm1890_vm9 }
 0x22b   : > { %5111 = vmatpush3.bf16.msra.mxu0 %v5570_v41  ;;  %5417 = vmatpush3.bf16.msra.mxu1 %v5570_v41 }
 0x22c   : > { %5112 = vmatprep.subr.bf16.mxu0 %v5571_v15  ;;  %5410 = vmatprep.subr.bf16.mxu1 %v5571_v15 }
 0x22f   : > { %v5604_v37 = vpop.eup %5603 }
 0x230   : > { %v6633_v4 = vrot.slane %v5604_v37, %v1167_v44 }
 0x232   : > { %v1170_v51 = vmul.f32 %v6633_v4, %v1132_v25  ;;  %v1171_v20 = vmul.f32 %v6633_v4, %v1133_v56  ;;  %v1194_v17 = vmul.f32 %v6633_v4, %v1156_v6  ;;  %v1195_v19 = vmul.f32 %v6633_v4, %v1157_v38 }
 0x233   : > { %v1192_v44 = vmul.f32 %v6633_v4, %v1154_v2  ;;  %v1193_v36 = vmul.f32 %v6633_v4, %v1155_v12  ;;  %v1172_v34 = vmul.f32 %v6633_v4, %v1134_v1  ;;  %v1173_v37 = vmul.f32 %v6633_v4, %v1135_v43  ;;  %v5572_v2 = vld [vmem:[%s9622_s4 + $0x10] sm:$0xff]  }
 0x234   : > { %v1209_v25 = vmul.f32 %v6622_v60, %v1170_v51  ;;  %v1210_v56 = vmul.f32 %v6622_v60, %v1171_v20  ;;  %v1233_v6 = vmul.f32 %v6622_v60, %v1194_v17  ;;  %v1234_v38 = vmul.f32 %v6622_v60, %v1195_v19  ;;  %v5573_v51 = vld [vmem:[%s9622_s4 + $0x58] sm:$0xff]   ;;  %5113 = vmatpush3.bf16.msra.mxu0 %v5572_v2 }
 0x235   : > { %v1231_v12 = vmul.f32 %v6622_v60, %v1192_v44  ;;  %v1232_v1 = vmul.f32 %v6622_v60, %v1193_v36  ;;  %v1211_v43 = vmul.f32 %v6622_v60, %v1172_v34  ;;  %v1212_v33 = vmul.f32 %v6622_v60, %v1173_v37  ;;  %v5574_v44 = vld [vmem:[%s9622_s4 + $0x18] sm:$0xff]   ;;  %5114 = vmatprep.subr.bf16.mxu0 %v5573_v51 }
 0x236   : > { %v1248_v20 = vadd.f32 %v6658_v21, %v1209_v25  ;;  %v1249_v17 = vadd.f32 %v6658_v21, %v1210_v56  ;;  %v1272_v19 = vadd.f32 %v6658_v21, %v1233_v6  ;;  %v1273_v53 = vadd.f32 %v6658_v21, %v1234_v38  ;;  %v5575_v25 = vld [vmem:[%s9622_s4 + $0x60] sm:$0xff]   ;;  %5418 = vmatpush3.bf16.msra.mxu1 %v5572_v2 }
 0x237   : > { %v1270_v36 = vadd.f32 %v6658_v21, %v1231_v12  ;;  %v1271_v34 = vadd.f32 %v6658_v21, %v1232_v1  ;;  %v1250_v37 = vadd.f32 %v6658_v21, %v1211_v43  ;;  %v1251_v52 = vadd.f32 %v6658_v21, %v1212_v33  ;;  %5411 = vmatprep.subr.bf16.mxu1 %v5573_v51 }
 0x238   : > { %v1280_v56 = vmax.f32 %v1248_v20, 0.0  ;;  %v1281_v6 = vmax.f32 %v1249_v17, 0.0  ;;  %v1304_v41 = vmax.f32 %v1272_v19, 0.0  ;;  %v1305_v38 = vmax.f32 %v1273_v53, 0.0  ;;  %5115 = vmatpush3.bf16.msra.mxu0 %v5574_v44 }
 0x239   : > { %v1302_v31 = vmax.f32 %v1270_v36, 0.0  ;;  %v1303_v29 = vmax.f32 %v1271_v34, 0.0  ;;  %v1282_v16 = vmax.f32 %v1250_v37, 0.0  ;;  %v1283_v12 = vmax.f32 %v1251_v52, 0.0  ;;  %5116 = vmatprep.subr.bf16.mxu0 %v5575_v25 }
 0x23a   : > { %v1312_v1 = vpack.c.bf16 %v1281_v6, %v1280_v56  ;;  %v1324_v49 = vpack.c.bf16 %v1305_v38, %v1304_v41  ;;  %v1196_v15 = vmul.f32 %v6633_v4, %v1158_v47  ;;  %v1197_v43 = vmul.f32 %v6633_v4, %v1159_v24  ;;  %5419 = vmatpush3.bf16.msra.mxu1 %v5574_v44  ;;  %v5578_v56 = vld [vmem:[%s9622_s4 + $0x28] sm:$0xff]  }
 0x23b   : > { %v1323_v53 = vpack.c.bf16 %v1303_v29, %v1302_v31  ;;  %v1313_v33 = vpack.c.bf16 %v1283_v12, %v1282_v16  ;;  %v1174_v52 = vmul.f32 %v6633_v4, %v1136_v54  ;;  %v1175_v27 = vmul.f32 %v6633_v4, %v1137_v59  ;;  %v5576_v16 = vld [vmem:[%s9622_s4 + $0x20] sm:$0xff]   ;;  %5412 = vmatprep.subr.bf16.mxu1 %v5575_v25 }
 0x23c   : > { %v1329_v47 = vshrl.u32 %v1312_v1, 16  ;;  %v1332_v20 = vshll.u32 %v1312_v1, 16  ;;  %v1413_v17 = vshrl.u32 %v1324_v49, 16  ;;  %v1416_v23 = vshll.u32 %v1324_v49, 16  ;;  %5117 = vmatpush3.bf16.msra.mxu0 %v5576_v16 }
 0x23d   : > { %v1406_v29 = vshrl.u32 %v1323_v53, 16  ;;  %v1409_v24 = vshll.u32 %v1323_v53, 16  ;;  %v1336_v31 = vshrl.u32 %v1313_v33, 16  ;;  %v1339_v39 = vshll.u32 %v1313_v33, 16  ;;  %5118 = vmatprep.subr.bf16.mxu0 %v5577_v62 }
 0x23e   : > { %v1331_v54 = vrot.slane %v1329_v47, 7  ;;  %v1415_v59 = vrot.slane %v1413_v17, 7  ;;  %v1235_v2 = vmul.f32 %v6622_v60, %v1196_v15  ;;  %v1236_v49 = vmul.f32 %v6622_v60, %v1197_v43  ;;  %v5579_v43 = vld [vmem:[%s9622_s4 + $0x70] sm:$0xff]   ;;  %5420 = vmatpush3.bf16.msra.mxu1 %v5576_v16 }
 0x23f   : > { %v1408_v19 = vrot.slane %v1406_v29, 7  ;;  %v6722_v36 = vrot.slane %v1336_v31, 7  ;;  %v1213_v34 = vmul.f32 %v6622_v60, %v1174_v52  ;;  %v1214_v37 = vmul.f32 %v6622_v60, %v1175_v27  ;;  %v5580_v47 = vld [vmem:[%s9622_s4 + $0x30] sm:$0xff]   ;;  %5413 = vmatprep.subr.bf16.mxu1 %v5577_v62  ;;  %v5581_v62 = vld [vmem:[%s9622_s4 + $0x78] sm:$0xff]  }
 0x240   : > { %v1334_v44 = vor.u32 %v1332_v20, %v1331_v54  ;;  %v1418_v6 = vor.u32 %v1416_v23, %v1415_v59  ;;  %v1274_v41 = vadd.f32 %v6658_v21, %v1235_v2  ;;  %v1275_v38 = vadd.f32 %v6658_v21, %v1236_v49  ;;  %5119 = vmatpush3.bf16.msra.mxu0 %v5578_v56 }
 0x241   : > { %v1411_v12 = vor.u32 %v1409_v24, %v1408_v19  ;;  %v6733_v1 = vsel %vm6718_vm6, %v1408_v19, 0  ;;  %v1341_v15 = vor.u32 %v1339_v39, %v6722_v36  ;;  %v6738_v25 = vsel %vm6718_vm6, %v1331_v54, 0  ;;  %5120 = vmatprep.subr.bf16.mxu0 %v5579_v43 }
 0x242   : > { %v6745_v53 = vsel %vm6718_vm6, 0, %v1334_v44  ;;  %v6749_v33 = vsel %vm6718_vm6, 0, %v1418_v6  ;;  %v1656_v52 = vshll.u32 %v6733_v1, 16  ;;  %v1306_v27 = vmax.f32 %v1274_v41, 0.0  ;;  %v6776_v44 = vld [vmem:[%s6483_s21 + $0x60] sm:$0xff]  ;;  %5421 = vmatpush3.bf16.msra.mxu1 %v5578_v56 }
 0x243   : > { %1824 = vrot.lane.b32.xlu0 %v6745_v53, %s5784_s27  ;;  %v6759_v20 = vsel %vm6718_vm6, 0, %v1411_v12  ;;  %v6763_v17 = vsel %vm6718_vm6, 0, %v1341_v15  ;;  %v1307_v23 = vmax.f32 %v1275_v38, 0.0  ;;  %v1517_v29 = vshrl.u32 %v6745_v53, 16  ;;  %5414 = vmatprep.subr.bf16.mxu1 %v5579_v43 }
 0x244   : > { %v1649_v16 = vshrl.u32 %v6759_v20, 16  ;;  %v1651_v24 = vshll.u32 %v6759_v20, 16  ;;  %v1658_v31 = vrot.slane %v1656_v52, 1  ;;  %v1519_v39 = vshll.u32 %v6745_v53, 16  ;;  %5121 = vmatpush3.bf16.msra.mxu0 %v5580_v47 }
 0x245   : > { %v1325_v54 = vpack.c.bf16 %v1307_v23, %v1306_v27  ;;  %v1524_v2 = vshll.u32 %v6738_v25, 16  ;;  %v6772_v49 = vsel %vm6718_vm6, %v1415_v59, 0  ;;  %v1661_v19 = vshrl.u32 %v6749_v33, 16  ;;  %v5582_v23 = vld [vmem:[%s9622_s4 + $0x38] sm:$0xff]   ;;  %5122 = vmatprep.subr.bf16.mxu0 %v5581_v62 }
 0x246   : > { %v1653_v6 = vrot.slane %v1651_v24, 1  ;;  %v1521_v41 = vrot.slane %v1519_v39, 1  ;;  %v1663_v38 = vshll.u32 %v6749_v33, 16  ;;  %v1668_v12 = vshll.u32 %v6772_v49, 16  ;;  %5422 = vmatpush3.bf16.msra.mxu1 %v5580_v47 }
 0x247   : > { %1848 = vrot.lane.b32.xlu0 %v6749_v33, %s5784_s27  ;;  %v1420_v59 = vshrl.u32 %v1325_v54, 16  ;;  %v1423_v15 = vshll.u32 %v1325_v54, 16  ;;  %v1526_v52 = vrot.slane %v1524_v2, 1  ;;  %v1252_v27 = vadd.f32 %v6658_v21, %v1213_v34  ;;  %v6797_v34 = vld [vmem:[%s9622_s4 + $0x100] sm:$0xff]   ;;  %5415 = vmatprep.subr.bf16.mxu1 %v5581_v62 }
 0x248   : > { %v1654_v24 = vor.u32 %v1653_v6, %v1649_v16  ;;  %v1522_v39 = vor.u32 %v1521_v41, %v1517_v29  ;;  %v1665_v14 = vrot.slane %v1663_v38, 1  ;;  %v1670_v11 = vrot.slane %v1668_v12, 1  ;;  %5123 = vmatpush3.bf16.msra.mxu0 %v5582_v23 }
 0x249   : > { %v1422_v48 = vrot.slane %v1420_v59, 7  ;;  %v1253_v56 = vadd.f32 %v6658_v21, %v1214_v37  ;;  %v1284_v7 = vmax.f32 %v1252_v27, 0.0  ;;  %v1198_v54 = vmul.f32 %v6633_v4, %v1160_v58  ;;  %v5583_v58 = vld [vmem:[%s9622_s4 + $0xc0] sm:$0xff]   ;;  %5352 = vmatprep.subr.bf16.mxu0 %v6797_v34 }
 0x24a   : > { %v6800_v43 = vsel %vm1507_vm7, %v1654_v24, %v1658_v31  ;;  %v1666_v29 = vor.u32 %v1665_v14, %v1661_v19  ;;  %v1199_v37 = vmul.f32 %v6633_v4, %v1161_v32  ;;  %v1144_v28 = vsub.f32 %v6776_v44, %v6488_v10  ;;  %5423 = vmatpush3.bf16.msra.mxu1 %v5582_v23  ;;  %v6848_v24 = vld [vmem:[%s6483_s21 + $0x68] sm:$0xff] }
 0x24b   : > { %1816 = vrot.lane.b32.xlu1 %v6800_v43, %s5784_s27  ;;  %1826 = vrot.lane.b32.xlu0 %v6763_v17, %s5784_s27  ;;  %v1425_v14 = vor.u32 %v1423_v15, %v1422_v48  ;;  %v1285_v16 = vmax.f32 %v1253_v56, 0.0  ;;  %v1237_v45 = vmul.f32 %v6622_v60, %v1198_v54  ;;  %v6819_v32 = vsel %vm6718_vm6, %v6722_v36, 0 }
 0x24c   : > { %v6822_v47 = vsel %vm1507_vm7, %v1522_v39, %v1526_v52  ;;  %v1238_v31 = vmul.f32 %v6622_v60, %v1199_v37  ;;  %v1529_v2 = vshrl.u32 %v6763_v17, 16  ;;  %v1531_v19 = vshll.u32 %v6763_v17, 16  ;;  %5220 = vmatprep.subr.bf16.mxu1 %v5583_v58 }
 0x24d   : > { %v6829_v6 = vsel %vm6718_vm6, 0, %v1425_v14  ;;  %v1314_v41 = vpack.c.bf16 %v1285_v16, %v1284_v7  ;;  %v1276_v36 = vadd.f32 %v6658_v21, %v1237_v45  ;;  %v1536_v38 = vshll.u32 %v6819_v32, 16 }
 0x24e   : > { %v6835_v12 = vsel %vm1507_vm7, %v1666_v29, %v1670_v11  ;;  %v1277_v59 = vadd.f32 %v6658_v21, %v1238_v31  ;;  %v1533_v15 = vrot.slane %v1531_v19, 1  ;;  %v6840_v62 = vsel %vm6718_vm6, %v1422_v48, 0 }
 0x24f   : > { %1850 = vrot.lane.b32.xlu1 %v6829_v6, %s5784_s27  ;;  %1794 = vrot.lane.b32.xlu0 %v6822_v47, %s5784_s27  ;;  %v1343_v7 = vshrl.u32 %v1314_v41, 16  ;;  %v1346_v52 = vshll.u32 %v1314_v41, 16  ;;  %v1308_v27 = vmax.f32 %v1276_v36, 0.0  ;;  %v1673_v11 = vshrl.u32 %v6829_v6, 16 }
 0x250   : > { %v1309_v39 = vmax.f32 %v1277_v59, 0.0  ;;  %v1534_v56 = vor.u32 %v1533_v15, %v1529_v2  ;;  %v1538_v54 = vrot.slane %v1536_v38, 1  ;;  %v1675_v48 = vshll.u32 %v6829_v6, 16 }
 0x251   : > { %v1345_v23 = vrot.slane %v1343_v7, 7  ;;  %v1176_v29 = vmul.f32 %v6633_v4, %v1138_v63  ;;  %v1177_v37 = vmul.f32 %v6633_v4, %v1139_v35  ;;  %v1200_v14 = vmul.f32 %v6633_v4, %v1162_v0 }
 0x252   : > { %v1326_v16 = vpack.c.bf16 %v1309_v39, %v1308_v27  ;;  %v1677_v45 = vrot.slane %v1675_v48, 1  ;;  %v1680_v58 = vshll.u32 %v6840_v62, 16  ;;  %v1145_v13 = vsub.f32 %v6848_v24, %v6488_v10 }
 0x253   : > { %1818 = vrot.lane.b32.xlu1 %v6835_v12, %s5784_s27  ;;  %v1348_v63 = vor.u32 %v1346_v52, %v1345_v23  ;;  %v1215_v57 = vmul.f32 %v6622_v60, %v1176_v29  ;;  %v1216_v35 = vmul.f32 %v6622_v60, %v1177_v37  ;;  %v1201_v42 = vmul.f32 %v6633_v4, %v1163_v5 }
 0x254   : > { %v1427_v0 = vshrl.u32 %v1326_v16, 16  ;;  %v1430_v31 = vshll.u32 %v1326_v16, 16  ;;  %v6875_v2 = vsel %vm1507_vm7, %v1534_v56, %v1538_v54  ;;  %v1239_v19 = vmul.f32 %v6622_v60, %v1200_v14 }
 0x255   : > { %v6880_v41 = vsel %vm6718_vm6, 0, %v1348_v63  ;;  %v1254_v36 = vadd.f32 %v6658_v21, %v1215_v57  ;;  %v1255_v38 = vadd.f32 %v6658_v21, %v1216_v35  ;;  %v1240_v59 = vmul.f32 %v6622_v60, %v1201_v42 }
 0x256   : > { %1828 = vrot.lane.b32.xlu0 %v6880_v41, %s5784_s27  ;;  %v1429_v5 = vrot.slane %v1427_v0, 7  ;;  %v1678_v15 = vor.u32 %v1677_v45, %v1673_v11  ;;  %v1682_v7 = vrot.slane %v1680_v58, 1  ;;  %v1278_v52 = vadd.f32 %v6658_v21, %v1239_v19 }
 0x257   : > { %v1286_v27 = vmax.f32 %v1254_v36, 0.0  ;;  %v1287_v39 = vmax.f32 %v1255_v38, 0.0  ;;  %v1279_v56 = vadd.f32 %v6658_v21, %v1240_v59  ;;  %v6894_v54 = vsel %vm6718_vm6, %v1345_v23, 0 }
 0x258   : > { %v1432_v48 = vor.u32 %v1430_v31, %v1429_v5  ;;  %v1310_v29 = vmax.f32 %v1278_v52, 0.0  ;;  %v1543_v37 = vshll.u32 %v6880_v41, 16  ;;  %v1146_v14 = vsub.f32 %v6886_v22, %v6488_v10 }
 0x259   : > { %v1315_v16 = vpack.c.bf16 %v1287_v39, %v1286_v27  ;;  %v1311_v11 = vmax.f32 %v1279_v56, 0.0  ;;  %v6901_v45 = vsel %vm6718_vm6, %v1429_v5, 0  ;;  %v9679_v58 = vsub.f32 %v6560_v55, %v6488_v10 }
 0x25a   : > { %v6909_v23 = vsel %vm6718_vm6, 0, %v1432_v48  ;;  %1796 = vrot.lane.b32.xlu0 %v6875_v2, %s5784_s27  ;;  %v1541_v57 = vshrl.u32 %v6880_v41, 16  ;;  %v1545_v35 = vrot.slane %v1543_v37, 1  ;;  %v1548_v42 = vshll.u32 %v6894_v54, 16 }
 0x25b   : > { %v1178_v63 = vmul.f32 %v6633_v4, %v9679_v58  ;;  %1852 = vrot.lane.b32.xlu1 %v6909_v23, %s5784_s27  ;;  %v6918_v0 = vsel %vm1507_vm7, %v1678_v15, %v1682_v7  ;;  %v1350_v55 = vshrl.u32 %v1315_v16, 16  ;;  %v1353_v31 = vshll.u32 %v1315_v16, 16 }
 0x25c   : > { %v1327_v19 = vpack.c.bf16 %v1311_v11, %v1310_v29  ;;  %v1685_v36 = vshrl.u32 %v6909_v23, 16  ;;  %v1687_v38 = vshll.u32 %v6909_v23, 16  ;;  %v1692_v59 = vshll.u32 %v6901_v45, 16 }
 0x25d   : > { %v9680_v5 = vsub.f32 %v6574_v3, %v6488_v10  ;;  %v1352_v27 = vrot.slane %v1350_v55, 7  ;;  %v1217_v15 = vmul.f32 %v6622_v60, %v1178_v63  ;;  %v1546_v7 = vor.u32 %v1545_v35, %v1541_v57  ;;  %v1104_v55 = vld [vmem:[%s6483_s21 + $0x78] sm:$0xff] }
 0x25e   : > { %v1434_v39 = vshrl.u32 %v1327_v19, 16  ;;  %v1437_v56 = vshll.u32 %v1327_v19, 16  ;;  %v1550_v48 = vrot.slane %v1548_v42, 1  ;;  %v1689_v29 = vrot.slane %v1687_v38, 1 }
 0x25f   : > { %v1179_v52 = vmul.f32 %v6633_v4, %v9680_v5  ;;  %1820 = vrot.lane.b32.xlu1 %v6918_v0, %s5784_s27  ;;  %v1355_v16 = vor.u32 %v1353_v31, %v1352_v27  ;;  %v1256_v3 = vadd.f32 %v6658_v21, %v1217_v15  ;;  %v6936_v58 = vsel %vm6718_vm6, %v1352_v27, 0 }
 0x260   : > { %v6931_v11 = vrot.slane %v1434_v39, 7  ;;  %v1690_v19 = vor.u32 %v1689_v29, %v1685_v36  ;;  %v1694_v63 = vrot.slane %v1692_v59, 1  ;;  %v1560_v35 = vshll.u32 %v6936_v58, 16 }
 0x261   : > { %v1218_v37 = vmul.f32 %v6622_v60, %v1179_v52  ;;  %v6943_v42 = vsel %vm6718_vm6, 0, %v1355_v16  ;;  %v1288_v38 = vmax.f32 %v1256_v3, 0.0  ;;  %v9681_v5 = vsub.f32 %v6577_v9, %v6488_v10 }
 0x262   : > { %v1439_v31 = vor.u32 %v1437_v56, %v6931_v11  ;;  %1830 = vrot.lane.b32.xlu0 %v6943_v42, %s5784_s27  ;;  %v1553_v59 = vshrl.u32 %v6943_v42, 16  ;;  %v1555_v27 = vshll.u32 %v6943_v42, 16  ;;  %v1147_v39 = vsub.f32 %v1104_v55, %v6488_v10 }
 0x263   : > { %v1257_v57 = vadd.f32 %v6658_v21, %v1218_v37  ;;  %v1180_v52 = vmul.f32 %v6633_v4, %v9681_v5  ;;  %v6960_v56 = vsel %vm1507_vm7, %v1546_v7, %v1550_v48  ;;  %v1730_v9 = vrot.slane %v6745_v53, 1 }
 0x264   : > { %v6957_v15 = vsel %vm6718_vm6, 0, %v1439_v31  ;;  %v9682_v29 = vsub.f32 %v6580_v26, %v6488_v10  ;;  %v6970_v16 = vsel %vm1507_vm7, %v1690_v19, %v1694_v63  ;;  %v1557_v55 = vrot.slane %v1555_v27, 1 }
 0x265   : > { %v1289_v36 = vmax.f32 %v1257_v57, 0.0  ;;  %1854 = vrot.lane.b32.xlu1 %v6957_v15, %s5784_s27  ;;  %v1219_v57 = vmul.f32 %v6622_v60, %v1180_v52  ;;  %v1562_v7 = vrot.slane %v1560_v35, 1  ;;  %v1182_v26 = vmul.f32 %v6633_v4, %v1144_v28 }
 0x266   : > { %v1181_v37 = vmul.f32 %v6633_v4, %v9682_v29  ;;  %v1183_v31 = vmul.f32 %v6633_v4, %v1145_v13  ;;  %1798 = vrot.lane.b32.xlu0 %v6960_v56, %s5784_s27  ;;  %v1731_v5 = vrot.slane %v6738_v25, 1  ;;  %v1734_v27 = vrot.slane %v6819_v32, 1 }
 0x267   : > { %v1316_v3 = vpack.c.bf16 %v1289_v36, %v1288_v38  ;;  %v1558_v38 = vor.u32 %v1557_v55, %v1553_v59  ;;  %v1258_v35 = vadd.f32 %v6658_v21, %v1219_v57  ;;  %v1221_v44 = vmul.f32 %v6622_v60, %v1182_v26 }
 0x268   : > { %v1220_v48 = vmul.f32 %v6622_v60, %v1181_v37  ;;  %v1222_v28 = vmul.f32 %v6622_v60, %v1183_v31  ;;  %v1733_v36 = vrot.slane %v6763_v17, 1  ;;  %v1184_v57 = vmul.f32 %v6633_v4, %v1146_v14 }
 0x269   : > { %v1357_v19 = vshrl.u32 %v1316_v3, 16  ;;  %v1360_v63 = vshll.u32 %v1316_v3, 16  ;;  %1822 = vrot.lane.b32.xlu1 %v6970_v16, %s5784_s27  ;;  %v1290_v13 = vmax.f32 %v1258_v35, 0.0  ;;  %v6994_v59 = vsel %vm1507_vm7, %v1558_v38, %v1562_v7 }
 0x26a   : > { %v1259_v52 = vadd.f32 %v6658_v21, %v1220_v48  ;;  %v1260_v25 = vadd.f32 %v6658_v21, %v1221_v44  ;;  %v1261_v37 = vadd.f32 %v6658_v21, %v1222_v28  ;;  %v1185_v32 = vmul.f32 %v6633_v4, %v1147_v39 }
 0x26b   : > { %v1359_v24 = vrot.slane %v1357_v19, 7  ;;  %v1764_v51 = vrot.slane %v6733_v1, 1 }
 0x26c   : > { %v1291_v29 = vmax.f32 %v1259_v52, 0.0  ;;  %v1292_v26 = vmax.f32 %v1260_v25, 0.0  ;;  %v1293_v31 = vmax.f32 %v1261_v37, 0.0  ;;  %v1224_v22 = vmul.f32 %v6622_v60, %v1185_v32 }
 0x26d   : > { %v1362_v3 = vor.u32 %v1360_v63, %v1359_v24  ;;  %v7000_v55 = vsel %vm6718_vm6, %v1359_v24, 0  ;;  %1800 = vrot.lane.b32.xlu1 %v6994_v59, %s5784_s27  ;;  %v1223_v63 = vmul.f32 %v6622_v60, %v1184_v57  ;;  %v7021_v52 = vsel %vm1727_vm8, %v1730_v9, %v1731_v5 }
 0x26e   : > { %v1317_v48 = vpack.c.bf16 %v1291_v29, %v1290_v13  ;;  %v1572_v7 = vshll.u32 %v7000_v55, 16  ;;  %v1318_v44 = vpack.c.bf16 %v1293_v31, %v1292_v26  ;;  %v1263_v24 = vadd.f32 %v6658_v21, %v1224_v22 }
 0x26f   : > { %v7010_v19 = vsel %vm6718_vm6, 0, %v1362_v3  ;;  %v1262_v28 = vadd.f32 %v6658_v21, %v1223_v63  ;;  %v7026_v37 = vsel %vm1727_vm8, %v1733_v36, %v1734_v27  ;;  %v1736_v31 = vrot.slane %v6880_v41, 1 }
 0x270   : > { %1832 = vrot.lane.b32.xlu0 %v7010_v19, %s5784_s27  ;;  %v1364_v14 = vshrl.u32 %v1317_v48, 16  ;;  %v1367_v39 = vshll.u32 %v1317_v48, 16  ;;  %v1565_v38 = vshrl.u32 %v7010_v19, 16  ;;  %v1567_v35 = vshll.u32 %v7010_v19, 16 }
 0x271   : > { %v1574_v25 = vrot.slane %v1572_v7, 1  ;;  %v1371_v3 = vshrl.u32 %v1318_v44, 16  ;;  %v1374_v57 = vshll.u32 %v1318_v44, 16  ;;  %v1294_v32 = vmax.f32 %v1262_v28, 0.0 }
 0x272   : > { %v1366_v13 = vrot.slane %v1364_v14, 7  ;;  %v1569_v29 = vrot.slane %v1567_v35, 1  ;;  %v1295_v48 = vmax.f32 %v1263_v24, 0.0  ;;  %v9683_v27 = vsub.f32 %v6563_v46, %v6488_v10 }
 0x273   : > { %v1373_v63 = vrot.slane %v1371_v3, 7  ;;  %v9684_v35 = vsub.f32 %v6566_v18, %v6488_v10 }
 0x274   : > { %1856 = vrot.lane.b32.xlu0 %v7021_v52, %s5784_s27  ;;  %v1369_v9 = vor.u32 %v1367_v39, %v1366_v13  ;;  %v1570_v5 = vor.u32 %v1569_v29, %v1565_v38  ;;  %v7032_v26 = vsel %vm6718_vm6, %v1366_v13, 0  ;;  %v1319_v36 = vpack.c.bf16 %v1295_v48, %v1294_v32 }
 0x275   : > { %v1584_v7 = vshll.u32 %v7032_v26, 16  ;;  %v1186_v22 = vmul.f32 %v6633_v4, %v9683_v27  ;;  %v1737_v38 = vrot.slane %v6894_v54, 1  ;;  %v1187_v44 = vmul.f32 %v6633_v4, %v9684_v35 }
 0x276   : > { %v7042_v14 = vsel %vm6718_vm6, 0, %v1369_v9  ;;  %v7045_v39 = vsel %vm1507_vm7, %v1570_v5, %v1574_v25  ;;  %v1376_v46 = vor.u32 %v1374_v57, %v1373_v63  ;;  %v1378_v29 = vshrl.u32 %v1319_v36, 16 }
 0x277   : > { %1834 = vrot.lane.b32.xlu1 %v7042_v14, %s5784_s27  ;;  %v1577_v28 = vshrl.u32 %v7042_v14, 16  ;;  %v1579_v24 = vshll.u32 %v7042_v14, 16  ;;  %v1586_v13 = vrot.slane %v1584_v7, 1  ;;  %v1381_v25 = vshll.u32 %v1319_v36, 16 }
 0x278   : > { %1802 = vrot.lane.b32.xlu0 %v7045_v39, %s5784_s27  ;;  %v7060_v54 = vsel %vm6718_vm6, %v1373_v63, 0  ;;  %v1225_v18 = vmul.f32 %v6622_v60, %v1186_v22  ;;  %v7065_v3 = vsel %vm6718_vm6, 0, %v1376_v46  ;;  %v1226_v48 = vmul.f32 %v6622_v60, %v1187_v44 }
 0x279   : > { %v1581_v57 = vrot.slane %v1579_v24, 1  ;;  %v1596_v32 = vshll.u32 %v7060_v54, 16  ;;  %v1380_v9 = vrot.slane %v1378_v29, 7  ;;  %v1589_v5 = vshrl.u32 %v7065_v3, 16 }
 0x27a   : > { %v1591_v7 = vshll.u32 %v7065_v3, 16  ;;  %v1264_v36 = vadd.f32 %v6658_v21, %v1225_v18  ;;  %v7075_v27 = vsel %vm1727_vm8, %v1736_v31, %v1737_v38  ;;  %v1739_v22 = vrot.slane %v6943_v42, 1 }
 0x27b   : > { %1858 = vrot.lane.b32.xlu1 %v7026_v37, %s5784_s27  ;;  %v1582_v63 = vor.u32 %v1581_v57, %v1577_v28  ;;  %v1265_v35 = vadd.f32 %v6658_v21, %v1226_v48  ;;  %v1383_v44 = vor.u32 %v1381_v25, %v1380_v9  ;;  %v7083_v29 = vsel %vm6718_vm6, %v1380_v9, 0 }
 0x27c   : > { %1836 = vrot.lane.b32.xlu0 %v7065_v3, %s5784_s27  ;;  %v1593_v46 = vrot.slane %v1591_v7, 1  ;;  %v1296_v24 = vmax.f32 %v1264_v36, 0.0  ;;  %v1598_v28 = vrot.slane %v1596_v32, 1  ;;  %v1740_v31 = vrot.slane %v6936_v58, 1 }
 0x27d   : > { %v7086_v18 = vsel %vm1507_vm7, %v1582_v63, %v1586_v13  ;;  %v1297_v38 = vmax.f32 %v1265_v35, 0.0  ;;  %v7091_v57 = vsel %vm6718_vm6, 0, %v1383_v44  ;;  %v9685_v25 = vsub.f32 %v6569_v61, %v6488_v10 }
 0x27e   : > { %v1594_v48 = vor.u32 %v1593_v46, %v1589_v5  ;;  %v9686_v9 = vsub.f32 %v6587_v40, %v6488_v10  ;;  %v1601_v32 = vshrl.u32 %v7091_v57, 16  ;;  %v1603_v36 = vshll.u32 %v7091_v57, 16 }
 0x27f   : > { %v1188_v7 = vmul.f32 %v6633_v4, %v9685_v25  ;;  %1804 = vrot.lane.b32.xlu1 %v7086_v18, %s5784_s27  ;;  %v1320_v58 = vpack.c.bf16 %v1297_v38, %v1296_v24  ;;  %v1608_v5 = vshll.u32 %v7083_v29, 16  ;;  %v9687_v25 = vsub.f32 %v6592_v50, %v6488_v10 }
 0x280   : > { %v1189_v13 = vmul.f32 %v6633_v4, %v9686_v9  ;;  %1860 = vrot.lane.b32.xlu0 %v7075_v27, %s5784_s27  ;;  %v7111_v40 = vsel %vm1507_vm7, %v1594_v48, %v1598_v28  ;;  %v1605_v46 = vrot.slane %v1603_v36, 1  ;;  %v7126_v28 = vsel %vm1727_vm8, %v1739_v22, %v1740_v31 }
 0x281   : > { %v1227_v61 = vmul.f32 %v6622_v60, %v1188_v7  ;;  %v1385_v35 = vshrl.u32 %v1320_v58, 16  ;;  %v1388_v44 = vshll.u32 %v1320_v58, 16  ;;  %v1190_v9 = vmul.f32 %v6633_v4, %v9687_v25 }
 0x282   : > { %v1228_v63 = vmul.f32 %v6622_v60, %v1189_v13  ;;  %v9688_v7 = vsub.f32 %v6595_v30, %v6488_v10  ;;  %v1606_v58 = vor.u32 %v1605_v46, %v1601_v32  ;;  %v1610_v36 = vrot.slane %v1608_v5, 1 }
 0x283   : > { %v1266_v24 = vadd.f32 %v6658_v21, %v1227_v61  ;;  %1838 = vrot.lane.b32.xlu1 %v7091_v57, %s5784_s27  ;;  %v1387_v48 = vrot.slane %v1385_v35, 7  ;;  %v1743_v25 = vrot.slane %v7000_v55, 1 }
 0x284   : > { %v1267_v38 = vadd.f32 %v6658_v21, %v1228_v63  ;;  %v1191_v13 = vmul.f32 %v6633_v4, %v9688_v7  ;;  %1806 = vrot.lane.b32.xlu0 %v7111_v40, %s5784_s27  ;;  %v1229_v63 = vmul.f32 %v6622_v60, %v1190_v9  ;;  %v1742_v4 = vrot.slane %v7010_v19, 1 }
 0x285   : > { %v1298_v50 = vmax.f32 %v1266_v24, 0.0  ;;  %v1390_v30 = vor.u32 %v1388_v44, %v1387_v48  ;;  %v7136_v22 = vsel %vm6718_vm6, %v1387_v48, 0  ;;  %v7148_v55 = vsel %vm1507_vm7, %v1606_v58, %v1610_v36 }
 0x286   : > { %v1299_v61 = vmax.f32 %v1267_v38, 0.0  ;;  %v1230_v10 = vmul.f32 %v6622_v60, %v1191_v13  ;;  %v1620_v32 = vshll.u32 %v7136_v22, 16  ;;  %v1268_v5 = vadd.f32 %v6658_v21, %v1229_v63 }
 0x287   : > { %1862 = vrot.lane.b32.xlu1 %v7126_v28, %s5784_s27  ;;  %v7145_v60 = vsel %vm6718_vm6, 0, %v1390_v30  ;;  %v1745_v58 = vrot.slane %v7042_v14, 1 }
 0x288   : > { %v1321_v31 = vpack.c.bf16 %v1299_v61, %v1298_v50  ;;  %v1269_v35 = vadd.f32 %v6658_v21, %v1230_v10  ;;  %1840 = vrot.lane.b32.xlu0 %v7145_v60, %s5784_s27  ;;  %v1613_v24 = vshrl.u32 %v7145_v60, 16  ;;  %v1615_v38 = vshll.u32 %v7145_v60, 16 }
 0x289   : > { %v7155_v21 = vsel %vm1727_vm8, %v1742_v4, %v1743_v25  ;;  %v1300_v9 = vmax.f32 %v1268_v5, 0.0  ;;  %v1622_v50 = vrot.slane %v1620_v32, 1  ;;  %v1746_v10 = vrot.slane %v7032_v26, 1 }
 0x28a   : > { %v1392_v44 = vshrl.u32 %v1321_v31, 16  ;;  %v1395_v46 = vshll.u32 %v1321_v31, 16  ;;  %v1301_v7 = vmax.f32 %v1269_v35, 0.0  ;;  %v1617_v48 = vrot.slane %v1615_v38, 1 }
 0x28b   : > { %1808 = vrot.lane.b32.xlu1 %v7148_v55, %s5784_s27  ;;  %v1749_v38 = vrot.slane %v7060_v54, 1 }
 0x28c   : > { %v1394_v13 = vrot.slane %v1392_v44, 7  ;;  %v1322_v36 = vpack.c.bf16 %v1301_v7, %v1300_v9  ;;  %1864 = vrot.lane.b32.xlu0 %v7155_v21, %s5784_s27  ;;  %v1618_v63 = vor.u32 %v1617_v48, %v1613_v24  ;;  %v1748_v24 = vrot.slane %v7065_v3, 1 }
 0x28e   : > { %v1397_v61 = vor.u32 %v1395_v46, %v1394_v13  ;;  %v1500_v30 = vsel %vm6718_vm6, %v1394_v13, 0  ;;  %v1399_v4 = vshrl.u32 %v1322_v36, 16  ;;  %v1402_v25 = vshll.u32 %v1322_v36, 16 }
 0x28f   : > { %v1632_v31 = vshll.u32 %v1500_v30, 16  ;;  %v7170_v5 = vsel %vm1507_vm7, %v1618_v63, %v1622_v50  ;;  %v7179_v46 = vsel %vm1727_vm8, %v1745_v58, %v1746_v10  ;;  %v7199_v10 = vsel %vm1727_vm8, %v1748_v24, %v1749_v38 }
 0x290   : > { %v7167_v32 = vsel %vm6718_vm6, 0, %v1397_v61  ;;  %v1401_v35 = vrot.slane %v1399_v4, 7  ;;  %1810 = vrot.lane.b32.xlu0 %v7170_v5, %s5784_s27 }
 0x291   : > { %1842 = vrot.lane.b32.xlu1 %v7167_v32, %s5784_s27  ;;  %v1625_v44 = vshrl.u32 %v7167_v32, 16  ;;  %v1627_v26 = vshll.u32 %v7167_v32, 16  ;;  %v1634_v13 = vrot.slane %v1632_v31, 1 }
 0x292   : > { %v1404_v9 = vor.u32 %v1402_v25, %v1401_v35  ;;  %v1501_v48 = vsel %vm6718_vm6, %v1401_v35, 0  ;;  %v1751_v35 = vrot.slane %v7091_v57, 1 }
 0x293   : > { %v1629_v7 = vrot.slane %v1627_v26, 1  ;;  %v1644_v50 = vshll.u32 %v1501_v48, 16  ;;  %v1754_v26 = vrot.slane %v7145_v60, 1 }
 0x294   : > { %v7189_v36 = vsel %vm6718_vm6, 0, %v1404_v9  ;;  %v1755_v9 = vrot.slane %v7136_v22, 1 }
 0x295   : > { %1866 = vrot.lane.b32.xlu1 %v7179_v46, %s5784_s27  ;;  %v1630_v58 = vor.u32 %v1629_v7, %v1625_v44  ;;  %1844 = vrot.lane.b32.xlu0 %v7189_v36, %s5784_s27  ;;  %v1637_v54 = vshrl.u32 %v7189_v36, 16  ;;  %v1639_v61 = vshll.u32 %v7189_v36, 16  ;;  %v1646_v25 = vrot.slane %v1644_v50, 1 }
 0x296   : > { %v1752_v44 = vrot.slane %v7083_v29, 1  ;;  %v1757_v7 = vrot.slane %v7167_v32, 1  ;;  %v7221_v29 = vsel %vm1727_vm8, %v1754_v26, %v1755_v9  ;;  %v1760_v22 = vrot.slane %v7189_v36, 1 }
 0x297   : > { %v7196_v63 = vsel %vm1507_vm7, %v1630_v58, %v1634_v13  ;;  %v1641_v4 = vrot.slane %v1639_v61, 1  ;;  %v1758_v13 = vrot.slane %v1500_v30, 1  ;;  %v1761_v50 = vrot.slane %v1501_v48, 1 }
 0x298   : > { %v7217_v38 = vsel %vm1727_vm8, %v1751_v35, %v1752_v44  ;;  %v1778_v58 = vshll.u32 %v6957_v15, 16  ;;  %v1776_v48 = vshrl.u32 %v6957_v15, 16  ;;  %v1767_v35 = vrot.slane %v6772_v49, 1 }
 0x299   : > { %1812 = vrot.lane.b32.xlu1 %v7196_v63, %s5784_s27  ;;  %1868 = vrot.lane.b32.xlu0 %v7199_v10, %s5784_s27  ;;  %v1642_v31 = vor.u32 %v1641_v4, %v1637_v54  ;;  %v1506_v54 = vsel %vm6718_vm6, %v6931_v11, 0  ;;  %v7233_v30 = vsel %vm1727_vm8, %v1757_v7, %v1758_v13  ;;  %v7236_v61 = vsel %vm1727_vm8, %v1760_v22, %v1761_v50 }
 0x29a   : > { %v1780_v4 = vrot.slane %v1778_v58, 1  ;;  %v1766_v11 = vrot.slane %v6749_v33, 1  ;;  %v1769_v7 = vrot.slane %v6829_v6, 1  ;;  %v1770_v13 = vrot.slane %v6840_v62, 1 }
 0x29b   : > { %v7210_v24 = vsel %vm1507_vm7, %v1642_v31, %v1646_v25  ;;  %v1783_v25 = vshll.u32 %v1506_v54, 16  ;;  %v1763_v31 = vrot.slane %v6759_v20, 1  ;;  %v1789_v22 = vrot.slane %v6957_v15, 1 }
 0x29c   : > { %v1781_v44 = vor.u32 %v1780_v4, %v1776_v48  ;;  %v7255_v1 = vsel %vm1727_vm8, %v1766_v11, %v1767_v35  ;;  %v1790_v50 = vrot.slane %v1506_v54, 1  ;;  %v7264_v58 = vsel %vm1727_vm8, %v1769_v7, %v1770_v13  ;;  %v7282_v54 = vpop.permute.xlu1 %1792  ;;  %v5597_v11 = vld [vmem:[%s9622_s4 + $0x108] sm:$0xff]   ;;  %v5585_v7 = vld [vmem:[%s9622_s4 + $0x80] sm:$0xff]  }
 0x29d   : > { %1846 = vrot.lane.b32.xlu1 %v6759_v20, %s5784_s27  ;;  %1814 = vrot.lane.b32.xlu0 %v7210_v24, %s5784_s27  ;;  %v1785_v26 = vrot.slane %v1783_v25, 1  ;;  %v7248_v9 = vsel %vm1727_vm8, %v1763_v31, %v1764_v51  ;;  %v1772_v62 = vrot.slane %v6909_v23, 1  ;;  %v1773_v48 = vrot.slane %v6901_v45, 1 }
 0x29e   : > { %v7273_v4 = vsel %vm1727_vm8, %v1789_v22, %v1790_v50  ;;  %v5586_v50 = vld [vmem:[%s9622_s4 + $0xc8] sm:$0xff]  }
 0x29f   : > { %v7260_v49 = vsel %vm1507_vm7, %v1781_v44, %v1785_v26  ;;  %v7276_v25 = vsel %vm1727_vm8, %v1772_v62, %v1773_v48  ;;  %v5601_v26 = vld [vmem:[%s9622_s4 + $0x110] sm:$0xff]   ;;  %v5602_v48 = vld [vmem:[%s9622_s4 + $0x118] sm:$0xff]  }
 0x2a1   : > { %1870 = vrot.lane.b32.xlu1 %v7217_v38, %s5784_s27  ;;  %1872 = vrot.lane.b32.xlu0 %v7221_v29, %s5784_s27 }
 0x2a5   : > { %1874 = vrot.lane.b32.xlu1 %v7233_v30, %s5784_s27  ;;  %1876 = vrot.lane.b32.xlu0 %v7236_v61, %s5784_s27 }
 0x2a9   : > { %1878 = vrot.lane.b32.xlu1 %v7248_v9, %s5784_s27  ;;  %1880 = vrot.lane.b32.xlu0 %v7255_v1, %s5784_s27 }
 0x2ad   : > { %1882 = vrot.lane.b32.xlu1 %v7264_v58, %s5784_s27  ;;  %1888 = vrot.lane.b32.xlu0 %v7260_v49, %s5784_s27 }
 0x2b1   : > { %1884 = vrot.lane.b32.xlu1 %v7276_v25, %s5784_s27  ;;  %1886 = vrot.lane.b32.xlu0 %v7273_v4, %s5784_s27 }
 0x2b5   : > { %v1825_v45 = vpop.permute.xlu0 %1824 }
 0x2b6   : > { %v1941_v51 = vsel %vm1890_vm9, %v6480_v8, %v1825_v45  ;;  %v5587_v45 = vld [vmem:[%s9622_s4 + $0x88] sm:$0xff]  }
 0x2b7   : > { %2423 = vmatprep.mubr.bf16.mxu0 %v1941_v51 }
 0x2b8   : > { %4932 = vmatmul.mubr.msk.bf16.vlgmr.msra.gmra.mrb[0].mxu0 %vm7285_vm10, %v7282_v54 }
 0x2b9   : > { %v1849_v35 = vpop.permute.xlu0 %1848  ;;  %5353 = vmatpush3.bf16.msra.mxu0 %v6797_v34 }
 0x2ba   : > { %v1989_v44 = vsel %vm1890_vm9, %v7248_v9, %v1849_v35  ;;  %5354 = vmatprep.subr.bf16.mxu0 %v5597_v11 }
 0x2bb   : > { %2519 = vmatprep.mubr.bf16.mxu1 %v1989_v44  ;;  %v5589_v44 = vld [vmem:[%s9622_s4 + $0x90] sm:$0xff]  }
 0x2bd   : > { %v1817_v13 = vpop.permute.xlu1 %1816  ;;  %v1827_v22 = vpop.permute.xlu0 %1826  ;;  %5355 = vmatpush3.bf16.msra.mxu0 %v5597_v11 }
 0x2be   : > { %v7311_v34 = vsel %vm1890_vm9, %v6759_v20, %v1817_v13  ;;  %v1945_v62 = vsel %vm1890_vm9, %v7021_v52, %v1827_v22  ;;  %5356 = vmatprep.subr.bf16.mxu0 %v5601_v26  ;;  %v5588_v52 = vld [vmem:[%s9622_s4 + $0xd0] sm:$0xff]   ;;  %v5591_v22 = vld [vmem:[%s9622_s4 + $0x98] sm:$0xff]  }
 0x2bf   : > { %2520 = vmatmul.mubr.bf16.vlgmr.msra.gmra.mrb[0].mxu1 %v7311_v34  ;;  %2431 = vmatprep.mubr.bf16.mxu0 %v1945_v62  ;;  %v5592_v62 = vld [vmem:[%s9622_s4 + $0xe0] sm:$0xff]  }
 0x2c0   : > { %5221 = vmatpush3.bf16.msra.mxu1 %v5585_v7 }
 0x2c1   : > { %v1851_v51 = vpop.permute.xlu1 %1850  ;;  %5222 = vmatprep.subr.bf16.mxu1 %v5586_v50  ;;  %v1795_v20 = vpop.permute.xlu0 %1794  ;;  %5357 = vmatpush3.bf16.msra.mxu0 %v5601_v26  ;;  %v5590_v26 = vld [vmem:[%s9622_s4 + $0xd8] sm:$0xff]  }
 0x2c2   : > { %v1993_v11 = vsel %vm1890_vm9, %v7255_v1, %v1851_v51  ;;  %v1895_v35 = vsel %vm1890_vm9, %v6745_v53, %v1795_v20  ;;  %5358 = vmatprep.subr.bf16.mxu0 %v5602_v48  ;;  %v5594_v20 = vld [vmem:[%s9622_s4 + $0xe8] sm:$0xff]  }
 0x2c3   : > { %2527 = vmatprep.mubr.bf16.mxu1 %v1993_v11  ;;  %2432 = vmatmul.mubr.bf16.gmra.mrb[4].mxu0 %v1895_v35  ;;  %v5595_v11 = vld [vmem:[%s9622_s4 + $0xa8] sm:$0xff]  }
 0x2c4   : > { %5223 = vmatpush3.bf16.msra.mxu1 %v5587_v45 }
 0x2c5   : > { %v1819_v7 = vpop.permute.xlu1 %1818  ;;  %5224 = vmatprep.subr.bf16.mxu1 %v5588_v52  ;;  %5359 = vmatpush3.bf16.msra.mxu0 %v5602_v48 }
 0x2c6   : > { %v7337_v13 = vsel %vm1890_vm9, %v6749_v33, %v1819_v7  ;;  %v5593_v33 = vld [vmem:[%s9622_s4 + $0xa0] sm:$0xff]  }
 0x2c7   : > { %2528 = vmatmul.mubr.bf16.gmra.mrb[4].mxu1 %v7337_v13 }
 0x2c8   : > { %v1829_v53 = vpop.permute.xlu0 %1828  ;;  %5225 = vmatpush3.bf16.msra.mxu1 %v5589_v44 }
 0x2c9   : > { %5226 = vmatprep.subr.bf16.mxu1 %v5590_v26  ;;  %v1949_v50 = vsel %vm1890_vm9, %v7026_v37, %v1829_v53  ;;  %v5598_v26 = vld [vmem:[%s9622_s4 + $0xb0] sm:$0xff]  }
 0x2ca   : > { %2439 = vmatprep.mubr.bf16.mxu0 %v1949_v50 }
 0x2cc   : > { %v1797_v48 = vpop.permute.xlu0 %1796  ;;  %5227 = vmatpush3.bf16.msra.mxu1 %v5591_v22  ;;  %v5599_v22 = vld [vmem:[%s9622_s4 + $0xf8] sm:$0xff]  }
 0x2cd   : > { %v1853_v45 = vpop.permute.xlu1 %1852  ;;  %v1898_v51 = vsel %vm1890_vm9, %v6763_v17, %v1797_v48  ;;  %5228 = vmatprep.subr.bf16.mxu1 %v5592_v62  ;;  %v5596_v17 = vld [vmem:[%s9622_s4 + $0xf0] sm:$0xff]  }
 0x2ce   : > { %v1997_v52 = vsel %vm1890_vm9, %v7264_v58, %v1853_v45  ;;  %2440 = vmatmul.mubr.bf16.gmra.mrb[8].mxu0 %v1898_v51 }
 0x2cf   : > { %2535 = vmatprep.mubr.bf16.mxu1 %v1997_v52 }
 0x2d0   : > { %5229 = vmatpush3.bf16.msra.mxu1 %v5593_v33  ;;  %v5600_v33 = vld [vmem:[%s9622_s4 + $0xb8] sm:$0xff]  }
 0x2d1   : > { %v1821_v35 = vpop.permute.xlu1 %1820  ;;  %5230 = vmatprep.subr.bf16.mxu1 %v5594_v20 }
 0x2d2   : > { %v7366_v44 = vsel %vm1890_vm9, %v6829_v6, %v1821_v35 }
 0x2d3   : > { %2536 = vmatmul.mubr.bf16.gmra.mrb[8].mxu1 %v7366_v44 }
 0x2d4   : > { %v1831_v7 = vpop.permute.xlu0 %1830  ;;  %5231 = vmatpush3.bf16.msra.mxu1 %v5595_v11 }
 0x2d5   : > { %v1953_v53 = vsel %vm1890_vm9, %v7075_v27, %v1831_v7  ;;  %5232 = vmatprep.subr.bf16.mxu1 %v5596_v17 }
 0x2d6   : > { %2447 = vmatprep.mubr.bf16.mxu0 %v1953_v53 }
 0x2d7   : > { %v1855_v50 = vpop.permute.xlu1 %1854 }
 0x2d8   : > { %v2001_v6 = vsel %vm1890_vm9, %v7276_v25, %v1855_v50  ;;  %v1799_v62 = vpop.permute.xlu0 %1798  ;;  %5233 = vmatpush3.bf16.msra.mxu1 %v5598_v26 }
 0x2d9   : > { %2543 = vmatprep.mubr.bf16.mxu1 %v2001_v6  ;;  %v1901_v48 = vsel %vm1890_vm9, %v6880_v41, %v1799_v62  ;;  %5234 = vmatprep.subr.bf16.mxu1 %v5599_v22 }
 0x2da   : > { %2448 = vmatmul.mubr.bf16.gmra.mrb[12].mxu0 %v1901_v48 }
 0x2db   : > { %v1823_v45 = vpop.permute.xlu1 %1822 }
 0x2dc   : > { %v7386_v20 = vsel %vm1890_vm9, %v6909_v23, %v1823_v45  ;;  %5235 = vmatpush3.bf16.msra.mxu1 %v5600_v33 }
 0x2dd   : > { %2544 = vmatmul.mubr.bf16.gmra.mrb[12].mxu1 %v7386_v20 }
 0x2de   : > { %2584 = vmatprep.mubr.bf16.mxu1 %v1898_v51 }
 0x2df   : > { %v1801_v52 = vpop.permute.xlu1 %1800 }
 0x2e0   : > { %v1904_v41 = vsel %vm1890_vm9, %v6943_v42, %v1801_v52 }
 0x2e2   : > { %v1833_v11 = vpop.permute.xlu0 %1832 }
 0x2e3   : > { %v1957_v35 = vsel %vm1890_vm9, %v7126_v28, %v1833_v11 }
 0x2e4   : > { %2455 = vmatprep.mubr.bf16.mxu0 %v1957_v35 }
 0x2e5   : > { %2456 = vmatmul.mubr.bf16.gmra.mrb[16].mxu0 %v1904_v41 }
 0x2e6   : > { %v1857_v17 = vpop.permute.xlu0 %1856 }
 0x2e7   : > { %v2005_v7 = vsel %vm1890_vm9, %v6822_v47, %v1857_v17 }
 0x2e8   : > { %2585 = vmatmul.mubr.bf16.vlgmr.msra.gmra.mrb[16].mxu1 %v2005_v7 }
 0x2e9   : > { %2592 = vmatprep.mubr.bf16.mxu1 %v1901_v48  ;;  %v1835_v23 = vpop.permute.xlu1 %1834 }
 0x2ea   : > { %v1803_v26 = vpop.permute.xlu0 %1802  ;;  %v1961_v51 = vsel %vm1890_vm9, %v7155_v21, %v1835_v23 }
 0x2eb   : > { %2463 = vmatprep.mubr.bf16.mxu0 %v1961_v51  ;;  %v1907_v42 = vsel %vm1890_vm9, %v7010_v19, %v1803_v26 }
 0x2ed   : > { %2464 = vmatmul.mubr.bf16.gmra.mrb[20].mxu0 %v1907_v42  ;;  %v1859_v53 = vpop.permute.xlu1 %1858 }
 0x2ee   : > { %v2009_v22 = vsel %vm1890_vm9, %v6875_v2, %v1859_v53  ;;  %v1837_v50 = vpop.permute.xlu0 %1836 }
 0x2ef   : > { %v1965_v47 = vsel %vm1890_vm9, %v7179_v46, %v1837_v50 }
 0x2f0   : > { %2593 = vmatmul.mubr.bf16.gmra.mrb[20].mxu1 %v2009_v22  ;;  %2471 = vmatprep.mubr.bf16.mxu0 %v1965_v47 }
 0x2f1   : > { %2600 = vmatprep.mubr.bf16.mxu1 %v1904_v41  ;;  %v1805_v6 = vpop.permute.xlu1 %1804 }
 0x2f2   : > { %v1910_v62 = vsel %vm1890_vm9, %v7042_v14, %v1805_v6  ;;  %v1861_v48 = vpop.permute.xlu0 %1860 }
 0x2f3   : > { %v2013_v19 = vsel %vm1890_vm9, %v6960_v56, %v1861_v48 }
 0x2f5   : > { %2472 = vmatmul.mubr.bf16.gmra.mrb[24].mxu0 %v1910_v62  ;;  %v1839_v33 = vpop.permute.xlu1 %1838 }
 0x2f6   : > { %v1807_v45 = vpop.permute.xlu0 %1806  ;;  %v1969_v2 = vsel %vm1890_vm9, %v7199_v10, %v1839_v33 }
 0x2f7   : > { %2479 = vmatprep.mubr.bf16.mxu0 %v1969_v2  ;;  %v1913_v11 = vsel %vm1890_vm9, %v7065_v3, %v1807_v45 }
 0x2f8   : > { %2601 = vmatmul.mubr.bf16.gmra.mrb[24].mxu1 %v2013_v19 }
 0x2f9   : > { %2608 = vmatprep.mubr.bf16.mxu1 %v1907_v42  ;;  %v1863_v52 = vpop.permute.xlu1 %1862 }
 0x2fa   : > { %v1841_v41 = vpop.permute.xlu0 %1840  ;;  %v2017_v56 = vsel %vm1890_vm9, %v6994_v59, %v1863_v52 }
 0x2fb   : > { %v1973_v14 = vsel %vm1890_vm9, %v7217_v38, %v1841_v41 }
 0x2fd   : > { %2480 = vmatmul.mubr.bf16.gmra.mrb[28].mxu0 %v1913_v11  ;;  %v1809_v35 = vpop.permute.xlu1 %1808 }
 0x2fe   : > { %2487 = vmatprep.mubr.bf16.mxu0 %v1973_v14  ;;  %v1865_v17 = vpop.permute.xlu0 %1864  ;;  %v1916_v23 = vsel %vm1890_vm9, %v7091_v57, %v1809_v35 }
 0x2ff   : > { %v2021_v51 = vsel %vm1890_vm9, %v7045_v39, %v1865_v17 }
 0x300   : > { %2609 = vmatmul.mubr.bf16.gmra.mrb[28].mxu1 %v2017_v56 }
 0x301   : > { %2616 = vmatprep.mubr.bf16.mxu1 %v1910_v62 }
 0x302   : > { %v1811_v26 = vpop.permute.xlu0 %1810 }
 0x303   : > { %v1843_v7 = vpop.permute.xlu1 %1842  ;;  %v1919_v53 = vsel %vm1890_vm9, %v7145_v60, %v1811_v26 }
 0x304   : > { %v1977_v3 = vsel %vm1890_vm9, %v7221_v29, %v1843_v7 }
 0x305   : > { %2488 = vmatmul.mubr.bf16.gmra.mrb[32].mxu0 %v1916_v23 }
 0x306   : > { %2495 = vmatprep.mubr.bf16.mxu0 %v1977_v3 }
 0x307   : > { %v1867_v42 = vpop.permute.xlu1 %1866  ;;  %v1845_v59 = vpop.permute.xlu0 %1844 }
 0x308   : > { %2617 = vmatmul.mubr.bf16.gmra.mrb[32].mxu1 %v2021_v51  ;;  %v1981_v22 = vsel %vm1890_vm9, %v7233_v30, %v1845_v59  ;;  %v2025_v50 = vsel %vm1890_vm9, %v7086_v18, %v1867_v42 }
 0x309   : > { %2624 = vmatprep.mubr.bf16.mxu1 %v1913_v11 }
 0x30b   : > { %v1813_v57 = vpop.permute.xlu1 %1812  ;;  %v1869_v39 = vpop.permute.xlu0 %1868 }
 0x30c   : > { %v1922_v6 = vsel %vm1890_vm9, %v7167_v32, %v1813_v57  ;;  %v2029_v60 = vsel %vm1890_vm9, %v7111_v40, %v1869_v39 }
 0x30d   : > { %2496 = vmatmul.mubr.bf16.gmra.mrb[36].mxu0 %v1919_v53 }
 0x30e   : > { %2503 = vmatprep.mubr.bf16.mxu0 %v1981_v22 }
 0x30f   : > { %v1847_v47 = vpop.permute.xlu1 %1846  ;;  %v1815_v48 = vpop.permute.xlu0 %1814 }
 0x310   : > { %2625 = vmatmul.mubr.bf16.gmra.mrb[36].mxu1 %v2025_v50  ;;  %v1985_v62 = vsel %vm1890_vm9, %v7236_v61, %v1847_v47  ;;  %v1925_v18 = vsel %vm1890_vm9, %v7189_v36, %v1815_v48 }
 0x311   : > { %2632 = vmatprep.mubr.bf16.mxu1 %v1916_v23 }
 0x313   : > { %v1871_v19 = vpop.permute.xlu1 %1870  ;;  %v1873_v32 = vpop.permute.xlu0 %1872 }
 0x314   : > { %v2033_v33 = vsel %vm1890_vm9, %v7148_v55, %v1871_v19  ;;  %v2037_v40 = vsel %vm1890_vm9, %v7170_v5, %v1873_v32 }
 0x315   : > { %2504 = vmatmul.mubr.bf16.gmra.mrb[40].mxu0 %v1922_v6 }
 0x316   : > { %2511 = vmatprep.mubr.bf16.mxu0 %v1985_v62 }
 0x317   : > { %v1875_v36 = vpop.permute.xlu1 %1874 }
 0x318   : > { %2633 = vmatmul.mubr.bf16.gmra.mrb[40].mxu1 %v2029_v60 }
 0x319   : > { %2640 = vmatprep.mubr.bf16.mxu1 %v1919_v53 }
 0x31b   : > { %v1879_v55 = vpop.permute.xlu1 %1878 }
 0x31d   : > { %2512 = vmatmul.mubr.bf16.gmra.mrb[44].mxu0 %v1925_v18 }
 0x31e   : > { %5360 = vmatprep.mubr.msk.bf16.mxu0 %vm1890_vm9, %v7026_v37  ;;  %v2041_v37 = vsel %vm1890_vm9, %v7196_v63, %v1875_v36 }
 0x320   : > { %2641 = vmatmul.mubr.bf16.gmra.mrb[44].mxu1 %v2033_v33 }
 0x321   : > { %2648 = vmatprep.mubr.bf16.mxu1 %v1922_v6 }
 0x325   : > { %5361 = vmatmul.mubr.msk.bf16.vlgmr.msra.gmra.mrb[48].mxu0 %vm1890_vm9, %v7075_v27  ;;  %v1877_v27 = vpop.permute.xlu0 %1876 }
 0x326   : > { %5364 = vmatprep.mubr.msk.bf16.mxu0 %vm1890_vm9, %v7126_v28  ;;  %v2045_v28 = vsel %vm1890_vm9, %v7210_v24, %v1877_v27 }
 0x328   : > { %2649 = vmatmul.mubr.bf16.gmra.mrb[48].mxu1 %v2037_v40 }
 0x329   : > { %2656 = vmatprep.mubr.bf16.mxu1 %v1925_v18  ;;  %v1881_v5 = vpop.permute.xlu0 %1880 }
 0x32d   : > { %5365 = vmatmul.mubr.msk.bf16.gmra.mrb[52].mxu0 %vm1890_vm9, %v7155_v21  ;;  %v2049_v21 = vsel %vm1890_vm9, %v6800_v43, %v1879_v55  ;;  %v1883_v43 = vpop.permute.xlu1 %1882  ;;  %v1889_v63 = vpop.permute.xlu0 %1888 }
 0x32e   : > { %5368 = vmatprep.mubr.msk.bf16.mxu0 %vm1890_vm9, %v7179_v46  ;;  %v2053_v46 = vsel %vm1890_vm9, %v6835_v12, %v1881_v5  ;;  %v2068_v12 = vsel %vm1890_vm9, %v6957_v15, %v1889_v63 }
 0x330   : > { %2657 = vmatmul.mubr.bf16.gmra.mrb[52].mxu1 %v2041_v37 }
 0x331   : > { %2664 = vmatprep.mubr.bf16.mxu1 %v7311_v34  ;;  %v1885_v24 = vpop.permute.xlu1 %1884 }
 0x335   : > { %5369 = vmatmul.mubr.msk.bf16.gmra.mrb[56].mxu0 %vm1890_vm9, %v7199_v10  ;;  %v2057_v10 = vsel %vm1890_vm9, %v6918_v0, %v1883_v43  ;;  %v1887_v0 = vpop.permute.xlu0 %1886 }
 0x336   : > { %5372 = vmatprep.mubr.msk.bf16.mxu0 %vm1890_vm9, %v7217_v38  ;;  %v2061_v38 = vsel %vm1890_vm9, %v6970_v16, %v1885_v24  ;;  %v2065_v15 = vsel %vm1890_vm9, %v7260_v49, %v1887_v0 }
 0x338   : > { %2665 = vmatmul.mubr.bf16.gmra.mrb[56].mxu1 %v2045_v28 }
 0x339   : > { %2672 = vmatprep.mubr.bf16.mxu1 %v7337_v13 }
 0x33d   : > { %5373 = vmatmul.mubr.msk.bf16.gmra.mrb[60].mxu0 %vm1890_vm9, %v7221_v29 }
 0x33e   : > { %5376 = vmatprep.mubr.msk.bf16.mxu0 %vm1890_vm9, %v7233_v30  ;;  %v3114_v30 = vstv %s3111_s10 }
 0x33f   : > { %5605 = vrcp.f32 %v3114_v30 }
 0x340   : > { %2673 = vmatmul.mubr.bf16.gmra.mrb[60].mxu1 %v2049_v21 }
 0x341   : > { %2680 = vmatprep.mubr.bf16.mxu1 %v7366_v44 }
 0x345   : > { %5377 = vmatmul.mubr.msk.bf16.gmra.mrb[64].mxu0 %vm1890_vm9, %v7236_v61 }
 0x346   : > { %5380 = vmatprep.mubr.msk.bf16.mxu0 %vm1890_vm9, %v7248_v9 }
 0x348   : > { %2681 = vmatmul.mubr.bf16.gmra.mrb[64].mxu1 %v2053_v46 }
 0x349   : > { %2688 = vmatprep.mubr.bf16.mxu1 %v7386_v20  ;;  %v5606_v13 = vpop.eup %5605 }
 0x34a   : > { %5434 = vpush %v5606_v13 }
 0x34d   : > { %5381 = vmatmul.mubr.msk.bf16.gmra.mrb[68].mxu0 %vm1890_vm9, %v7255_v1 }
 0x34e   : > { %5384 = vmatprep.mubr.msk.bf16.mxu0 %vm1890_vm9, %v7264_v58 }
 0x350   : > { %2689 = vmatmul.mubr.bf16.gmra.mrb[68].mxu1 %v2057_v10 }
 0x351   : > { %2696 = vmatprep.mubr.bf16.mxu1 %v2068_v12 }
 0x355   : > { %5385 = vmatmul.mubr.msk.bf16.gmra.mrb[72].mxu0 %vm1890_vm9, %v7276_v25 }
 0x356   : > { %5388 = vmatprep.mubr.msk.bf16.mxu0 %vm1890_vm9, %v7273_v4 }
 0x358   : > { %2697 = vmatmul.mubr.bf16.gmra.mrb[72].mxu1 %v2061_v38 }
 0x359   : > { %4934 = vmatprep.mubr.msk.bf16.mxu1 %vm7285_vm10, %v7282_v54 }
 0x35d   : > { %5389 = vmatmul.mubr.msk.bf16.gmra.mrb[76].mxu0 %vm1890_vm9, %v6480_v8 }
 0x360   : > { %2705 = vmatmul.mubr.bf16.gmra.mrb[76].mxu1 %v2065_v15 }
 0x37b   : > { %s5435_s7 = spop %5434 }
 0x37c   : > { %s3117_s30 = smul.f32 256.0, %s5435_s7 }
 0x37d   : > { %s3130_s9 = smul.f32 %s5435_s7, %s3126_s29 }
 0x38b   : > { %v5124_v16 = vpop.f32.mrb[0].mxu0 }
 0x38c   : > { %v5125_v29 = vpop.f32.mrb[1].mxu0 }
 0x38d   : > { %v5126_v61 = vadd.f32 %v5125_v29, %v5124_v16  ;;  %v5127_v9 = vpop.f32.mrb[2].mxu0 }
 0x38e   : > { %v5128_v1 = vpop.f32.mrb[3].mxu0 }
 0x38f   : > { %v5129_v58 = vadd.f32 %v5128_v1, %v5127_v9 }
 0x392   : > { %v5196_v4 = vpop.f32.mrb[0].mxu1 }
 0x393   : > { %v5197_v25 = vpop.f32.mrb[1].mxu1 }
 0x394   : > { %v7497_v54 = vadd.f32 %v5197_v25, %v5196_v4  ;;  %v5199_v8 = vpop.f32.mrb[2].mxu1 }
 0x395   : > { %v5200_v31 = vpop.f32.mrb[3].mxu1 }
 0x396   : > { %v7499_v34 = vadd.f32 %v5200_v31, %v5199_v8  ;;  %v5130_v49 = vpop.f32.mrb[4].mxu0 }
 0x397   : > { %v5131_v44 = vpop.f32.mrb[5].mxu0 }
 0x398   : > { %v5132_v20 = vadd.f32 %v5131_v44, %v5130_v49  ;;  %v5133_v45 = vpop.f32.mrb[6].mxu0 }
 0x399   : > { %v5134_v2 = vpop.f32.mrb[7].mxu0 }
 0x39a   : > { %v5135_v52 = vadd.f32 %v5134_v2, %v5133_v45  ;;  %v5202_v11 = vpop.f32.mrb[4].mxu1 }
 0x39b   : > { %v5203_v41 = vpop.f32.mrb[5].mxu1 }
 0x39c   : > { %v7501_v14 = vadd.f32 %v5203_v41, %v5202_v11  ;;  %v5205_v56 = vpop.f32.mrb[6].mxu1 }
 0x39d   : > { %v5206_v35 = vpop.f32.mrb[7].mxu1 }
 0x39e   : > { %v7503_v17 = vadd.f32 %v5206_v35, %v5205_v56 }
 0x3a1   : > { %v5136_v7 = vpop.f32.mrb[8].mxu0 }
 0x3a2   : > { %v5137_v23 = vpop.f32.mrb[9].mxu0 }
 0x3a3   : > { %v5138_v3 = vadd.f32 %v5137_v23, %v5136_v7  ;;  %v5139_v26 = vpop.f32.mrb[10].mxu0 }
 0x3a4   : > { %v5140_v51 = vpop.f32.mrb[11].mxu0 }
 0x3a5   : > { %v5141_v42 = vadd.f32 %v5140_v51, %v5139_v26 }
 0x3a6   : > { %v5208_v59 = vpop.f32.mrb[8].mxu1 }
 0x3a7   : > { %v5209_v53 = vpop.f32.mrb[9].mxu1 }
 0x3a8   : > { %v7505_v22 = vadd.f32 %v5209_v53, %v5208_v59  ;;  %v5211_v57 = vpop.f32.mrb[10].mxu1 }
 0x3a9   : > { %v5212_v50 = vpop.f32.mrb[11].mxu1 }
 0x3aa   : > { %v7507_v47 = vadd.f32 %v5212_v50, %v5211_v57 }
 0x3ad   : > { %v5142_v39 = vpop.f32.mrb[12].mxu0 }
 0x3ae   : > { %v5143_v6 = vpop.f32.mrb[13].mxu0 }
 0x3af   : > { %v7509_v62 = vadd.f32 %v5143_v6, %v5142_v39  ;;  %v5145_v60 = vpop.f32.mrb[14].mxu0 }
 0x3b0   : > { %v5214_v48 = vpop.f32.mrb[12].mxu1  ;;  %v5146_v18 = vpop.f32.mrb[15].mxu0 }
 0x3b1   : > { %v5215_v19 = vpop.f32.mrb[13].mxu1  ;;  %v5147_v33 = vadd.f32 %v5146_v18, %v5145_v60 }
 0x3b2   : > { %v7511_v32 = vadd.f32 %v5215_v19, %v5214_v48  ;;  %v5217_v40 = vpop.f32.mrb[14].mxu1 }
 0x3b3   : > { %v5218_v36 = vpop.f32.mrb[15].mxu1 }
 0x3b4   : > { %v7513_v37 = vadd.f32 %v5218_v36, %v5217_v40 }
 0x3b8   : > { %v5148_v27 = vpop.f32.mrb[16].mxu0 }
 0x3b9   : > { %v5149_v28 = vpop.f32.mrb[17].mxu0 }
 0x3ba   : > { %v7515_v55 = vadd.f32 %v5149_v28, %v5148_v27  ;;  %v5151_v21 = vpop.f32.mrb[18].mxu0 }
 0x3bb   : > { %v5152_v5 = vpop.f32.mrb[19].mxu0  ;;  %v5236_v46 = vpop.f32.mrb[16].mxu1 }
 0x3bc   : > { %v7517_v43 = vadd.f32 %v5152_v5, %v5151_v21  ;;  %v5237_v63 = vpop.f32.mrb[17].mxu1 }
 0x3bd   : > { %v5238_v10 = vadd.f32 %v5237_v63, %v5236_v46  ;;  %v5239_v12 = vpop.f32.mrb[18].mxu1 }
 0x3be   : > { %v5240_v24 = vpop.f32.mrb[19].mxu1 }
 0x3bf   : > { %v5241_v38 = vadd.f32 %v5240_v24, %v5239_v12  ;;  %v7519_v0 = vadd.f32 %v5238_v10, %v5126_v61 }
 0x3c0   : > { %v5154_v15 = vpop.f32.mrb[20].mxu0 }
 0x3c1   : > { %v5155_v16 = vpop.f32.mrb[21].mxu0  ;;  %v7521_v29 = vadd.f32 %v5241_v38, %v5129_v58 }
 0x3c2   : > { %v7523_v30 = vadd.f32 %v5155_v16, %v5154_v15  ;;  %v5157_v9 = vpop.f32.mrb[22].mxu0 }
 0x3c3   : > { %v5158_v1 = vpop.f32.mrb[23].mxu0  ;;  %v5242_v4 = vpop.f32.mrb[20].mxu1 }
 0x3c4   : > { %v7525_v25 = vadd.f32 %v5158_v1, %v5157_v9  ;;  %v5243_v8 = vpop.f32.mrb[21].mxu1 }
 0x3c5   : > { %v5244_v31 = vadd.f32 %v5243_v8, %v5242_v4  ;;  %v5245_v49 = vpop.f32.mrb[22].mxu1 }
 0x3c6   : > { %v5246_v13 = vpop.f32.mrb[23].mxu1 }
 0x3c7   : > { %v5247_v44 = vadd.f32 %v5246_v13, %v5245_v49  ;;  %v7527_v45 = vadd.f32 %v5244_v31, %v5132_v20 }
 0x3c8   : > { %v5160_v61 = vpop.f32.mrb[24].mxu0 }
 0x3c9   : > { %v5161_v2 = vpop.f32.mrb[25].mxu0  ;;  %v7529_v11 = vadd.f32 %v5247_v44, %v5135_v52 }
 0x3ca   : > { %v7531_v58 = vadd.f32 %v5161_v2, %v5160_v61  ;;  %v5163_v41 = vpop.f32.mrb[26].mxu0 }
 0x3cb   : > { %v5164_v56 = vpop.f32.mrb[27].mxu0  ;;  %v5248_v35 = vpop.f32.mrb[24].mxu1 }
 0x3cc   : > { %v7533_v7 = vadd.f32 %v5164_v56, %v5163_v41  ;;  %v5249_v23 = vpop.f32.mrb[25].mxu1 }
 0x3cd   : > { %v5250_v26 = vadd.f32 %v5249_v23, %v5248_v35  ;;  %v5251_v51 = vpop.f32.mrb[26].mxu1 }
 0x3ce   : > { %v5252_v59 = vpop.f32.mrb[27].mxu1 }
 0x3cf   : > { %v5253_v53 = vadd.f32 %v5252_v59, %v5251_v51  ;;  %v7535_v57 = vadd.f32 %v5250_v26, %v5138_v3 }
 0x3d0   : > { %v5166_v20 = vpop.f32.mrb[28].mxu0 }
 0x3d1   : > { %v5167_v50 = vpop.f32.mrb[29].mxu0  ;;  %v7537_v39 = vadd.f32 %v5253_v53, %v5141_v42 }
 0x3d2   : > { %v7539_v52 = vadd.f32 %v5167_v50, %v5166_v20  ;;  %v5169_v6 = vpop.f32.mrb[30].mxu0 }
 0x3d3   : > { %v5170_v60 = vpop.f32.mrb[31].mxu0  ;;  %v5254_v48 = vpop.f32.mrb[28].mxu1 }
 0x3d4   : > { %v7541_v18 = vadd.f32 %v5170_v60, %v5169_v6  ;;  %v5255_v19 = vpop.f32.mrb[29].mxu1 }
 0x3d5   : > { %v5256_v40 = vadd.f32 %v5255_v19, %v5254_v48  ;;  %v5257_v36 = vpop.f32.mrb[30].mxu1 }
 0x3d6   : > { %v5258_v27 = vpop.f32.mrb[31].mxu1 }
 0x3d7   : > { %v5259_v28 = vadd.f32 %v5258_v27, %v5257_v36  ;;  %v7544_v21 = vadd.f32 %v5256_v40, %v7509_v62 }
 0x3d8   : > { %v5172_v3 = vpop.f32.mrb[32].mxu0 }
 0x3d9   : > { %v5173_v5 = vpop.f32.mrb[33].mxu0  ;;  %v7546_v46 = vadd.f32 %v5259_v28, %v5147_v33 }
 0x3da   : > { %v7548_v42 = vadd.f32 %v5173_v5, %v5172_v3  ;;  %v5175_v63 = vpop.f32.mrb[34].mxu0 }
 0x3db   : > { %v5176_v10 = vpop.f32.mrb[35].mxu0  ;;  %v5260_v12 = vpop.f32.mrb[32].mxu1 }
 0x3dc   : > { %v7550_v24 = vadd.f32 %v5176_v10, %v5175_v63  ;;  %v5261_v38 = vpop.f32.mrb[33].mxu1 }
 0x3dd   : > { %v5262_v15 = vadd.f32 %v5261_v38, %v5260_v12  ;;  %v5263_v16 = vpop.f32.mrb[34].mxu1 }
 0x3de   : > { %v5264_v9 = vpop.f32.mrb[35].mxu1 }
 0x3df   : > { %v5265_v1 = vadd.f32 %v5264_v9, %v5263_v16  ;;  %v7553_v4 = vadd.f32 %v5262_v15, %v7515_v55 }
 0x3e0   : > { %v5178_v62 = vpop.f32.mrb[36].mxu0 }
 0x3e1   : > { %v5179_v8 = vpop.f32.mrb[37].mxu0  ;;  %v7556_v33 = vadd.f32 %v5265_v1, %v7517_v43 }
 0x3e2   : > { %v7558_v31 = vadd.f32 %v5179_v8, %v5178_v62  ;;  %v5181_v49 = vpop.f32.mrb[38].mxu0 }
 0x3e3   : > { %v5182_v13 = vpop.f32.mrb[39].mxu0  ;;  %v5266_v44 = vpop.f32.mrb[36].mxu1 }
 0x3e4   : > { %v7560_v61 = vadd.f32 %v5182_v13, %v5181_v49  ;;  %v5267_v2 = vpop.f32.mrb[37].mxu1 }
 0x3e5   : > { %v5268_v41 = vadd.f32 %v5267_v2, %v5266_v44  ;;  %v5269_v56 = vpop.f32.mrb[38].mxu1 }
 0x3e6   : > { %v5270_v35 = vpop.f32.mrb[39].mxu1 }
 0x3e7   : > { %v5271_v23 = vadd.f32 %v5270_v35, %v5269_v56  ;;  %v7563_v55 = vadd.f32 %v5268_v41, %v7523_v30 }
 0x3e8   : > { %v5184_v26 = vpop.f32.mrb[40].mxu0 }
 0x3e9   : > { %v5185_v51 = vpop.f32.mrb[41].mxu0  ;;  %v7566_v43 = vadd.f32 %v5271_v23, %v7525_v25 }
 0x3ea   : > { %v7568_v59 = vadd.f32 %v5185_v51, %v5184_v26  ;;  %v5187_v53 = vpop.f32.mrb[42].mxu0 }
 0x3eb   : > { %v5188_v20 = vpop.f32.mrb[43].mxu0  ;;  %v5272_v50 = vpop.f32.mrb[40].mxu1 }
 0x3ec   : > { %v7570_v6 = vadd.f32 %v5188_v20, %v5187_v53  ;;  %v5273_v60 = vpop.f32.mrb[41].mxu1 }
 0x3ed   : > { %v5274_v48 = vadd.f32 %v5273_v60, %v5272_v50  ;;  %v5275_v19 = vpop.f32.mrb[42].mxu1 }
 0x3ee   : > { %v5276_v40 = vpop.f32.mrb[43].mxu1 }
 0x3ef   : > { %v5277_v36 = vadd.f32 %v5276_v40, %v5275_v19  ;;  %v7573_v30 = vadd.f32 %v5274_v48, %v7531_v58 }
 0x3f0   : > { %v5190_v27 = vpop.f32.mrb[44].mxu0 }
 0x3f1   : > { %v5191_v28 = vpop.f32.mrb[45].mxu0  ;;  %v7576_v25 = vadd.f32 %v5277_v36, %v7533_v7 }
 0x3f2   : > { %v7578_v3 = vadd.f32 %v5191_v28, %v5190_v27  ;;  %v5193_v5 = vpop.f32.mrb[46].mxu0 }
 0x3f3   : > { %v5194_v63 = vpop.f32.mrb[47].mxu0  ;;  %v5278_v10 = vpop.f32.mrb[44].mxu1 }
 0x3f4   : > { %v7580_v12 = vadd.f32 %v5194_v63, %v5193_v5  ;;  %v5279_v38 = vpop.f32.mrb[45].mxu1 }
 0x3f5   : > { %v5280_v15 = vadd.f32 %v5279_v38, %v5278_v10  ;;  %v5281_v16 = vpop.f32.mrb[46].mxu1 }
 0x3f6   : > { %v5282_v9 = vpop.f32.mrb[47].mxu1 }
 0x3f7   : > { %v5283_v1 = vadd.f32 %v5282_v9, %v5281_v16  ;;  %v7583_v58 = vadd.f32 %v5280_v15, %v7539_v52 }
 0x3f8   : > { %v5362_v62 = vpop.f32.mrb[48].mxu0 }
 0x3f9   : > { %v7586_v7 = vadd.f32 %v5362_v62, %v7527_v45  ;;  %v2747_v8 = vpop.f32.mrb[49].mxu0  ;;  %v7589_v49 = vadd.f32 %v5283_v1, %v7541_v18 }
 0x3fa   : > { %v7592_v13 = vadd.f32 %v2747_v8, %v7519_v0  ;;  %v5363_v44 = vpop.f32.mrb[50].mxu0 }
 0x3fb   : > { %2877 = vst.msk [vmem:[%s7595_s5 + $0x10] sm:$0xff] %vm1890_vm9, %v7586_v7  ;;  %v7601_v45 = vadd.f32 %v5363_v44, %v7529_v11  ;;  %v5284_v52 = vpop.f32.mrb[48].mxu1  ;;  %v2750_v2 = vpop.f32.mrb[51].mxu0  ;;  %v2910_v53 = vsel %vm1890_vm9, %v7586_v7, 0.0 }
 0x3fc   : > { %2875 = vst.msk [vmem:[%s7595_s5] sm:$0xff] %vm1890_vm9, %v7592_v13  ;;  %v7607_v0 = vadd.f32 %v2750_v2, %v7521_v29  ;;  %v5285_v18 = vpop.f32.mrb[49].mxu1  ;;  %v2907_v35 = vsel %vm1890_vm9, %v7592_v13, 0.0 }
 0x3fd   : > { %2878 = vst.msk [vmem:[%s7595_s5 + $0x18] sm:$0xff] %vm1890_vm9, %v7601_v45  ;;  %v5286_v41 = vadd.f32 %v5285_v18, %v5284_v52  ;;  %v5287_v56 = vpop.f32.mrb[50].mxu1  ;;  %v2912_v40 = vsel %vm1890_vm9, %v7601_v45, 0.0 }
 0x3fe   : > { %2876 = vst.msk [vmem:[%s7595_s5 + $0x8] sm:$0xff] %vm1890_vm9, %v7607_v0  ;;  %v2908_v11 = vsel %vm1890_vm9, %v7607_v0, 0.0  ;;  %v5288_v23 = vpop.f32.mrb[51].mxu1 }
 0x3ff   : > { %v2909_v26 = vadd.f32 %v2908_v11, %v2907_v35  ;;  %v5289_v29 = vadd.f32 %v5288_v23, %v5287_v56  ;;  %v7620_v51 = vadd.f32 %v5286_v41, %v7548_v42 }
 0x400   : > { %v5366_v20 = vpop.f32.mrb[52].mxu0 }
 0x401   : > { %v2911_v50 = vadd.f32 %v2910_v53, %v2909_v26  ;;  %v7625_v60 = vadd.f32 %v5366_v20, %v7544_v21  ;;  %v2763_v48 = vpop.f32.mrb[53].mxu0  ;;  %v7628_v19 = vadd.f32 %v5289_v29, %v7550_v24 }
 0x402   : > { %v7633_v42 = vadd.f32 %v2763_v48, %v7535_v57  ;;  %v5367_v36 = vpop.f32.mrb[54].mxu0 }
 0x403   : > { %2881 = vst.msk [vmem:[%s7595_s5 + $0x30] sm:$0xff] %vm1890_vm9, %v7625_v60  ;;  %v2913_v27 = vadd.f32 %v2912_v40, %v2911_v50  ;;  %v7639_v21 = vadd.f32 %v5367_v36, %v7546_v46  ;;  %v5290_v28 = vpop.f32.mrb[52].mxu1  ;;  %v2766_v5 = vpop.f32.mrb[55].mxu0  ;;  %v2918_v62 = vsel %vm1890_vm9, %v7625_v60, 0.0 }
 0x404   : > { %2879 = vst.msk [vmem:[%s7595_s5 + $0x20] sm:$0xff] %vm1890_vm9, %v7633_v42  ;;  %v2914_v24 = vsel %vm1890_vm9, %v7633_v42, 0.0  ;;  %v7647_v63 = vadd.f32 %v2766_v5, %v7537_v39  ;;  %v5291_v57 = vpop.f32.mrb[53].mxu1 }
 0x405   : > { %v2915_v10 = vadd.f32 %v2914_v24, %v2913_v27  ;;  %2882 = vst.msk [vmem:[%s7595_s5 + $0x38] sm:$0xff] %vm1890_vm9, %v7639_v21  ;;  %v5292_v38 = vadd.f32 %v5291_v57, %v5290_v28  ;;  %v5293_v15 = vpop.f32.mrb[54].mxu1  ;;  %v2920_v41 = vsel %vm1890_vm9, %v7639_v21, 0.0 }
 0x406   : > { %2880 = vst.msk [vmem:[%s7595_s5 + $0x28] sm:$0xff] %vm1890_vm9, %v7647_v63  ;;  %v2916_v46 = vsel %vm1890_vm9, %v7647_v63, 0.0  ;;  %v5294_v16 = vpop.f32.mrb[55].mxu1 }
 0x407   : > { %v2917_v9 = vadd.f32 %v2916_v46, %v2915_v10  ;;  %v5295_v1 = vadd.f32 %v5294_v16, %v5293_v15  ;;  %v2659_v39 = vadd.f32 %v5292_v38, %v7558_v31 }
 0x408   : > { %v5370_v8 = vpop.f32.mrb[56].mxu0 }
 0x409   : > { %v2919_v44 = vadd.f32 %v2918_v62, %v2917_v9  ;;  %v7661_v52 = vadd.f32 %v5370_v8, %v7563_v55  ;;  %v2779_v2 = vpop.f32.mrb[57].mxu0  ;;  %v2662_v18 = vadd.f32 %v5295_v1, %v7560_v61 }
 0x40a   : > { %v7667_v56 = vadd.f32 %v2779_v2, %v7553_v4  ;;  %v5371_v31 = vpop.f32.mrb[58].mxu0 }
 0x40b   : > { %2885 = vst.msk [vmem:[%s7595_s5 + $0x50] sm:$0xff] %vm1890_vm9, %v7661_v52  ;;  %v2921_v35 = vadd.f32 %v2920_v41, %v2919_v44  ;;  %v7673_v11 = vadd.f32 %v5371_v31, %v7566_v43  ;;  %v5296_v55 = vpop.f32.mrb[56].mxu1  ;;  %v2782_v23 = vpop.f32.mrb[59].mxu0  ;;  %v2926_v36 = vsel %vm1890_vm9, %v7661_v52, 0.0 }
 0x40c   : > { %2883 = vst.msk [vmem:[%s7595_s5 + $0x40] sm:$0xff] %vm1890_vm9, %v7667_v56  ;;  %v2922_v61 = vsel %vm1890_vm9, %v7667_v56, 0.0  ;;  %v7681_v26 = vadd.f32 %v2782_v23, %v7556_v33  ;;  %v5297_v4 = vpop.f32.mrb[57].mxu1 }
 0x40d   : > { %v2923_v29 = vadd.f32 %v2922_v61, %v2921_v35  ;;  %2886 = vst.msk [vmem:[%s7595_s5 + $0x58] sm:$0xff] %vm1890_vm9, %v7673_v11  ;;  %v5298_v53 = vadd.f32 %v5297_v4, %v5296_v55  ;;  %v5299_v20 = vpop.f32.mrb[58].mxu1  ;;  %v2928_v10 = vsel %vm1890_vm9, %v7673_v11, 0.0 }
 0x40e   : > { %2884 = vst.msk [vmem:[%s7595_s5 + $0x48] sm:$0xff] %vm1890_vm9, %v7681_v26  ;;  %v2924_v43 = vsel %vm1890_vm9, %v7681_v26, 0.0  ;;  %v5300_v50 = vpop.f32.mrb[59].mxu1 }
 0x40f   : > { %v2925_v48 = vadd.f32 %v2924_v43, %v2923_v29  ;;  %v5301_v40 = vadd.f32 %v5300_v50, %v5299_v20  ;;  %v7692_v33 = vadd.f32 %v5298_v53, %v7568_v59 }
 0x410   : > { %v5374_v27 = vpop.f32.mrb[60].mxu0 }
 0x411   : > { %v2927_v28 = vadd.f32 %v2926_v36, %v2925_v48  ;;  %v7697_v5 = vadd.f32 %v5374_v27, %v7583_v58  ;;  %v2795_v24 = vpop.f32.mrb[61].mxu0  ;;  %v7700_v57 = vadd.f32 %v5301_v40, %v7570_v6 }
 0x412   : > { %v7705_v59 = vadd.f32 %v2795_v24, %v7573_v30  ;;  %v5375_v38 = vpop.f32.mrb[62].mxu0 }
 0x413   : > { %2889 = vst.msk [vmem:[%s7595_s5 + $0x70] sm:$0xff] %vm1890_vm9, %v7697_v5  ;;  %v2929_v15 = vadd.f32 %v2928_v10, %v2927_v28  ;;  %v7711_v58 = vadd.f32 %v5375_v38, %v7589_v49  ;;  %v5302_v46 = vpop.f32.mrb[60].mxu1  ;;  %v2798_v16 = vpop.f32.mrb[63].mxu0  ;;  %v2934_v31 = vsel %vm1890_vm9, %v7697_v5, 0.0 }
 0x414   : > { %2887 = vst.msk [vmem:[%s7595_s5 + $0x60] sm:$0xff] %vm1890_vm9, %v7705_v59  ;;  %v2930_v6 = vsel %vm1890_vm9, %v7705_v59, 0.0  ;;  %v7719_v9 = vadd.f32 %v2798_v16, %v7576_v25  ;;  %v5303_v30 = vpop.f32.mrb[61].mxu1 }
 0x415   : > { %v2931_v1 = vadd.f32 %v2930_v6, %v2929_v15  ;;  %2890 = vst.msk [vmem:[%s7595_s5 + $0x78] sm:$0xff] %vm1890_vm9, %v7711_v58  ;;  %v5304_v62 = vadd.f32 %v5303_v30, %v5302_v46  ;;  %v5305_v8 = vpop.f32.mrb[62].mxu1  ;;  %v2936_v29 = vsel %vm1890_vm9, %v7711_v58, 0.0 }
 0x416   : > { %2888 = vst.msk [vmem:[%s7595_s5 + $0x68] sm:$0xff] %vm1890_vm9, %v7719_v9  ;;  %v2932_v49 = vsel %vm1890_vm9, %v7719_v9, 0.0  ;;  %v5306_v44 = vpop.f32.mrb[63].mxu1 }
 0x417   : > { %v2933_v2 = vadd.f32 %v2932_v49, %v2931_v1  ;;  %v5307_v41 = vadd.f32 %v5306_v44, %v5305_v8  ;;  %v2675_v25 = vadd.f32 %v5304_v62, %v7578_v3 }
 0x418   : > { %v5378_v35 = vpop.f32.mrb[64].mxu0 }
 0x419   : > { %v2935_v55 = vadd.f32 %v2934_v31, %v2933_v2  ;;  %v7732_v23 = vadd.f32 %v5378_v35, %v2659_v39  ;;  %v2811_v61 = vpop.f32.mrb[65].mxu0  ;;  %v2678_v4 = vadd.f32 %v5307_v41, %v7580_v12 }
 0x41a   : > { %v7738_v53 = vadd.f32 %v2811_v61, %v7620_v51  ;;  %v5379_v20 = vpop.f32.mrb[66].mxu0 }
 0x41b   : > { %2893 = vst.msk [vmem:[%s7595_s5 + $0x90] sm:$0xff] %vm1890_vm9, %v7732_v23  ;;  %v2937_v3 = vadd.f32 %v2936_v29, %v2935_v55  ;;  %v7743_v43 = vadd.f32 %v5379_v20, %v2662_v18  ;;  %v5308_v39 = vpop.f32.mrb[64].mxu1  ;;  %v2814_v50 = vpop.f32.mrb[67].mxu0  ;;  %v2942_v38 = vsel %vm1890_vm9, %v7732_v23, 0.0 }
 0x41c   : > { %2891 = vst.msk [vmem:[%s7595_s5 + $0x80] sm:$0xff] %vm1890_vm9, %v7738_v53  ;;  %v2938_v12 = vsel %vm1890_vm9, %v7738_v53, 0.0  ;;  %v7751_v48 = vadd.f32 %v2814_v50, %v7628_v19  ;;  %v5309_v51 = vpop.f32.mrb[65].mxu1 }
 0x41d   : > { %v2939_v40 = vadd.f32 %v2938_v12, %v2937_v3  ;;  %2894 = vst.msk [vmem:[%s7595_s5 + $0x98] sm:$0xff] %vm1890_vm9, %v7743_v43  ;;  %v5310_v36 = vadd.f32 %v5309_v51, %v5308_v39  ;;  %v5311_v27 = vpop.f32.mrb[66].mxu1  ;;  %v2944_v1 = vsel %vm1890_vm9, %v7743_v43, 0.0 }
 0x41e   : > { %2892 = vst.msk [vmem:[%s7595_s5 + $0x88] sm:$0xff] %vm1890_vm9, %v7751_v48  ;;  %v2940_v18 = vsel %vm1890_vm9, %v7751_v48, 0.0  ;;  %v5312_v28 = vpop.f32.mrb[67].mxu1 }
 0x41f   : > { %v2941_v24 = vadd.f32 %v2940_v18, %v2939_v40  ;;  %v5313_v10 = vadd.f32 %v5312_v28, %v5311_v27  ;;  %v2683_v19 = vadd.f32 %v5310_v36, %v7497_v54 }
 0x420   : > { %v5382_v15 = vpop.f32.mrb[68].mxu0 }
 0x421   : > { %v2943_v46 = vadd.f32 %v2942_v38, %v2941_v24  ;;  %v7764_v16 = vadd.f32 %v5382_v15, %v2675_v25  ;;  %v2827_v6 = vpop.f32.mrb[69].mxu0  ;;  %v2686_v30 = vadd.f32 %v5313_v10, %v7499_v34 }
 0x422   : > { %v7770_v62 = vadd.f32 %v2827_v6, %v7692_v33  ;;  %v5383_v8 = vpop.f32.mrb[70].mxu0 }
 0x423   : > { %2897 = vst.msk [vmem:[%s7595_s5 + $0xb0] sm:$0xff] %vm1890_vm9, %v7764_v16  ;;  %v2945_v54 = vadd.f32 %v2944_v1, %v2943_v46  ;;  %v7775_v49 = vadd.f32 %v5383_v8, %v2678_v4  ;;  %v5314_v44 = vpop.f32.mrb[68].mxu1  ;;  %v2830_v2 = vpop.f32.mrb[71].mxu0  ;;  %v2950_v20 = vsel %vm1890_vm9, %v7764_v16, 0.0 }
 0x424   : > { %2895 = vst.msk [vmem:[%s7595_s5 + $0xa0] sm:$0xff] %vm1890_vm9, %v7770_v62  ;;  %v2946_v34 = vsel %vm1890_vm9, %v7770_v62, 0.0  ;;  %v7783_v41 = vadd.f32 %v2830_v2, %v7700_v57  ;;  %v5315_v33 = vpop.f32.mrb[69].mxu1 }
 0x425   : > { %v2947_v25 = vadd.f32 %v2946_v34, %v2945_v54  ;;  %2898 = vst.msk [vmem:[%s7595_s5 + $0xb8] sm:$0xff] %vm1890_vm9, %v7775_v49  ;;  %v5316_v31 = vadd.f32 %v5315_v33, %v5314_v44  ;;  %v5317_v35 = vpop.f32.mrb[70].mxu1  ;;  %v2952_v40 = vsel %vm1890_vm9, %v7775_v49, 0.0 }
 0x426   : > { %2896 = vst.msk [vmem:[%s7595_s5 + $0xa8] sm:$0xff] %vm1890_vm9, %v7783_v41  ;;  %v2948_v55 = vsel %vm1890_vm9, %v7783_v41, 0.0  ;;  %v5318_v61 = vpop.f32.mrb[71].mxu1 }
 0x427   : > { %v2949_v4 = vadd.f32 %v2948_v55, %v2947_v25  ;;  %v5319_v29 = vadd.f32 %v5318_v61, %v5317_v35  ;;  %v2691_v57 = vadd.f32 %v5316_v31, %v7501_v14 }
 0x428   : > { %v5386_v3 = vpop.f32.mrb[72].mxu0 }
 0x429   : > { %v2951_v39 = vadd.f32 %v2950_v20, %v2949_v4  ;;  %v7796_v50 = vadd.f32 %v5386_v3, %v2691_v57  ;;  %v2843_v12 = vpop.f32.mrb[73].mxu0  ;;  %v2694_v51 = vadd.f32 %v5319_v29, %v7503_v17 }
 0x42a   : > { %v7801_v36 = vadd.f32 %v2843_v12, %v2683_v19  ;;  %v5387_v27 = vpop.f32.mrb[74].mxu0 }
 0x42b   : > { %2901 = vst.msk [vmem:[%s7595_s5 + $0xd0] sm:$0xff] %vm1890_vm9, %v7796_v50  ;;  %v2953_v14 = vadd.f32 %v2952_v40, %v2951_v39  ;;  %v7806_v18 = vadd.f32 %v5387_v27, %v2694_v51  ;;  %v5320_v28 = vpop.f32.mrb[72].mxu1  ;;  %v2846_v24 = vpop.f32.mrb[75].mxu0  ;;  %v2958_v44 = vsel %vm1890_vm9, %v7796_v50, 0.0 }
 0x42c   : > { %2899 = vst.msk [vmem:[%s7595_s5 + $0xc0] sm:$0xff] %vm1890_vm9, %v7801_v36  ;;  %v2954_v17 = vsel %vm1890_vm9, %v7801_v36, 0.0  ;;  %v7813_v10 = vadd.f32 %v2846_v24, %v2686_v30  ;;  %v5321_v38 = vpop.f32.mrb[73].mxu1 }
 0x42d   : > { %v2955_v19 = vadd.f32 %v2954_v17, %v2953_v14  ;;  %2902 = vst.msk [vmem:[%s7595_s5 + $0xd8] sm:$0xff] %vm1890_vm9, %v7806_v18  ;;  %v5322_v15 = vadd.f32 %v5321_v38, %v5320_v28  ;;  %v5323_v46 = vpop.f32.mrb[74].mxu1  ;;  %v2960_v31 = vsel %vm1890_vm9, %v7806_v18, 0.0 }
 0x42e   : > { %2900 = vst.msk [vmem:[%s7595_s5 + $0xc8] sm:$0xff] %vm1890_vm9, %v7813_v10  ;;  %v2956_v6 = vsel %vm1890_vm9, %v7813_v10, 0.0  ;;  %v5324_v1 = vpop.f32.mrb[75].mxu1 }
 0x42f   : > { %v2957_v8 = vadd.f32 %v2956_v6, %v2955_v19  ;;  %v5325_v54 = vadd.f32 %v5324_v1, %v5323_v46  ;;  %v2699_v30 = vadd.f32 %v5322_v15, %v7505_v22 }
 0x430   : > { %v5390_v2 = vpop.f32.mrb[76].mxu0 }
 0x431   : > { %v2959_v34 = vadd.f32 %v2958_v44, %v2957_v8  ;;  %v2859_v33 = vpop.f32.mrb[77].mxu0  ;;  %v2702_v25 = vadd.f32 %v5325_v54, %v7507_v47 }
 0x432   : > { %v2860_v35 = vadd.f32 %v2859_v33, %v2699_v30  ;;  %v5391_v55 = vpop.f32.mrb[78].mxu0 }
 0x433   : > { %v2961_v61 = vadd.f32 %v2960_v31, %v2959_v34  ;;  %v5326_v4 = vpop.f32.mrb[76].mxu1  ;;  %v2862_v29 = vpop.f32.mrb[79].mxu0 }
 0x434   : > { %2903 = vst.msk [vmem:[%s7595_s5 + $0xe0] sm:$0xff] %vm1890_vm9, %v2860_v35  ;;  %v2962_v22 = vsel %vm1890_vm9, %v2860_v35, 0.0  ;;  %v2863_v57 = vadd.f32 %v2862_v29, %v2702_v25  ;;  %v5327_v20 = vpop.f32.mrb[77].mxu1 }
 0x435   : > { %v2963_v3 = vadd.f32 %v2962_v22, %v2961_v61  ;;  %v5328_v39 = vadd.f32 %v5327_v20, %v5326_v4  ;;  %v5329_v12 = vpop.f32.mrb[78].mxu1 }
 0x436   : > { %2904 = vst.msk [vmem:[%s7595_s5 + $0xe8] sm:$0xff] %vm1890_vm9, %v2863_v57  ;;  %v2964_v47 = vsel %vm1890_vm9, %v2863_v57, 0.0  ;;  %v5330_v51 = vpop.f32.mrb[79].mxu1 }
 0x437   : > { %v2965_v40 = vadd.f32 %v2964_v47, %v2963_v3  ;;  %v2707_v27 = vadd.f32 %v5328_v39, %v7511_v32  ;;  %v5331_v14 = vadd.f32 %v5330_v51, %v5329_v12 }
 0x439   : > { %v2868_v28 = vadd.f32 %v5390_v2, %v2707_v27  ;;  %v2710_v24 = vadd.f32 %v5331_v14, %v7513_v37  ;;  %v3112_v14 = vld [vmem:[#allocation7] sm:$0x1] }
 0x43b   : > { %2905 = vst.msk [vmem:[%s7595_s5 + $0xf0] sm:$0xff] %vm1890_vm9, %v2868_v28  ;;  %v2966_v17 = vsel %vm1890_vm9, %v2868_v28, 0.0  ;;  %v2871_v38 = vadd.f32 %v5391_v55, %v2710_v24 }
 0x43c   : > { %v2967_v19 = vadd.f32 %v2966_v17, %v2965_v40 }
 0x43d   : > { %2906 = vst.msk [vmem:[%s7595_s5 + $0xf8] sm:$0xff] %vm1890_vm9, %v2871_v38  ;;  %v2968_v15 = vsel %vm1890_vm9, %v2871_v38, 0.0 }
 0x43e   : > { %v2969_v46 = vadd.f32 %v2968_v15, %v2967_v19 }
 0x440   : > { %v2970_v6 = vrot.slane %v2969_v46, 4 }
 0x442   : > { %v2971_v1 = vadd.f32 %v2970_v6, %v2969_v46 }
 0x444   : > { %v2972_v8 = vrot.slane %v2971_v1, 2 }
 0x446   : > { %v2973_v54 = vadd.f32 %v2972_v8, %v2971_v1  ;;  %v3131_v1 = vstv %s3130_s9 }
 0x448   : > { %v2974_v32 = vrot.slane %v2973_v54, 1 }
 0x44a   : > { %v2975_v30 = vadd.f32 %v2974_v32, %v2973_v54 }
 0x44c   : > { %v7843_v44 = vmul.f32 0.00390625, %v2975_v30 }
 0x44e   : > { %v7847_v37 = vsub.f32 %v7705_v59, %v7843_v44  ;;  %v7851_v2 = vsub.f32 %v7719_v9, %v7843_v44  ;;  %v7855_v34 = vsub.f32 %v7697_v5, %v7843_v44  ;;  %v7859_v33 = vsub.f32 %v7711_v58, %v7843_v44 }
 0x44f   : > { %v7863_v25 = vsub.f32 %v7738_v53, %v7843_v44  ;;  %v7867_v59 = vsub.f32 %v7751_v48, %v7843_v44  ;;  %v7871_v9 = vsub.f32 %v7732_v23, %v7843_v44  ;;  %v7875_v5 = vsub.f32 %v7743_v43, %v7843_v44 }
 0x450   : > { %v7879_v58 = vsub.f32 %v7770_v62, %v7843_v44  ;;  %v7883_v53 = vsub.f32 %v7783_v41, %v7843_v44  ;;  %v7887_v48 = vsub.f32 %v7764_v16, %v7843_v44  ;;  %v7891_v23 = vsub.f32 %v7775_v49, %v7843_v44 }
 0x451   : > { %v7895_v43 = vsub.f32 %v7801_v36, %v7843_v44  ;;  %v7899_v62 = vsub.f32 %v7813_v10, %v7843_v44  ;;  %v7903_v41 = vsub.f32 %v7796_v50, %v7843_v44  ;;  %v7907_v16 = vsub.f32 %v7806_v18, %v7843_v44 }
 0x452   : > { %v7910_v31 = vsub.f32 %v2860_v35, %v7843_v44  ;;  %v7913_v49 = vsub.f32 %v2863_v57, %v7843_v44  ;;  %v7916_v36 = vsub.f32 %v2868_v28, %v7843_v44  ;;  %v7919_v10 = vsub.f32 %v2871_v38, %v7843_v44 }
 0x453   : > { %v2977_v50 = vsub.f32 %v7592_v13, %v7843_v44  ;;  %v2978_v55 = vsub.f32 %v7607_v0, %v7843_v44  ;;  %v2979_v18 = vsub.f32 %v7586_v7, %v7843_v44  ;;  %v2980_v35 = vsub.f32 %v7601_v45, %v7843_v44 }
 0x454   : > { %v2981_v29 = vsub.f32 %v7633_v42, %v7843_v44  ;;  %v2982_v57 = vsub.f32 %v7647_v63, %v7843_v44  ;;  %v2983_v7 = vsub.f32 %v7625_v60, %v7843_v44  ;;  %v2984_v12 = vsub.f32 %v7639_v21, %v7843_v44 }
 0x455   : > { %v3009_v61 = vmul.f32 %v2977_v50, %v2977_v50  ;;  %v3010_v4 = vmul.f32 %v2978_v55, %v2978_v55  ;;  %v3011_v22 = vmul.f32 %v2979_v18, %v2979_v18  ;;  %v3012_v13 = vmul.f32 %v2980_v35, %v2980_v35 }
 0x456   : > { %v3013_v45 = vmul.f32 %v2981_v29, %v2981_v29  ;;  %v3014_v63 = vmul.f32 %v2982_v57, %v2982_v57  ;;  %v2985_v40 = vsub.f32 %v7667_v56, %v7843_v44  ;;  %v3015_v27 = vmul.f32 %v2983_v7, %v2983_v7 }
 0x457   : > { %v3041_v20 = vsel %vm1890_vm9, %v3009_v61, 0.0  ;;  %v3042_v0 = vsel %vm1890_vm9, %v3010_v4, 0.0  ;;  %v3044_v39 = vsel %vm1890_vm9, %v3011_v22, 0.0  ;;  %v3046_v47 = vsel %vm1890_vm9, %v3012_v13, 0.0 }
 0x458   : > { %v3043_v3 = vadd.f32 %v3042_v0, %v3041_v20  ;;  %v3048_v60 = vsel %vm1890_vm9, %v3013_v45, 0.0  ;;  %v2986_v24 = vsub.f32 %v7681_v26, %v7843_v44  ;;  %v3016_v17 = vmul.f32 %v2984_v12, %v2984_v12 }
 0x459   : > { %v3050_v21 = vsel %vm1890_vm9, %v3014_v63, 0.0  ;;  %v3118_v38 = vstv %s3117_s30  ;;  %v3113_v15 = vsub.f32 %v7843_v44, %v3112_v14  ;;  %v2987_v46 = vsub.f32 %v7661_v52, %v7843_v44 }
 0x45a   : > { %v3045_v42 = vadd.f32 %v3044_v39, %v3043_v3  ;;  %v3017_v56 = vmul.f32 %v2985_v40, %v2985_v40  ;;  %v3052_v6 = vsel %vm1890_vm9, %v3015_v27, 0.0  ;;  %v2988_v26 = vsub.f32 %v7673_v11, %v7843_v44 }
 0x45b   : > { %v3119_v54 = vmul.f32 %v3118_v38, %v3113_v15  ;;  %v3125_v32 = vmul.f32 %v3113_v15, %v3113_v15  ;;  %v3018_v30 = vmul.f32 %v2986_v24, %v2986_v24  ;;  %v3054_v50 = vsel %vm1890_vm9, %v3016_v17, 0.0 }
 0x45c   : > { %v3047_v51 = vadd.f32 %v3046_v47, %v3045_v42  ;;  %v3019_v61 = vmul.f32 %v2987_v46, %v2987_v46  ;;  %v3056_v52 = vsel %vm1890_vm9, %v3017_v56, 0.0  ;;  %v3020_v29 = vmul.f32 %v2988_v26, %v2988_v26 }
 0x45d   : > { %v3120_v18 = vadd.f32 %v3119_v54, %v3112_v14  ;;  %v7956_v35 = vmul.f32 %v3131_v1, %v3125_v32  ;;  %v3058_v22 = vsel %vm1890_vm9, %v3018_v30, 0.0  ;;  %v3021_v11 = vmul.f32 %v7847_v37, %v7847_v37 }
 0x45e   : > { %v3049_v28 = vadd.f32 %v3048_v60, %v3047_v51  ;;  %v3060_v44 = vsel %vm1890_vm9, %v3019_v61, 0.0  ;;  %v3022_v20 = vmul.f32 %v7851_v2, %v7851_v2  ;;  %v3062_v0 = vsel %vm1890_vm9, %v3020_v29, 0.0 }
 0x45f   : > { %3122 = vst.msk [vmem:[#allocation7] sm:$0x1] %vm3121_vm11, %v3120_v18  ;;  %v3023_v7 = vmul.f32 %v7855_v34, %v7855_v34  ;;  %v3064_v45 = vsel %vm1890_vm9, %v3021_v11, 0.0  ;;  %v3024_v42 = vmul.f32 %v7859_v33, %v7859_v33  ;;  %v3025_v63 = vmul.f32 %v7863_v25, %v7863_v25 }
 0x460   : > { %v3051_v19 = vadd.f32 %v3050_v21, %v3049_v28  ;;  %v3066_v37 = vsel %vm1890_vm9, %v3022_v20, 0.0  ;;  %v3026_v51 = vmul.f32 %v7867_v59, %v7867_v59  ;;  %v3027_v27 = vmul.f32 %v7871_v9, %v7871_v9 }
 0x461   : > { %v3068_v2 = vsel %vm1890_vm9, %v3023_v7, 0.0  ;;  %v3070_v34 = vsel %vm1890_vm9, %v3024_v42, 0.0  ;;  %v3072_v33 = vsel %vm1890_vm9, %v3025_v63, 0.0  ;;  %v3028_v14 = vmul.f32 %v7875_v5, %v7875_v5 }
 0x462   : > { %v3053_v8 = vadd.f32 %v3052_v6, %v3051_v19  ;;  %v3074_v25 = vsel %vm1890_vm9, %v3026_v51, 0.0  ;;  %v3029_v24 = vmul.f32 %v7879_v58, %v7879_v58  ;;  %v3076_v59 = vsel %vm1890_vm9, %v3027_v27, 0.0 }
 0x463   : > { %v3030_v21 = vmul.f32 %v7883_v53, %v7883_v53  ;;  %v3078_v9 = vsel %vm1890_vm9, %v3028_v14, 0.0  ;;  %v3031_v19 = vmul.f32 %v7887_v48, %v7887_v48  ;;  %v3032_v46 = vmul.f32 %v7891_v23, %v7891_v23 }
 0x464   : > { %v3055_v55 = vadd.f32 %v3054_v50, %v3053_v8  ;;  %v3080_v5 = vsel %vm1890_vm9, %v3029_v24, 0.0  ;;  %v3033_v6 = vmul.f32 %v7895_v43, %v7895_v43  ;;  %v3034_v8 = vmul.f32 %v7899_v62, %v7899_v62 }
 0x465   : > { %v3082_v58 = vsel %vm1890_vm9, %v3030_v21, 0.0  ;;  %v3084_v53 = vsel %vm1890_vm9, %v3031_v19, 0.0  ;;  %v3086_v48 = vsel %vm1890_vm9, %v3032_v46, 0.0  ;;  %v3035_v32 = vmul.f32 %v7903_v41, %v7903_v41 }
 0x466   : > { %v3057_v4 = vadd.f32 %v3056_v52, %v3055_v55  ;;  %v3088_v23 = vsel %vm1890_vm9, %v3033_v6, 0.0  ;;  %v3036_v30 = vmul.f32 %v7907_v16, %v7907_v16  ;;  %v3090_v43 = vsel %vm1890_vm9, %v3034_v8, 0.0 }
 0x467   : > { %v3037_v55 = vmul.f32 %v7910_v31, %v7910_v31  ;;  %v3092_v62 = vsel %vm1890_vm9, %v3035_v32, 0.0  ;;  %v3038_v61 = vmul.f32 %v7913_v49, %v7913_v49 }
 0x468   : > { %v3059_v57 = vadd.f32 %v3058_v22, %v3057_v4  ;;  %v3094_v41 = vsel %vm1890_vm9, %v3036_v30, 0.0  ;;  %v3039_v4 = vmul.f32 %v7916_v36, %v7916_v36  ;;  %v3040_v22 = vmul.f32 %v7919_v10, %v7919_v10 }
 0x469   : > { %v3096_v16 = vsel %vm1890_vm9, %v3037_v55, 0.0  ;;  %v3098_v31 = vsel %vm1890_vm9, %v3038_v61, 0.0 }
 0x46a   : > { %v3061_v13 = vadd.f32 %v3060_v44, %v3059_v57  ;;  %v3100_v11 = vsel %vm1890_vm9, %v3039_v4, 0.0  ;;  %v3102_v49 = vsel %vm1890_vm9, %v3040_v22, 0.0 }
 0x46c   : > { %v3063_v3 = vadd.f32 %v3062_v0, %v3061_v13 }
 0x46e   : > { %v3065_v39 = vadd.f32 %v3064_v45, %v3063_v3  ;;  %v3123_v45 = vld [vmem:[#allocation8] sm:$0x1] }
 0x470   : > { %v3067_v12 = vadd.f32 %v3066_v37, %v3065_v39 }
 0x472   : > { %v3069_v47 = vadd.f32 %v3068_v2, %v3067_v12 }
 0x474   : > { %v3071_v40 = vadd.f32 %v3070_v34, %v3069_v47 }
 0x476   : > { %v3073_v60 = vadd.f32 %v3072_v33, %v3071_v40 }
 0x478   : > { %v3075_v28 = vadd.f32 %v3074_v25, %v3073_v60 }
 0x47a   : > { %v3077_v17 = vadd.f32 %v3076_v59, %v3075_v28 }
 0x47c   : > { %v3079_v38 = vadd.f32 %v3078_v9, %v3077_v17 }
 0x47e   : > { %v3081_v15 = vadd.f32 %v3080_v5, %v3079_v38 }
 0x480   : > { %v3083_v56 = vadd.f32 %v3082_v58, %v3081_v15 }
 0x482   : > { %v3085_v1 = vadd.f32 %v3084_v53, %v3083_v56 }
 0x484   : > { %v3087_v54 = vadd.f32 %v3086_v48, %v3085_v1 }
 0x486   : > { %v3089_v26 = vadd.f32 %v3088_v23, %v3087_v54 }
 0x488   : > { %v3091_v50 = vadd.f32 %v3090_v43, %v3089_v26 }
 0x48a   : > { %v3093_v18 = vadd.f32 %v3092_v62, %v3091_v50 }
 0x48c   : > { %v3095_v52 = vadd.f32 %v3094_v41, %v3093_v18 }
 0x48e   : > { %v3097_v29 = vadd.f32 %v3096_v16, %v3095_v52 }
 0x490   : > { %v3099_v57 = vadd.f32 %v3098_v31, %v3097_v29 }
 0x492   : > { %v3101_v44 = vadd.f32 %v3100_v11, %v3099_v57 }
 0x494   : > { %v3103_v13 = vadd.f32 %v3102_v49, %v3101_v44 }
 0x496   : > { %v3104_v20 = vrot.slane %v3103_v13, 4 }
 0x498   : > { %v3105_v0 = vadd.f32 %v3104_v20, %v3103_v13 }
 0x49a   : > { %v3106_v3 = vrot.slane %v3105_v0, 2 }
 0x49c   : > { %v3107_v7 = vadd.f32 %v3106_v3, %v3105_v0 }
 0x49e   : > { %v3108_v36 = vrot.slane %v3107_v7, 1 }
 0x4a0   : > { %v3109_v39 = vadd.f32 %v3108_v36, %v3107_v7 }
 0x4a2   : > { %v3124_v42 = vadd.f32 %v3123_v45, %v3109_v39 }
 0x4a4   : > { %v3133_v37 = vadd.f32 %v7956_v35, %v3124_v42 }
 0x4a6   : > { %3134 = vst.msk [vmem:[#allocation8] sm:$0x1] %vm3121_vm11, %v3133_v37 }
 0x4a7 PF: > { %p4951_p2 = scmp.ne.s32.totalorder %s5765_s20, 2 }
 0x4a9   : > { %3138 = sbr.rel (%p4951_p2) target bundleno = 1658 (0x67a), region = 80 }
 0x4b0   : > { %s9691_s22 = sld [smem:[#allocation45_spill]]  ;;  %v5785_v63 = vmov 0   ;;  %v3172_v51 = vld [vmem:[#allocation8] sm:$0x1]  ;;  %v9638_v60 = vlaneseq  ;;  %s8056_s29 = scalar_lea.vmem [#allocation3], %s6014_s6  ;;  %vm3427_vm12 = vcmask 523264  }
 0x4b1   : > { %3508 = vmatprep.mubr.bf16.mxu0 %v5785_v63  ;;  %3588 = vmatprep.mubr.bf16.mxu1 %v5785_v63  ;;  %v3173_v40 = vmul.f32 0.001953125, %v3172_v51  ;;  %v3140_v28 = vld [vmem:[%s8056_s29] sm:$0xff]  ;;  %v3141_v24 = vld [vmem:[%s8056_s29 + $0x8] sm:$0xff]  ;;  %v8063_v17 = vld [vmem:[%s8056_s29 + $0xf0] sm:$0xff]  ;;  %s9694_s12 = sld [smem:[#allocation43_spill]]  ;;  %s9695_s16 = sld [smem:[#allocation44_spill]] }
 0x4b2   : > { %v8053_v25 = vshrl.u32 %v9638_v60, 7  ;;  %v8060_v59 = vld [vmem:[#allocation7] ss:$0 sm:$0xff]  ;;  %v3142_v21 = vld [vmem:[%s8056_s29 + $0x10] sm:$0xff]  ;;  %v3143_v9 = vld [vmem:[%s8056_s29 + $0x18] sm:$0xff]  ;;  %s4016_s10 = scvt.s32.f32 %s6014_s6  ;;  %s3669_s7 = sshra.s32 %s6014_s6, 3 }
 0x4b3   : > { %v3174_v33 = vadd.f32 1e-05, %v3173_v40  ;;  %v8068_v38 = vld [vmem:[%s8056_s29 + $0xf8] sm:$0xff]  ;;  %v3213_v19 = vsub.f32 %v8063_v17, %v8060_v59  ;;  %v3183_v46 = vsub.f32 %v3140_v28, %v8060_v59  ;;  %v3184_v58 = vsub.f32 %v3141_v24, %v8060_v59  ;;  %v3144_v8 = vld [vmem:[%s8056_s29 + $0x20] sm:$0xff]  ;;  %v3145_v48 = vld [vmem:[%s8056_s29 + $0x28] sm:$0xff] }
 0x4b4   : > { %9693 = vst [vmem:[#allocation22_spill] sm:$0xff] %v8053_v25  ;;  %v9639_v5 = vsub.s32 0, %v8053_v25  ;;  %v3214_v15 = vsub.f32 %v8068_v38, %v8060_v59  ;;  %v3185_v56 = vsub.f32 %v3142_v21, %v8060_v59  ;;  %v3186_v6 = vsub.f32 %v3143_v9, %v8060_v59  ;;  %v3156_v62 = vld [vmem:[%s8056_s29 + $0x80] sm:$0xff]  ;;  %v3157_v18 = vld [vmem:[%s8056_s29 + $0x88] sm:$0xff]  ;;  %v3158_v16 = vld [vmem:[%s8056_s29 + $0x90] sm:$0xff]  ;;  %s4017_s5 = sadd.f32 256.0, %s4016_s10 }
 0x4b5   : > { %5619 = vrsqrt.f32 %v3174_v33  ;;  %v3187_v50 = vsub.f32 %v3144_v8, %v8060_v59  ;;  %v3188_v55 = vsub.f32 %v3145_v48, %v8060_v59  ;;  %v3159_v29 = vld [vmem:[%s8056_s29 + $0x98] sm:$0xff]  ;;  %v3146_v57 = vld [vmem:[%s8056_s29 + $0x30] sm:$0xff]  ;;  %v3199_v11 = vsub.f32 %v3156_v62, %v8060_v59 }
 0x4b6   : > { %s9692_s27 = smov %s9691_s22  ;;  %v5607_v10 = vld [vmem:[%s9691_s22 + $0x4] ss:$8 sps:$4 sm:$0xff]   ;;  %v3200_v44 = vsub.f32 %v3157_v18, %v8060_v59  ;;  %v3147_v3 = vld [vmem:[%s8056_s29 + $0x38] sm:$0xff]  ;;  %v3201_v45 = vsub.f32 %v3158_v16, %v8060_v59  ;;  %v3202_v39 = vsub.f32 %v3159_v29, %v8060_v59  ;;  %v3189_v42 = vsub.f32 %v3146_v57, %v8060_v59 }
 0x4b7   : > { %v5609_v12 = vld [vmem:[%s9692_s27] ss:$8 sps:$4 sm:$0xff]   ;;  %3476 = vmatprep.subr.bf16.mxu0 %v5607_v10  ;;  %v5610_v35 = vld [vmem:[%s9692_s27 + $0x14] ss:$8 sps:$4 sm:$0xff]   ;;  %5424 = vmatprep.subr.bf16.mxu1 %v5607_v10  ;;  %v5612_v2 = vld [vmem:[%s9692_s27 + $0x10] ss:$8 sps:$4 sm:$0xff]   ;;  %v3190_v10 = vsub.f32 %v3147_v3, %v8060_v59 }
 0x4b8   : > { %3477 = vmatpush1.bf16.msra.mxu0 %v5609_v12  ;;  %5428 = vmatpush1.bf16.msra.mxu1 %v5609_v12  ;;  %v5613_v47 = vld [vmem:[%s9692_s27 + $0x24] ss:$8 sps:$4 sm:$0xff]   ;;  %v5615_v34 = vld [vmem:[%s9692_s27 + $0x20] ss:$8 sps:$4 sm:$0xff]   ;;  %v5616_v27 = vld [vmem:[%s9692_s27 + $0x34] ss:$8 sps:$4 sm:$0xff]  }
 0x4b9   : > { %3478 = vmatprep.subr.bf16.mxu0 %v5610_v35  ;;  %5425 = vmatprep.subr.bf16.mxu1 %v5610_v35  ;;  %v5618_v14 = vld [vmem:[%s9692_s27 + $0x30] ss:$8 sps:$4 sm:$0xff]   ;;  %v8088_v54 = vld [vmem:[%s9694_s12] ss:$0 sm:$0xff]  ;;  %s4085_s12 = smul.f32 256.0, %s4016_s10 }
 0x4ba   : > { %v8097_v43 = vld [vmem:[%s9695_s16] ss:$0 sm:$0xff] }
 0x4bc   : > { %3479 = vmatpush1.bf16.msra.mxu0 %v5612_v2  ;;  %5429 = vmatpush1.bf16.msra.mxu1 %v5612_v2  ;;  %v3160_v2 = vld [vmem:[%s8056_s29 + $0xa0] sm:$0xff] }
 0x4bd   : > { %3480 = vmatprep.subr.bf16.mxu0 %v5613_v47  ;;  %5426 = vmatprep.subr.bf16.mxu1 %v5613_v47  ;;  %v3161_v47 = vld [vmem:[%s8056_s29 + $0xa8] sm:$0xff]  ;;  %v3203_v9 = vsub.f32 %v3160_v2, %v8060_v59 }
 0x4bf   : > { %v5620_v53 = vpop.eup %5619 }
 0x4c0   : > { %3481 = vmatpush1.bf16.msra.mxu0 %v5615_v34  ;;  %5430 = vmatpush1.bf16.msra.mxu1 %v5615_v34  ;;  %v8081_v1 = vrot.slane %v5620_v53, %v9639_v5  ;;  %v3149_v53 = vld [vmem:[%s8056_s29 + $0x48] sm:$0xff] }
 0x4c1   : > { %3482 = vmatprep.subr.bf16.mxu0 %v5616_v27  ;;  %5427 = vmatprep.subr.bf16.mxu1 %v5616_v27 }
 0x4c2   : > { %v3221_v32 = vmul.f32 %v8081_v1, %v3183_v46  ;;  %v3222_v23 = vmul.f32 %v8081_v1, %v3184_v58  ;;  %v3223_v26 = vmul.f32 %v8081_v1, %v3185_v56  ;;  %v3224_v30 = vmul.f32 %v8081_v1, %v3186_v6  ;;  %v3148_v6 = vld [vmem:[%s8056_s29 + $0x40] sm:$0xff] }
 0x4c3   : > { %v3225_v20 = vmul.f32 %v8081_v1, %v3187_v50  ;;  %v3226_v0 = vmul.f32 %v8081_v1, %v3188_v55  ;;  %v3237_v12 = vmul.f32 %v8081_v1, %v3199_v11  ;;  %v3238_v35 = vmul.f32 %v8081_v1, %v3200_v44  ;;  %v3162_v50 = vld [vmem:[%s8056_s29 + $0xb0] sm:$0xff]  ;;  %v3163_v55 = vld [vmem:[%s8056_s29 + $0xb8] sm:$0xff] }
 0x4c4   : > { %3483 = vmatpush1.bf16.msra.mxu0 %v5618_v14  ;;  %5431 = vmatpush1.bf16.msra.mxu1 %v5618_v14  ;;  %v3260_v61 = vmul.f32 %v8088_v54, %v3221_v32  ;;  %v3261_v41 = vmul.f32 %v8088_v54, %v3222_v23  ;;  %v3262_v52 = vmul.f32 %v8088_v54, %v3223_v26 }
 0x4c5   : > { %v3263_v4 = vmul.f32 %v8088_v54, %v3224_v30  ;;  %v3264_v40 = vmul.f32 %v8088_v54, %v3225_v20  ;;  %v3265_v27 = vmul.f32 %v8088_v54, %v3226_v0  ;;  %v3276_v33 = vmul.f32 %v8088_v54, %v3237_v12 }
 0x4c6   : > { %v3299_v22 = vadd.f32 %v8097_v43, %v3260_v61  ;;  %v3300_v31 = vadd.f32 %v8097_v43, %v3261_v41  ;;  %v3301_v49 = vadd.f32 %v8097_v43, %v3262_v52  ;;  %v3277_v14 = vmul.f32 %v8088_v54, %v3238_v35 }
 0x4c7   : > { %v3302_v13 = vadd.f32 %v8097_v43, %v3263_v4  ;;  %v3239_v28 = vmul.f32 %v8081_v1, %v3201_v45  ;;  %v3240_v24 = vmul.f32 %v8081_v1, %v3202_v39  ;;  %v3227_v21 = vmul.f32 %v8081_v1, %v3189_v42  ;;  %v3150_v39 = vld [vmem:[%s8056_s29 + $0x50] sm:$0xff] }
 0x4c8   : > { %v3331_v7 = vmax.f32 %v3299_v22, 0.0  ;;  %v3332_v36 = vmax.f32 %v3300_v31, 0.0  ;;  %v3333_v51 = vmax.f32 %v3301_v49, 0.0  ;;  %v3204_v46 = vsub.f32 %v3161_v47, %v8060_v59 }
 0x4c9   : > { %v3334_v34 = vmax.f32 %v3302_v13, 0.0  ;;  %v3315_v58 = vadd.f32 %v8097_v43, %v3276_v33  ;;  %v3316_v56 = vadd.f32 %v8097_v43, %v3277_v14  ;;  %v3278_v8 = vmul.f32 %v8088_v54, %v3239_v28  ;;  %v3165_v33 = vld [vmem:[%s8056_s29 + $0xc8] sm:$0xff] }
 0x4ca   : > { %v3363_v37 = vpack.c.bf16 %v3332_v36, %v3331_v7  ;;  %v3279_v48 = vmul.f32 %v8088_v54, %v3240_v24  ;;  %v3303_v23 = vadd.f32 %v8097_v43, %v3264_v40  ;;  %v3304_v26 = vadd.f32 %v8097_v43, %v3265_v27  ;;  %v3164_v27 = vld [vmem:[%s8056_s29 + $0xc0] sm:$0xff] }
 0x4cb   : > { %v3364_v32 = vpack.c.bf16 %v3334_v34, %v3333_v51  ;;  %v3228_v30 = vmul.f32 %v8081_v1, %v3190_v10  ;;  %v3347_v62 = vmax.f32 %v3315_v58, 0.0  ;;  %v3348_v18 = vmax.f32 %v3316_v56, 0.0  ;;  %v3151_v10 = vld [vmem:[%s8056_s29 + $0x58] sm:$0xff] }
 0x4cc   : > { %4963 = vmatmul.mubr.msk.bf16.vlgmr.msra.gmra.mrb[0].mxu0 %vm3427_vm12, %v3363_v37  ;;  %v3317_v61 = vadd.f32 %v8097_v43, %v3278_v8  ;;  %v3318_v41 = vadd.f32 %v8097_v43, %v3279_v48  ;;  %v3191_v52 = vsub.f32 %v3148_v6, %v8060_v59  ;;  %v3192_v4 = vsub.f32 %v3149_v53, %v8060_v59 }
 0x4cd   : > { %3518 = vmatprep.mubr.bf16.mxu0 %v5785_v63  ;;  %v3371_v16 = vpack.c.bf16 %v3348_v18, %v3347_v62  ;;  %v3241_v29 = vmul.f32 %v8081_v1, %v3203_v9  ;;  %v3205_v22 = vsub.f32 %v3162_v50, %v8060_v59  ;;  %v3206_v31 = vsub.f32 %v3163_v55, %v8060_v59  ;;  %v3153_v50 = vld [vmem:[%s8056_s29 + $0x68] sm:$0xff] }
 0x4ce   : > { %v3335_v57 = vmax.f32 %v3303_v23, 0.0  ;;  %v3266_v11 = vmul.f32 %v8088_v54, %v3227_v21  ;;  %v3267_v44 = vmul.f32 %v8088_v54, %v3228_v30  ;;  %v3242_v49 = vmul.f32 %v8081_v1, %v3204_v46  ;;  %v3152_v30 = vld [vmem:[%s8056_s29 + $0x60] sm:$0xff] }
 0x4cf   : > { %v3336_v13 = vmax.f32 %v3304_v26, 0.0  ;;  %4971 = vmatmul.mubr.msk.bf16.vlgmr.msra.gmra.mrb[0].mxu1 %vm3427_vm12, %v3371_v16  ;;  %v3349_v20 = vmax.f32 %v3317_v61, 0.0  ;;  %v3350_v0 = vmax.f32 %v3318_v41, 0.0  ;;  %v3280_v3 = vmul.f32 %v8088_v54, %v3241_v29  ;;  %v3167_v16 = vld [vmem:[%s8056_s29 + $0xd8] sm:$0xff] }
 0x4d0   : > { %3598 = vmatprep.mubr.bf16.mxu1 %v5785_v63  ;;  %v3281_v7 = vmul.f32 %v8088_v54, %v3242_v49  ;;  %v3229_v36 = vmul.f32 %v8081_v1, %v3191_v52  ;;  %v3230_v45 = vmul.f32 %v8081_v1, %v3192_v4  ;;  %v3305_v42 = vadd.f32 %v8097_v43, %v3266_v11  ;;  %v3166_v4 = vld [vmem:[%s8056_s29 + $0xd0] sm:$0xff] }
 0x4d1   : > { %v3306_v37 = vadd.f32 %v8097_v43, %v3267_v44  ;;  %v3243_v12 = vmul.f32 %v8081_v1, %v3205_v22  ;;  %v3244_v35 = vmul.f32 %v8081_v1, %v3206_v31  ;;  %v3365_v2 = vpack.c.bf16 %v3336_v13, %v3335_v57 }
 0x4d2   : > { %v3372_v47 = vpack.c.bf16 %v3350_v0, %v3349_v20  ;;  %v3319_v51 = vadd.f32 %v8097_v43, %v3280_v3  ;;  %v3320_v34 = vadd.f32 %v8097_v43, %v3281_v7  ;;  %v3193_v40 = vsub.f32 %v3150_v39, %v8060_v59 }
 0x4d3   : > { %v3268_v14 = vmul.f32 %v8088_v54, %v3229_v36  ;;  %v3269_v28 = vmul.f32 %v8088_v54, %v3230_v45  ;;  %v3194_v24 = vsub.f32 %v3151_v10, %v8060_v59  ;;  %v3337_v21 = vmax.f32 %v3305_v42, 0.0 }
 0x4d4   : > { %4964 = vmatmul.mubr.msk.bf16.gmra.mrb[4].mxu0 %vm3427_vm12, %v3364_v32  ;;  %v3338_v9 = vmax.f32 %v3306_v37, 0.0  ;;  %v3282_v46 = vmul.f32 %v8088_v54, %v3243_v12  ;;  %v3283_v58 = vmul.f32 %v8088_v54, %v3244_v35  ;;  %v3351_v56 = vmax.f32 %v3319_v51, 0.0 }
 0x4d5   : > { %3528 = vmatprep.mubr.bf16.mxu0 %v5785_v63  ;;  %v3352_v6 = vmax.f32 %v3320_v34, 0.0  ;;  %v3207_v53 = vsub.f32 %v3164_v27, %v8060_v59  ;;  %v3208_v8 = vsub.f32 %v3165_v33, %v8060_v59  ;;  %v3231_v48 = vmul.f32 %v8081_v1, %v3193_v40 }
 0x4d6   : > { %v3307_v32 = vadd.f32 %v8097_v43, %v3268_v14  ;;  %v3308_v23 = vadd.f32 %v8097_v43, %v3269_v28  ;;  %v3232_v26 = vmul.f32 %v8081_v1, %v3194_v24  ;;  %v3366_v55 = vpack.c.bf16 %v3338_v9, %v3337_v21  ;;  %v3168_v28 = vld [vmem:[%s8056_s29 + $0xe0] sm:$0xff]  ;;  %v3169_v24 = vld [vmem:[%s8056_s29 + $0xe8] sm:$0xff] }
 0x4d7   : > { %4972 = vmatmul.mubr.msk.bf16.gmra.mrb[4].mxu1 %vm3427_vm12, %v3372_v47  ;;  %v3321_v62 = vadd.f32 %v8097_v43, %v3282_v46  ;;  %v3322_v18 = vadd.f32 %v8097_v43, %v3283_v58  ;;  %v3373_v61 = vpack.c.bf16 %v3352_v6, %v3351_v56  ;;  %v3245_v41 = vmul.f32 %v8081_v1, %v3207_v53  ;;  %v3155_v47 = vld [vmem:[%s8056_s29 + $0x78] sm:$0xff] }
 0x4d8   : > { %3608 = vmatprep.mubr.bf16.mxu1 %v5785_v63  ;;  %v3246_v52 = vmul.f32 %v8081_v1, %v3208_v8  ;;  %v3251_v29 = vmul.f32 %v8081_v1, %v3213_v19  ;;  %v3270_v22 = vmul.f32 %v8088_v54, %v3231_v48  ;;  %v3195_v31 = vsub.f32 %v3152_v30, %v8060_v59 }
 0x4d9   : > { %v3196_v57 = vsub.f32 %v3153_v50, %v8060_v59  ;;  %v3252_v11 = vmul.f32 %v8081_v1, %v3214_v15  ;;  %v3339_v44 = vmax.f32 %v3307_v32, 0.0  ;;  %v3340_v49 = vmax.f32 %v3308_v23, 0.0 }
 0x4da   : > { %v3271_v13 = vmul.f32 %v8088_v54, %v3232_v26  ;;  %v3290_v20 = vmul.f32 %v8088_v54, %v3251_v29  ;;  %v3353_v17 = vmax.f32 %v3321_v62, 0.0  ;;  %v3209_v19 = vsub.f32 %v3166_v4, %v8060_v59 }
 0x4db   : > { %v3210_v0 = vsub.f32 %v3167_v16, %v8060_v59  ;;  %v3291_v3 = vmul.f32 %v8088_v54, %v3252_v11  ;;  %v3354_v38 = vmax.f32 %v3322_v18, 0.0  ;;  %v3284_v15 = vmul.f32 %v8088_v54, %v3245_v41 }
 0x4dc   : > { %4965 = vmatmul.mubr.msk.bf16.gmra.mrb[8].mxu0 %vm3427_vm12, %v3365_v2  ;;  %v3285_v7 = vmul.f32 %v8088_v54, %v3246_v52  ;;  %v3329_v36 = vadd.f32 %v8097_v43, %v3290_v20  ;;  %v3367_v39 = vpack.c.bf16 %v3340_v49, %v3339_v44  ;;  %v3309_v42 = vadd.f32 %v8097_v43, %v3270_v22  ;;  %v3154_v2 = vld [vmem:[%s8056_s29 + $0x70] sm:$0xff]  ;;  %s4992_s29 = sshll.u32 %s3669_s7, 4 }
 0x4dd   : > { %3538 = vmatprep.mubr.bf16.mxu0 %v5785_v63  ;;  %v3330_v45 = vadd.f32 %v8097_v43, %v3291_v3  ;;  %v3310_v37 = vadd.f32 %v8097_v43, %v3271_v13  ;;  %v3233_v12 = vmul.f32 %v8081_v1, %v3195_v31  ;;  %v3234_v35 = vmul.f32 %v8081_v1, %v3196_v57  ;;  %s8283_s30 = scalar_lea.vmem [#allocation4], %s4992_s29 }
 0x4de   : > { %v3361_v10 = vmax.f32 %v3329_v36, 0.0  ;;  %v3247_v51 = vmul.f32 %v8081_v1, %v3209_v19  ;;  %v3374_v40 = vpack.c.bf16 %v3354_v38, %v3353_v17  ;;  %v3323_v27 = vadd.f32 %v8097_v43, %v3284_v15 }
 0x4df   : > { %4973 = vmatmul.mubr.msk.bf16.gmra.mrb[8].mxu1 %vm3427_vm12, %v3373_v61  ;;  %v3362_v34 = vmax.f32 %v3330_v45, 0.0  ;;  %v3324_v33 = vadd.f32 %v8097_v43, %v3285_v7  ;;  %v3248_v14 = vmul.f32 %v8081_v1, %v3210_v0  ;;  %v3341_v9 = vmax.f32 %v3309_v42, 0.0 }
 0x4e0   : > { %3618 = vmatprep.mubr.bf16.mxu1 %v5785_v63  ;;  %v3342_v46 = vmax.f32 %v3310_v37, 0.0  ;;  %v3197_v58 = vsub.f32 %v3154_v2, %v8060_v59  ;;  %v3198_v56 = vsub.f32 %v3155_v47, %v8060_v59  ;;  %v3272_v6 = vmul.f32 %v8088_v54, %v3233_v12 }
 0x4e1   : > { %v3378_v21 = vpack.c.bf16 %v3362_v34, %v3361_v10  ;;  %v3273_v53 = vmul.f32 %v8088_v54, %v3234_v35  ;;  %v3211_v8 = vsub.f32 %v3168_v28, %v8060_v59  ;;  %v3212_v48 = vsub.f32 %v3169_v24, %v8060_v59 }
 0x4e2   : > { %v3355_v32 = vmax.f32 %v3323_v27, 0.0  ;;  %v3356_v23 = vmax.f32 %v3324_v33, 0.0  ;;  %v3286_v26 = vmul.f32 %v8088_v54, %v3247_v51  ;;  %v3287_v30 = vmul.f32 %v8088_v54, %v3248_v14 }
 0x4e3   : > { %v3368_v50 = vpack.c.bf16 %v3342_v46, %v3341_v9  ;;  %v3311_v62 = vadd.f32 %v8097_v43, %v3272_v6  ;;  %v3312_v59 = vadd.f32 %v8097_v43, %v3273_v53  ;;  %v3236_v18 = vmul.f32 %v8081_v1, %v3198_v56 }
 0x4e4   : > { %4966 = vmatmul.mubr.msk.bf16.gmra.mrb[12].mxu0 %vm3427_vm12, %v3366_v55  ;;  %v3235_v55 = vmul.f32 %v8081_v1, %v3197_v58  ;;  %v3249_v61 = vmul.f32 %v8081_v1, %v3211_v8  ;;  %v3375_v41 = vpack.c.bf16 %v3356_v23, %v3355_v32  ;;  %v3325_v52 = vadd.f32 %v8097_v43, %v3286_v26 }
 0x4e5   : > { %3548 = vmatprep.mubr.bf16.mxu0 %v5785_v63  ;;  %v3326_v4 = vadd.f32 %v8097_v43, %v3287_v30  ;;  %v3250_v16 = vmul.f32 %v8081_v1, %v3212_v48  ;;  %v3343_v29 = vmax.f32 %v3311_v62, 0.0  ;;  %v3344_v22 = vmax.f32 %v3312_v59, 0.0 }
 0x4e6   : > { %v3274_v31 = vmul.f32 %v8088_v54, %v3235_v55  ;;  %v3275_v57 = vmul.f32 %v8088_v54, %v3236_v18  ;;  %v3357_v11 = vmax.f32 %v3325_v52, 0.0  ;;  %v3288_v49 = vmul.f32 %v8088_v54, %v3249_v61 }
 0x4e7   : > { %4974 = vmatmul.mubr.msk.bf16.gmra.mrb[12].mxu1 %vm3427_vm12, %v3374_v40  ;;  %v3358_v44 = vmax.f32 %v3326_v4, 0.0  ;;  %v3289_v13 = vmul.f32 %v8088_v54, %v3250_v16  ;;  %v3369_v17 = vpack.c.bf16 %v3344_v22, %v3343_v29 }
 0x4e8   : > { %3628 = vmatprep.mubr.bf16.mxu1 %v5785_v63  ;;  %v3313_v1 = vadd.f32 %v8097_v43, %v3274_v31  ;;  %v3314_v20 = vadd.f32 %v8097_v43, %v3275_v57  ;;  %v3327_v0 = vadd.f32 %v8097_v43, %v3288_v49 }
 0x4e9   : > { %v3376_v19 = vpack.c.bf16 %v3358_v44, %v3357_v11  ;;  %v3328_v3 = vadd.f32 %v8097_v43, %v3289_v13  ;;  %v4032_v43 = vstv %s4017_s5 }
 0x4ea   : > { %v3345_v38 = vmax.f32 %v3313_v1, 0.0  ;;  %v3346_v54 = vmax.f32 %v3314_v20, 0.0  ;;  %v3359_v15 = vmax.f32 %v3327_v0, 0.0  ;;  %5621 = vrcp.f32 %v4032_v43 }
 0x4eb   : > { %v3360_v7 = vmax.f32 %v3328_v3, 0.0 }
 0x4ec   : > { %4967 = vmatmul.mubr.msk.bf16.gmra.mrb[16].mxu0 %vm3427_vm12, %v3367_v39  ;;  %v3370_v36 = vpack.c.bf16 %v3346_v54, %v3345_v38 }
 0x4ed   : > { %3558 = vmatprep.mubr.bf16.mxu0 %v5785_v63  ;;  %v3377_v45 = vpack.c.bf16 %v3360_v7, %v3359_v15 }
 0x4ef   : > { %4975 = vmatmul.mubr.msk.bf16.gmra.mrb[16].mxu1 %vm3427_vm12, %v3375_v41 }
 0x4f0   : > { %3638 = vmatprep.mubr.bf16.mxu1 %v5785_v63 }
 0x4f4   : > { %4968 = vmatmul.mubr.msk.bf16.gmra.mrb[20].mxu0 %vm3427_vm12, %v3368_v50  ;;  %v5622_v39 = vpop.eup %5621 }
 0x4f5   : > { %3568 = vmatprep.mubr.bf16.mxu0 %v5785_v63  ;;  %5436 = vpush %v5622_v39 }
 0x4f7   : > { %4976 = vmatmul.mubr.msk.bf16.gmra.mrb[20].mxu1 %vm3427_vm12, %v3376_v19 }
 0x4f8   : > { %3648 = vmatprep.mubr.bf16.mxu1 %v5785_v63 }
 0x4fc   : > { %4969 = vmatmul.mubr.msk.bf16.gmra.mrb[24].mxu0 %vm3427_vm12, %v3369_v17 }
 0x4fd   : > { %3578 = vmatprep.mubr.bf16.mxu0 %v5785_v63 }
 0x4ff   : > { %4977 = vmatmul.mubr.msk.bf16.gmra.mrb[24].mxu1 %vm3427_vm12, %v3377_v45 }
 0x500   : > { %3658 = vmatprep.mubr.bf16.mxu1 %v5785_v63 }
 0x504   : > { %4970 = vmatmul.mubr.msk.bf16.gmra.mrb[28].mxu0 %vm3427_vm12, %v3370_v36 }
 0x507   : > { %4978 = vmatmul.mubr.msk.bf16.gmra.mrb[28].mxu1 %vm3427_vm12, %v3378_v21 }
 0x526   : > { %s5437_s9 = spop %5436 }
 0x527   : > { %s4035_s21 = smul.f32 256.0, %s5437_s9 }
 0x528   : > { %s4089_s22 = smul.f32 %s5437_s9, %s4085_s12 }
 0x59f   : > { %v8281_v42 = vpop.f32.mrb[0].mxu0 }
 0x5a0   : > { %3674 = vst [vmem:[%s8283_s30] sm:$0xff] %v8281_v42  ;;  %v8287_v63 = vpop.f32.mrb[1].mxu0 }
 0x5a1   : > { %3675 = vst [vmem:[%s8283_s30 + $0x8] sm:$0xff] %v8287_v63  ;;  %v8291_v37 = vpop.f32.mrb[2].mxu0 }
 0x5a2   : > { %3676 = vst [vmem:[%s8283_s30 + $0x10] sm:$0xff] %v8291_v37  ;;  %v3738_v10 = vadd.f32 %v8291_v37, %v8281_v42  ;;  %v8297_v12 = vpop.f32.mrb[3].mxu0  ;;  %v8305_v47 = vpop.f32.mrb[0].mxu1 }
 0x5a3   : > { %3677 = vst [vmem:[%s8283_s30 + $0x18] sm:$0xff] %v8297_v12  ;;  %v3775_v35 = vadd.f32 %v8297_v12, %v8287_v63  ;;  %3706 = vst [vmem:[%s8283_s30 + $0x100] sm:$0xff] %v8305_v47  ;;  %v8314_v40 = vpop.f32.mrb[1].mxu1 }
 0x5a4   : > { %9696 = vst [vmem:[#allocation23_spill] sm:$0xff] %v8314_v40  ;;  %3707 = vst [vmem:[%s8283_s30 + $0x108] sm:$0xff] %v8314_v40  ;;  %v8323_v14 = vpop.f32.mrb[2].mxu1 }
 0x5a5   : > { %3708 = vst [vmem:[%s8283_s30 + $0x110] sm:$0xff] %v8323_v14  ;;  %v8332_v21 = vpop.f32.mrb[3].mxu1 }
 0x5a6   : > { %9697 = vst [vmem:[#allocation24_spill] sm:$0xff] %v8332_v21  ;;  %3709 = vst [vmem:[%s8283_s30 + $0x118] sm:$0xff] %v8332_v21 }
 0x5a7   : > { %v8303_v2 = vpop.f32.mrb[4].mxu0 }
 0x5a8   : > { %3678 = vst [vmem:[%s8283_s30 + $0x20] sm:$0xff] %v8303_v2  ;;  %v3739_v51 = vadd.f32 %v3738_v10, %v8303_v2  ;;  %v8310_v34 = vpop.f32.mrb[5].mxu0 }
 0x5a9   : > { %3679 = vst [vmem:[%s8283_s30 + $0x28] sm:$0xff] %v8310_v34  ;;  %v3776_v27 = vadd.f32 %v3775_v35, %v8310_v34  ;;  %v8319_v33 = vpop.f32.mrb[6].mxu0 }
 0x5aa   : > { %3680 = vst [vmem:[%s8283_s30 + $0x30] sm:$0xff] %v8319_v33  ;;  %v3740_v28 = vadd.f32 %v3739_v51, %v8319_v33  ;;  %v8328_v24 = vpop.f32.mrb[7].mxu0  ;;  %v8341_v58 = vpop.f32.mrb[4].mxu1 }
 0x5ab   : > { %3681 = vst [vmem:[%s8283_s30 + $0x38] sm:$0xff] %v8328_v24  ;;  %v3777_v9 = vadd.f32 %v3776_v27, %v8328_v24  ;;  %3710 = vst [vmem:[%s8283_s30 + $0x120] sm:$0xff] %v8341_v58  ;;  %v8350_v53 = vpop.f32.mrb[5].mxu1 }
 0x5ac   : > { %9698 = vst [vmem:[#allocation25_spill] sm:$0xff] %v8350_v53  ;;  %3711 = vst [vmem:[%s8283_s30 + $0x128] sm:$0xff] %v8350_v53  ;;  %v8359_v32 = vpop.f32.mrb[6].mxu1 }
 0x5ad   : > { %3712 = vst [vmem:[%s8283_s30 + $0x130] sm:$0xff] %v8359_v32  ;;  %v8368_v30 = vpop.f32.mrb[7].mxu1 }
 0x5ae   : > { %9699 = vst [vmem:[#allocation26_spill] sm:$0xff] %v8368_v30  ;;  %3713 = vst [vmem:[%s8283_s30 + $0x138] sm:$0xff] %v8368_v30 }
 0x5af   : > { %v8339_v46 = vpop.f32.mrb[8].mxu0 }
 0x5b0   : > { %3682 = vst [vmem:[%s8283_s30 + $0x40] sm:$0xff] %v8339_v46  ;;  %v3741_v56 = vadd.f32 %v3740_v28, %v8339_v46  ;;  %v8346_v6 = vpop.f32.mrb[9].mxu0 }
 0x5b1   : > { %3683 = vst [vmem:[%s8283_s30 + $0x48] sm:$0xff] %v8346_v6  ;;  %v3778_v8 = vadd.f32 %v3777_v9, %v8346_v6  ;;  %v8355_v48 = vpop.f32.mrb[10].mxu0 }
 0x5b2   : > { %3684 = vst [vmem:[%s8283_s30 + $0x50] sm:$0xff] %v8355_v48  ;;  %v3742_v23 = vadd.f32 %v3741_v56, %v8355_v48  ;;  %v8364_v26 = vpop.f32.mrb[11].mxu0  ;;  %v8377_v62 = vpop.f32.mrb[8].mxu1 }
 0x5b3   : > { %3685 = vst [vmem:[%s8283_s30 + $0x58] sm:$0xff] %v8364_v26  ;;  %v3779_v50 = vadd.f32 %v3778_v8, %v8364_v26  ;;  %3714 = vst [vmem:[%s8283_s30 + $0x140] sm:$0xff] %v8377_v62  ;;  %v8386_v61 = vpop.f32.mrb[9].mxu1 }
 0x5b4   : > { %3715 = vst [vmem:[%s8283_s30 + $0x148] sm:$0xff] %v8386_v61  ;;  %v8395_v4 = vpop.f32.mrb[10].mxu1 }
 0x5b5   : > { %3716 = vst [vmem:[%s8283_s30 + $0x150] sm:$0xff] %v8395_v4  ;;  %v8404_v22 = vpop.f32.mrb[11].mxu1 }
 0x5b6   : > { %3717 = vst [vmem:[%s8283_s30 + $0x158] sm:$0xff] %v8404_v22 }
 0x5b7   : > { %v8375_v55 = vpop.f32.mrb[12].mxu0 }
 0x5b8   : > { %3686 = vst [vmem:[%s8283_s30 + $0x60] sm:$0xff] %v8375_v55  ;;  %v3743_v59 = vadd.f32 %v3742_v23, %v8375_v55  ;;  %v8382_v18 = vpop.f32.mrb[13].mxu0 }
 0x5b9   : > { %3687 = vst [vmem:[%s8283_s30 + $0x68] sm:$0xff] %v8382_v18  ;;  %v3780_v41 = vadd.f32 %v3779_v50, %v8382_v18  ;;  %v8391_v52 = vpop.f32.mrb[14].mxu0 }
 0x5ba   : > { %3688 = vst [vmem:[%s8283_s30 + $0x70] sm:$0xff] %v8391_v52  ;;  %v3744_v16 = vadd.f32 %v3743_v59, %v8391_v52  ;;  %v8400_v29 = vpop.f32.mrb[15].mxu0  ;;  %v8413_v11 = vpop.f32.mrb[12].mxu1 }
 0x5bb   : > { %3689 = vst [vmem:[%s8283_s30 + $0x78] sm:$0xff] %v8400_v29  ;;  %v3781_v31 = vadd.f32 %v3780_v41, %v8400_v29  ;;  %3718 = vst [vmem:[%s8283_s30 + $0x160] sm:$0xff] %v8413_v11  ;;  %v8422_v13 = vpop.f32.mrb[13].mxu1 }
 0x5bc   : > { %3719 = vst [vmem:[%s8283_s30 + $0x168] sm:$0xff] %v8422_v13  ;;  %v8431_v17 = vpop.f32.mrb[14].mxu1 }
 0x5bd   : > { %3720 = vst [vmem:[%s8283_s30 + $0x170] sm:$0xff] %v8431_v17  ;;  %v8440_v3 = vpop.f32.mrb[15].mxu1 }
 0x5be   : > { %9702 = vst [vmem:[#allocation29_spill] sm:$0xff] %v8440_v3  ;;  %3721 = vst [vmem:[%s8283_s30 + $0x178] sm:$0xff] %v8440_v3 }
 0x5bf   : > { %v8411_v57 = vpop.f32.mrb[16].mxu0 }
 0x5c0   : > { %3690 = vst [vmem:[%s8283_s30 + $0x80] sm:$0xff] %v8411_v57  ;;  %v3745_v44 = vadd.f32 %v3744_v16, %v8411_v57  ;;  %v8418_v49 = vpop.f32.mrb[17].mxu0 }
 0x5c1   : > { %9700 = vst [vmem:[#allocation27_spill] sm:$0xff] %v8418_v49  ;;  %3691 = vst [vmem:[%s8283_s30 + $0x88] sm:$0xff] %v8418_v49  ;;  %v3782_v1 = vadd.f32 %v3781_v31, %v8418_v49  ;;  %v8427_v20 = vpop.f32.mrb[18].mxu0 }
 0x5c2   : > { %3692 = vst [vmem:[%s8283_s30 + $0x90] sm:$0xff] %v8427_v20  ;;  %v3746_v19 = vadd.f32 %v3745_v44, %v8427_v20  ;;  %v8436_v0 = vpop.f32.mrb[19].mxu0  ;;  %v8449_v15 = vpop.f32.mrb[16].mxu1 }
 0x5c3   : > { %9701 = vst [vmem:[#allocation28_spill] sm:$0xff] %v8436_v0  ;;  %3693 = vst [vmem:[%s8283_s30 + $0x98] sm:$0xff] %v8436_v0  ;;  %v3783_v38 = vadd.f32 %v3782_v1, %v8436_v0  ;;  %v8458_v45 = vpop.f32.mrb[17].mxu1 }
 0x5c4   : > { %3722 = vst [vmem:[%s8283_s30 + $0x180] sm:$0xff] %v8449_v15  ;;  %9704 = vst [vmem:[#allocation31_spill] sm:$0xff] %v8458_v45  ;;  %v8467_v10 = vpop.f32.mrb[18].mxu1 }
 0x5c5   : > { %3723 = vst [vmem:[%s8283_s30 + $0x188] sm:$0xff] %v8458_v45  ;;  %3724 = vst [vmem:[%s8283_s30 + $0x190] sm:$0xff] %v8467_v10  ;;  %v8476_v27 = vpop.f32.mrb[19].mxu1 }
 0x5c6   : > { %9706 = vst [vmem:[#allocation33_spill] sm:$0xff] %v8476_v27  ;;  %3725 = vst [vmem:[%s8283_s30 + $0x198] sm:$0xff] %v8476_v27 }
 0x5c7   : > { %v8447_v54 = vpop.f32.mrb[20].mxu0 }
 0x5c8   : > { %3694 = vst [vmem:[%s8283_s30 + $0xa0] sm:$0xff] %v8447_v54  ;;  %v3747_v7 = vadd.f32 %v3746_v19, %v8447_v54  ;;  %v8454_v36 = vpop.f32.mrb[21].mxu0 }
 0x5c9   : > { %9703 = vst [vmem:[#allocation30_spill] sm:$0xff] %v8454_v36  ;;  %3695 = vst [vmem:[%s8283_s30 + $0xa8] sm:$0xff] %v8454_v36  ;;  %v3784_v43 = vadd.f32 %v3783_v38, %v8454_v36  ;;  %v8463_v39 = vpop.f32.mrb[22].mxu0 }
 0x5ca   : > { %3696 = vst [vmem:[%s8283_s30 + $0xb0] sm:$0xff] %v8463_v39  ;;  %v3748_v35 = vadd.f32 %v3747_v7, %v8463_v39  ;;  %v8472_v51 = vpop.f32.mrb[23].mxu0  ;;  %v8485_v56 = vpop.f32.mrb[20].mxu1 }
 0x5cb   : > { %9705 = vst [vmem:[#allocation32_spill] sm:$0xff] %v8472_v51  ;;  %3697 = vst [vmem:[%s8283_s30 + $0xb8] sm:$0xff] %v8472_v51  ;;  %v3785_v28 = vadd.f32 %v3784_v43, %v8472_v51  ;;  %v8494_v50 = vpop.f32.mrb[21].mxu1 }
 0x5cc   : > { %3726 = vst [vmem:[%s8283_s30 + $0x1a0] sm:$0xff] %v8485_v56  ;;  %9708 = vst [vmem:[#allocation35_spill] sm:$0xff] %v8494_v50  ;;  %v8503_v16 = vpop.f32.mrb[22].mxu1 }
 0x5cd   : > { %3727 = vst [vmem:[%s8283_s30 + $0x1a8] sm:$0xff] %v8494_v50  ;;  %3728 = vst [vmem:[%s8283_s30 + $0x1b0] sm:$0xff] %v8503_v16  ;;  %v8512_v1 = vpop.f32.mrb[23].mxu1 }
 0x5ce   : > { %9710 = vst [vmem:[#allocation37_spill] sm:$0xff] %v8512_v1  ;;  %3729 = vst [vmem:[%s8283_s30 + $0x1b8] sm:$0xff] %v8512_v1 }
 0x5cf   : > { %v8483_v9 = vpop.f32.mrb[24].mxu0 }
 0x5d0   : > { %3698 = vst [vmem:[%s8283_s30 + $0xc0] sm:$0xff] %v8483_v9  ;;  %v3749_v8 = vadd.f32 %v3748_v35, %v8483_v9  ;;  %v8490_v23 = vpop.f32.mrb[25].mxu0 }
 0x5d1   : > { %9707 = vst [vmem:[#allocation34_spill] sm:$0xff] %v8490_v23  ;;  %3699 = vst [vmem:[%s8283_s30 + $0xc8] sm:$0xff] %v8490_v23  ;;  %v3786_v59 = vadd.f32 %v3785_v28, %v8490_v23  ;;  %v8499_v41 = vpop.f32.mrb[26].mxu0 }
 0x5d2   : > { %3700 = vst [vmem:[%s8283_s30 + $0xd0] sm:$0xff] %v8499_v41  ;;  %v3750_v31 = vadd.f32 %v3749_v8, %v8499_v41  ;;  %v8508_v44 = vpop.f32.mrb[27].mxu0  ;;  %v8521_v7 = vpop.f32.mrb[24].mxu1 }
 0x5d3   : > { %9709 = vst [vmem:[#allocation36_spill] sm:$0xff] %v8508_v44  ;;  %3701 = vst [vmem:[%s8283_s30 + $0xd8] sm:$0xff] %v8508_v44  ;;  %v3787_v19 = vadd.f32 %v3786_v59, %v8508_v44  ;;  %v8530_v28 = vpop.f32.mrb[25].mxu1 }
 0x5d4   : > { %3730 = vst [vmem:[%s8283_s30 + $0x1c0] sm:$0xff] %v8521_v7  ;;  %9712 = vst [vmem:[#allocation39_spill] sm:$0xff] %v8530_v28  ;;  %v8539_v60 = vpop.f32.mrb[26].mxu1 }
 0x5d5   : > { %3731 = vst [vmem:[%s8283_s30 + $0x1c8] sm:$0xff] %v8530_v28  ;;  %3732 = vst [vmem:[%s8283_s30 + $0x1d0] sm:$0xff] %v8539_v60  ;;  %v8548_v25 = vpop.f32.mrb[27].mxu1 }
 0x5d6   : > { %3733 = vst [vmem:[%s8283_s30 + $0x1d8] sm:$0xff] %v8548_v25 }
 0x5d7   : > { %v8519_v38 = vpop.f32.mrb[28].mxu0 }
 0x5d8   : > { %3702 = vst [vmem:[%s8283_s30 + $0xe0] sm:$0xff] %v8519_v38  ;;  %v3751_v43 = vadd.f32 %v3750_v31, %v8519_v38  ;;  %v8526_v35 = vpop.f32.mrb[29].mxu0 }
 0x5d9   : > { %9711 = vst [vmem:[#allocation38_spill] sm:$0xff] %v8526_v35  ;;  %3703 = vst [vmem:[%s8283_s30 + $0xe8] sm:$0xff] %v8526_v35  ;;  %v3788_v8 = vadd.f32 %v3787_v19, %v8526_v35  ;;  %v8535_v59 = vpop.f32.mrb[30].mxu0 }
 0x5da   : > { %3704 = vst [vmem:[%s8283_s30 + $0xf0] sm:$0xff] %v8535_v59  ;;  %v3752_v31 = vadd.f32 %v3751_v43, %v8535_v59  ;;  %v8544_v5 = vpop.f32.mrb[31].mxu0  ;;  %v8559_v51 = vpop.f32.mrb[28].mxu1 }
 0x5db   : > { %9713 = vst [vmem:[#allocation40_spill] sm:$0xff] %v8544_v5  ;;  %3705 = vst [vmem:[%s8283_s30 + $0xf8] sm:$0xff] %v8544_v5  ;;  %v3789_v19 = vadd.f32 %v3788_v8, %v8544_v5  ;;  %v8564_v0 = vpop.f32.mrb[29].mxu1 }
 0x5dc   : > { %v3753_v35 = vadd.f32 %v3752_v31, %v8305_v47  ;;  %3734 = vst [vmem:[%s8283_s30 + $0x1e0] sm:$0xff] %v8559_v51  ;;  %3735 = vst [vmem:[%s8283_s30 + $0x1e8] sm:$0xff] %v8564_v0  ;;  %v8569_v5 = vpop.f32.mrb[30].mxu1 }
 0x5dd   : > { %v3790_v44 = vadd.f32 %v3789_v19, %v8314_v40  ;;  %3736 = vst [vmem:[%s8283_s30 + $0x1f0] sm:$0xff] %v8569_v5 }
 0x5de   : > { %v3754_v43 = vadd.f32 %v3753_v35, %v8323_v14  ;;  %v8574_v35 = vpop.f32.mrb[31].mxu1 }
 0x5df   : > { %v3791_v23 = vadd.f32 %v3790_v44, %v8332_v21  ;;  %3737 = vst [vmem:[%s8283_s30 + $0x1f8] sm:$0xff] %v8574_v35 }
 0x5e0   : > { %v3755_v36 = vadd.f32 %v3754_v43, %v8341_v58 }
 0x5e1   : > { %v3792_v8 = vadd.f32 %v3791_v23, %v8350_v53 }
 0x5e2   : > { %v3756_v31 = vadd.f32 %v3755_v36, %v8359_v32 }
 0x5e3   : > { %v3793_v44 = vadd.f32 %v3792_v8, %v8368_v30 }
 0x5e4   : > { %v3757_v19 = vadd.f32 %v3756_v31, %v8377_v62 }
 0x5e5   : > { %v3794_v43 = vadd.f32 %v3793_v44, %v8386_v61 }
 0x5e6   : > { %v3758_v23 = vadd.f32 %v3757_v19, %v8395_v4 }
 0x5e7   : > { %v3795_v53 = vadd.f32 %v3794_v43, %v8404_v22 }
 0x5e8   : > { %v3759_v21 = vadd.f32 %v3758_v23, %v8413_v11 }
 0x5e9   : > { %v3796_v36 = vadd.f32 %v3795_v53, %v8422_v13 }
 0x5ea   : > { %v3760_v40 = vadd.f32 %v3759_v21, %v8431_v17 }
 0x5eb   : > { %v3797_v49 = vadd.f32 %v3796_v36, %v8440_v3 }
 0x5ec   : > { %v3761_v8 = vadd.f32 %v3760_v40, %v8449_v15 }
 0x5ed   : > { %v3798_v30 = vadd.f32 %v3797_v49, %v8458_v45 }
 0x5ee   : > { %v3762_v31 = vadd.f32 %v3761_v8, %v8467_v10 }
 0x5ef   : > { %v3799_v44 = vadd.f32 %v3798_v30, %v8476_v27 }
 0x5f0   : > { %v3763_v19 = vadd.f32 %v3762_v31, %v8485_v56 }
 0x5f1   : > { %v3800_v43 = vadd.f32 %v3799_v44, %v8494_v50 }
 0x5f2   : > { %v3764_v23 = vadd.f32 %v3763_v19, %v8503_v16 }
 0x5f3   : > { %v3801_v53 = vadd.f32 %v3800_v43, %v8512_v1 }
 0x5f4   : > { %v3765_v21 = vadd.f32 %v3764_v23, %v8521_v7 }
 0x5f5   : > { %v3802_v36 = vadd.f32 %v3801_v53, %v8530_v28 }
 0x5f6   : > { %v3766_v40 = vadd.f32 %v3765_v21, %v8539_v60 }
 0x5f7   : > { %v3803_v49 = vadd.f32 %v3802_v36, %v8548_v25 }
 0x5f8   : > { %v3767_v8 = vadd.f32 %v3766_v40, %v8559_v51 }
 0x5f9   : > { %v3804_v30 = vadd.f32 %v3803_v49, %v8564_v0 }
 0x5fa   : > { %v3768_v31 = vadd.f32 %v3767_v8, %v8569_v5 }
 0x5fb   : > { %v3805_v44 = vadd.f32 %v3804_v30, %v8574_v35 }
 0x5fc   : > { %v3769_v50 = vrot.slane %v3768_v31, 4 }
 0x5fd   : > { %v3806_v19 = vrot.slane %v3805_v44, 4 }
 0x5fe   : > { %v3770_v27 = vadd.f32 %v3769_v50, %v3768_v31 }
 0x5ff   : > { %v3807_v43 = vadd.f32 %v3806_v19, %v3805_v44 }
 0x600   : > { %v3771_v1 = vrot.slane %v3770_v27, 2 }
 0x601   : > { %v3808_v23 = vrot.slane %v3807_v43, 2 }
 0x602   : > { %v3772_v45 = vadd.f32 %v3771_v1, %v3770_v27 }
 0x603   : > { %v3809_v28 = vadd.f32 %v3808_v23, %v3807_v43 }
 0x604   : > { %v3773_v53 = vrot.slane %v3772_v45, 1 }
 0x605   : > { %v3810_v36 = vrot.slane %v3809_v28, 1 }
 0x606   : > { %v3774_v21 = vadd.f32 %v3773_v53, %v3772_v45 }
 0x608   : > { %v8603_v3 = vmul.f32 0.00390625, %v3774_v21 }
 0x60a   : > { %v3814_v40 = vsub.f32 %v8281_v42, %v8603_v3  ;;  %v3816_v49 = vsub.f32 %v8291_v37, %v8603_v3  ;;  %v3818_v8 = vsub.f32 %v8303_v2, %v8603_v3  ;;  %v3820_v50 = vsub.f32 %v8319_v33, %v8603_v3 }
 0x60b   : > { %v3822_v27 = vsub.f32 %v8339_v46, %v8603_v3  ;;  %v3824_v45 = vsub.f32 %v8355_v48, %v8603_v3  ;;  %v3826_v1 = vsub.f32 %v8375_v55, %v8603_v3  ;;  %v8621_v42 = vsub.f32 %v8391_v52, %v8603_v3 }
 0x60c   : > { %v8625_v37 = vsub.f32 %v8411_v57, %v8603_v3  ;;  %v8629_v2 = vsub.f32 %v8427_v20, %v8603_v3  ;;  %v8633_v33 = vsub.f32 %v8447_v54, %v8603_v3  ;;  %v8637_v46 = vsub.f32 %v8463_v39, %v8603_v3 }
 0x60d   : > { %v8641_v48 = vsub.f32 %v8483_v9, %v8603_v3  ;;  %v8645_v55 = vsub.f32 %v8499_v41, %v8603_v3  ;;  %v8649_v52 = vsub.f32 %v8519_v38, %v8603_v3  ;;  %v8653_v57 = vsub.f32 %v8535_v59, %v8603_v3 }
 0x60e   : > { %v8657_v20 = vsub.f32 %v8305_v47, %v8603_v3  ;;  %v8661_v54 = vsub.f32 %v8323_v14, %v8603_v3  ;;  %v8665_v39 = vsub.f32 %v8341_v58, %v8603_v3  ;;  %v8669_v9 = vsub.f32 %v8359_v32, %v8603_v3 }
 0x60f   : > { %v8673_v41 = vsub.f32 %v8377_v62, %v8603_v3  ;;  %v8677_v47 = vsub.f32 %v8395_v4, %v8603_v3  ;;  %v8681_v14 = vsub.f32 %v8413_v11, %v8603_v3  ;;  %v8685_v58 = vsub.f32 %v8431_v17, %v8603_v3 }
 0x610   : > { %v8689_v32 = vsub.f32 %v8449_v15, %v8603_v3  ;;  %v8693_v62 = vsub.f32 %v8467_v10, %v8603_v3  ;;  %v8697_v4 = vsub.f32 %v8485_v56, %v8603_v3  ;;  %v8701_v11 = vsub.f32 %v8503_v16, %v8603_v3 }
 0x611   : > { %v8705_v17 = vsub.f32 %v8521_v7, %v8603_v3  ;;  %v8709_v15 = vsub.f32 %v8539_v60, %v8603_v3  ;;  %v8713_v10 = vsub.f32 %v8559_v51, %v8603_v3  ;;  %v8717_v56 = vsub.f32 %v8569_v5, %v8603_v3 }
 0x612   : > { %v3811_v38 = vadd.f32 %v3810_v36, %v3809_v28  ;;  %v3878_v59 = vmul.f32 %v3814_v40, %v3814_v40  ;;  %v3880_v16 = vmul.f32 %v3816_v49, %v3816_v49  ;;  %v3882_v31 = vmul.f32 %v3818_v8, %v3818_v8 }
 0x613   : > { %9714 = vst [vmem:[#allocation41_spill] sm:$0xff] %v8713_v10  ;;  %9715 = vst [vmem:[#allocation42_spill] sm:$0xff] %v8717_v56  ;;  %v3884_v7 = vmul.f32 %v3820_v50, %v3820_v50  ;;  %v3886_v44 = vmul.f32 %v3822_v27, %v3822_v27  ;;  %v3888_v19 = vmul.f32 %v3824_v45, %v3824_v45  ;;  %v9720_v50 = vld [vmem:[#allocation34_spill] sm:$0xff]  ;;  %v9721_v27 = vld [vmem:[#allocation36_spill] sm:$0xff] }
 0x614   : > { %v8719_v30 = vmul.f32 0.00390625, %v3811_v38  ;;  %v3890_v43 = vmul.f32 %v3826_v1, %v3826_v1  ;;  %v3942_v60 = vadd.f32 %v3880_v16, %v3878_v59  ;;  %v9722_v38 = vld [vmem:[#allocation38_spill] sm:$0xff]  ;;  %v9723_v16 = vld [vmem:[#allocation40_spill] sm:$0xff] }
 0x616   : > { %v3815_v23 = vsub.f32 %v8287_v63, %v8719_v30  ;;  %v3817_v51 = vsub.f32 %v8297_v12, %v8719_v30  ;;  %v3819_v5 = vsub.f32 %v8310_v34, %v8719_v30  ;;  %v3821_v28 = vsub.f32 %v8328_v24, %v8719_v30  ;;  %v9716_v34 = vld [vmem:[#allocation27_spill] sm:$0xff] }
 0x617   : > { %v8731_v53 = vsub.f32 %v8346_v6, %v8719_v30  ;;  %v8735_v21 = vsub.f32 %v8364_v26, %v8719_v30  ;;  %v8739_v63 = vsub.f32 %v8382_v18, %v8719_v30  ;;  %v3943_v36 = vadd.f32 %v3942_v60, %v3882_v31  ;;  %v9717_v6 = vld [vmem:[#allocation28_spill] sm:$0xff]  ;;  %v9718_v26 = vld [vmem:[#allocation30_spill] sm:$0xff]  ;;  %v9724_v60 = vld [vmem:[#allocation23_spill] sm:$0xff] }
 0x618   : > { %v8743_v12 = vsub.f32 %v8400_v29, %v8719_v30  ;;  %v8747_v24 = vsub.f32 %v9716_v34, %v8719_v30  ;;  %v8751_v40 = vsub.f32 %v9717_v6, %v8719_v30  ;;  %v8755_v49 = vsub.f32 %v9718_v26, %v8719_v30  ;;  %v9719_v18 = vld [vmem:[#allocation32_spill] sm:$0xff] }
 0x619   : > { %v8759_v8 = vsub.f32 %v9719_v18, %v8719_v30  ;;  %v8763_v29 = vsub.f32 %v9720_v50, %v8719_v30  ;;  %v8767_v45 = vsub.f32 %v9721_v27, %v8719_v30  ;;  %v3944_v1 = vadd.f32 %v3943_v36, %v3884_v7  ;;  %v9725_v6 = vld [vmem:[#allocation24_spill] sm:$0xff]  ;;  %v9726_v18 = vld [vmem:[#allocation25_spill] sm:$0xff]  ;;  %v9727_v7 = vld [vmem:[#allocation26_spill] sm:$0xff] }
 0x61a   : > { %v8771_v59 = vsub.f32 %v9722_v38, %v8719_v30  ;;  %v8775_v31 = vsub.f32 %v9723_v16, %v8719_v30  ;;  %v8779_v34 = vsub.f32 %v9724_v60, %v8719_v30  ;;  %v8783_v26 = vsub.f32 %v9725_v6, %v8719_v30  ;;  %v9731_v6 = vld [vmem:[#allocation29_spill] sm:$0xff] }
 0x61b   : > { %v8787_v50 = vsub.f32 %v9726_v18, %v8719_v30  ;;  %v8791_v36 = vsub.f32 %v9727_v7, %v8719_v30  ;;  %v8795_v27 = vsub.f32 %v8386_v61, %v8719_v30  ;;  %v3945_v38 = vadd.f32 %v3944_v1, %v3886_v44  ;;  %v9733_v7 = vld [vmem:[#allocation31_spill] sm:$0xff]  ;;  %v9735_v61 = vld [vmem:[#allocation33_spill] sm:$0xff] }
 0x61c   : > { %v8799_v16 = vsub.f32 %v8404_v22, %v8719_v30  ;;  %v8803_v60 = vsub.f32 %v8422_v13, %v8719_v30  ;;  %v8807_v18 = vsub.f32 %v9731_v6, %v8719_v30  ;;  %v8811_v56 = vsub.f32 %v9733_v7, %v8719_v30  ;;  %v9737_v22 = vld [vmem:[#allocation35_spill] sm:$0xff]  ;;  %v9739_v13 = vld [vmem:[#allocation37_spill] sm:$0xff] }
 0x61d   : > { %9728 = vst [vmem:[#allocation27_spill] sm:$0xff] %v8795_v27  ;;  %v8815_v44 = vsub.f32 %v9735_v61, %v8719_v30  ;;  %v8819_v1 = vsub.f32 %v9737_v22, %v8719_v30  ;;  %v9741_v6 = vld [vmem:[#allocation39_spill] sm:$0xff]  ;;  %v8831_v7 = vsub.f32 %v8548_v25, %v8719_v30  ;;  %v8835_v61 = vsub.f32 %v8564_v0, %v8719_v30 }
 0x61e   : > { %9729 = vst [vmem:[#allocation28_spill] sm:$0xff] %v8799_v16  ;;  %9730 = vst [vmem:[#allocation30_spill] sm:$0xff] %v8803_v60  ;;  %v8823_v60 = vsub.f32 %v9739_v13, %v8719_v30  ;;  %v3946_v16 = vadd.f32 %v3945_v38, %v3888_v19  ;;  %v8839_v22 = vsub.f32 %v8574_v35, %v8719_v30  ;;  %v4018_v38 = vld [vmem:[#allocation9] sm:$0x3]  ;;  %v5786_v0 = vmov 1966171168  }
 0x61f   : > { %9732 = vst [vmem:[#allocation32_spill] sm:$0xff] %v8807_v18  ;;  %9734 = vst [vmem:[#allocation34_spill] sm:$0xff] %v8811_v56  ;;  %v8827_v18 = vsub.f32 %v9741_v6, %v8719_v30  ;;  %v3892_v13 = vmul.f32 %v8621_v42, %v8621_v42  ;;  %v9746_v6 = vld [vmem:[#allocation22_spill] sm:$0xff]  ;;  %v3894_v25 = vmul.f32 %v8625_v37, %v8625_v37 }
 0x620   : > { %9736 = vst [vmem:[#allocation36_spill] sm:$0xff] %v8815_v44  ;;  %9738 = vst [vmem:[#allocation38_spill] sm:$0xff] %v8819_v1  ;;  %v3947_v19 = vadd.f32 %v3946_v16, %v3890_v43  ;;  %v3896_v42 = vmul.f32 %v8629_v2, %v8629_v2  ;;  %v3879_v16 = vmul.f32 %v3815_v23, %v3815_v23 }
 0x621   : > { %9740 = vst [vmem:[#allocation40_spill] sm:$0xff] %v8823_v60  ;;  %9742 = vst [vmem:[#allocation23_spill] sm:$0xff] %v8827_v18  ;;  %v4026_v18 = vsub.s32 1, %v9746_v6  ;;  %v9747_v60 = vsub.s32 0, %v9746_v6  ;;  %v3898_v44 = vmul.f32 %v8633_v33, %v8633_v33  ;;  %v3900_v37 = vmul.f32 %v8637_v46, %v8637_v46 }
 0x622   : > { %9743 = vst [vmem:[#allocation24_spill] sm:$0xff] %v8831_v7  ;;  %9744 = vst [vmem:[#allocation25_spill] sm:$0xff] %v8835_v61  ;;  %v3948_v7 = vadd.f32 %v3947_v19, %v3892_v13  ;;  %v4043_v61 = vunpack.c.l.s4 %v5786_v0  ;;  %v4036_v19 = vstv %s4035_s21  ;;  %v3902_v2 = vmul.f32 %v8641_v48, %v8641_v48 }
 0x623   : > { %9745 = vst [vmem:[#allocation26_spill] sm:$0xff] %v8839_v22  ;;  %v4023_v35 = vrot.slane %v4018_v38, %v9747_v60  ;;  %v3881_v22 = vmul.f32 %v3817_v51, %v3817_v51  ;;  %v4027_v1 = vrot.slane %v4018_v38, %v4026_v18  ;;  %v3883_v60 = vmul.f32 %v3819_v5, %v3819_v5 }
 0x624   : > { %v3949_v43 = vadd.f32 %v3948_v7, %v3894_v25  ;;  %v4044_v13 = vunpack.c.0.s8 %v4043_v61  ;;  %v3885_v23 = vmul.f32 %v3821_v28, %v3821_v28  ;;  %v4090_v18 = vstv %s4089_s22 }
 0x625   : > { %v3979_v10 = vadd.f32 %v3881_v22, %v3879_v16  ;;  %v4030_v27 = vsub.f32 %v8603_v3, %v4023_v35  ;;  %v4031_v51 = vsub.f32 %v8719_v30, %v4027_v1  ;;  %v3904_v46 = vmul.f32 %v8645_v55, %v8645_v55 }
 0x626   : > { %v3950_v56 = vadd.f32 %v3949_v43, %v3896_v42  ;;  %v3887_v48 = vmul.f32 %v8731_v53, %v8731_v53  ;;  %v3889_v55 = vmul.f32 %v8735_v21, %v8735_v21  ;;  %v3908_v53 = vmul.f32 %v8653_v57, %v8653_v57 }
 0x627   : > { %v3980_v33 = vadd.f32 %v3979_v10, %v3883_v60  ;;  %v4037_v25 = vmul.f32 %v4036_v19, %v4030_v27  ;;  %v4083_v42 = vmul.f32 %v4030_v27, %v4030_v27  ;;  %v4038_v5 = vmul.f32 %v4036_v19, %v4031_v51 }
 0x628   : > { %v3951_v0 = vadd.f32 %v3950_v56, %v3898_v44  ;;  %v8863_v56 = vsub.s32 %v4044_v13, %v9746_v6  ;;  %v4084_v44 = vmul.f32 %v4031_v51, %v4031_v51  ;;  %v3906_v10 = vmul.f32 %v8649_v52, %v8649_v52 }
 0x629   : > { %v3981_v28 = vadd.f32 %v3980_v33, %v3885_v23  ;;  %v8867_v61 = vmul.f32 %v4090_v18, %v4083_v42  ;;  %v4041_v30 = vcombine.low %v4037_v25, %v4038_v5  ;;  %v3891_v16 = vmul.f32 %v8739_v63, %v8739_v63 }
 0x62a   : > { %v3952_v7 = vadd.f32 %v3951_v0, %v3900_v37  ;;  %v8869_v1 = vmul.f32 %v4090_v18, %v4084_v44  ;;  %v9748_v13 = vlaneseq  ;;  %v3910_v21 = vmul.f32 %v8657_v20, %v8657_v20 }
 0x62b   : > { %v3982_v22 = vadd.f32 %v3981_v28, %v3887_v48  ;;  %v4048_v6 = vrot.slane %v4041_v30, %v8863_v56  ;;  %v3893_v60 = vmul.f32 %v8743_v12, %v8743_v12  ;;  %v3912_v63 = vmul.f32 %v8661_v54, %v8661_v54 }
 0x62c   : > { %v3953_v3 = vadd.f32 %v3952_v7, %v3902_v2  ;;  %v4095_v35 = vcombine.low %v8867_v61, %v8869_v1  ;;  %vm8884_vm13 = vcmp.lt.s32.totalorder %v9748_v13, 256  ;;  %v3895_v51 = vmul.f32 %v8747_v24, %v8747_v24 }
 0x62d   : > { %v3983_v37 = vadd.f32 %v3982_v22, %v3889_v55  ;;  %v4055_v52 = vrot.slane %v4048_v6, %v8863_v56  ;;  %v3914_v20 = vmul.f32 %v8665_v39, %v8665_v39  ;;  %v3897_v12 = vmul.f32 %v8751_v40, %v8751_v40 }
 0x62e   : > { %v3954_v27 = vadd.f32 %v3953_v3, %v3904_v46  ;;  %v3899_v25 = vmul.f32 %v8755_v49, %v8755_v49  ;;  %v3918_v42 = vmul.f32 %v8673_v41, %v8673_v41  ;;  %v3901_v39 = vmul.f32 %v8759_v8, %v8759_v8 }
 0x62f   : > { %v3984_v57 = vadd.f32 %v3983_v37, %v3891_v16  ;;  %v4057_v2 = vadd.f32 %v4055_v52, %v4018_v38  ;;  %v3916_v38 = vmul.f32 %v8669_v9, %v8669_v9  ;;  %v3920_v40 = vmul.f32 %v8677_v47, %v8677_v47 }
 0x630   : > { %v3955_v43 = vadd.f32 %v3954_v27, %v3906_v10  ;;  %v3903_v9 = vmul.f32 %v8763_v29, %v8763_v29  ;;  %v3922_v49 = vmul.f32 %v8681_v14, %v8681_v14  ;;  %v3905_v41 = vmul.f32 %v8767_v45, %v8767_v45 }
 0x631   : > { %v3985_v18 = vadd.f32 %v3984_v57, %v3893_v60  ;;  %4062 = vst.msk [vmem:[#allocation9] sm:$0x3] %vm8884_vm13, %v4057_v2  ;;  %v3924_v8 = vmul.f32 %v8685_v58, %v8685_v58  ;;  %v3907_v47 = vmul.f32 %v8771_v59, %v8771_v59  ;;  %v3926_v29 = vmul.f32 %v8689_v32, %v8689_v32  ;;  %v9752_v57 = vld [vmem:[#allocation41_spill] sm:$0xff] }
 0x632   : > { %v3956_v0 = vadd.f32 %v3955_v43, %v3908_v53  ;;  %v3909_v14 = vmul.f32 %v8775_v31, %v8775_v31  ;;  %v3928_v45 = vmul.f32 %v8693_v62, %v8693_v62  ;;  %v3911_v58 = vmul.f32 %v8779_v34, %v8779_v34 }
 0x633   : > { %v3986_v33 = vadd.f32 %v3985_v18, %v3895_v51  ;;  %v3930_v59 = vmul.f32 %v8697_v4, %v8697_v4  ;;  %v3913_v32 = vmul.f32 %v8783_v26, %v8783_v26  ;;  %v3932_v31 = vmul.f32 %v8701_v11, %v8701_v11  ;;  %v9754_v51 = vld [vmem:[#allocation42_spill] sm:$0xff] }
 0x634   : > { %v3957_v23 = vadd.f32 %v3956_v0, %v3910_v21  ;;  %v3915_v62 = vmul.f32 %v8787_v50, %v8787_v50  ;;  %v3934_v34 = vmul.f32 %v8705_v17, %v8705_v17  ;;  %v3917_v4 = vmul.f32 %v8791_v36, %v8791_v36  ;;  %v9751_v0 = vld [vmem:[#allocation27_spill] sm:$0xff] }
 0x635   : > { %v3987_v24 = vadd.f32 %v3986_v33, %v3897_v12  ;;  %v3936_v26 = vmul.f32 %v8709_v15, %v8709_v15  ;;  %v3919_v11 = vmul.f32 %v9751_v0, %v9751_v0  ;;  %v3938_v50 = vmul.f32 %v9752_v57, %v9752_v57  ;;  %v9756_v33 = vld [vmem:[#allocation32_spill] sm:$0xff]  ;;  %v4063_v0 = vld [vmem:[#allocation10] sm:$0x3] }
 0x636   : > { %v3958_v7 = vadd.f32 %v3957_v23, %v3912_v63  ;;  %v9753_v63 = vld [vmem:[#allocation28_spill] sm:$0xff]  ;;  %v3940_v36 = vmul.f32 %v9754_v51, %v9754_v51 }
 0x637   : > { %v3988_v5 = vadd.f32 %v3987_v24, %v3899_v25  ;;  %v3921_v17 = vmul.f32 %v9753_v63, %v9753_v63  ;;  %v9757_v25 = vld [vmem:[#allocation34_spill] sm:$0xff] }
 0x638   : > { %v3959_v54 = vadd.f32 %v3958_v7, %v3914_v20  ;;  %v9755_v20 = vld [vmem:[#allocation30_spill] sm:$0xff]  ;;  %v3927_v24 = vmul.f32 %v9757_v25, %v9757_v25 }
 0x639   : > { %v3989_v3 = vadd.f32 %v3988_v5, %v3901_v39  ;;  %v3923_v15 = vmul.f32 %v9755_v20, %v9755_v20 }
 0x63a   : > { %v3960_v46 = vadd.f32 %v3959_v54, %v3916_v38  ;;  %v3925_v38 = vmul.f32 %v9756_v33, %v9756_v33 }
 0x63b   : > { %v3990_v28 = vadd.f32 %v3989_v3, %v3903_v9 }
 0x63c   : > { %v3961_v44 = vadd.f32 %v3960_v46, %v3918_v42  ;;  %v9758_v46 = vld [vmem:[#allocation36_spill] sm:$0xff] }
 0x63d   : > { %v3991_v10 = vadd.f32 %v3990_v28, %v3905_v41  ;;  %v3929_v39 = vmul.f32 %v9758_v46, %v9758_v46  ;;  %v9761_v28 = vld [vmem:[#allocation23_spill] sm:$0xff] }
 0x63e   : > { %v3962_v48 = vadd.f32 %v3961_v44, %v3920_v40  ;;  %v9759_v40 = vld [vmem:[#allocation38_spill] sm:$0xff] }
 0x63f   : > { %v3992_v55 = vadd.f32 %v3991_v10, %v3907_v47  ;;  %v3931_v44 = vmul.f32 %v9759_v40, %v9759_v40  ;;  %v9762_v10 = vld [vmem:[#allocation24_spill] sm:$0xff] }
 0x640   : > { %v3963_v30 = vadd.f32 %v3962_v48, %v3922_v49  ;;  %v9760_v49 = vld [vmem:[#allocation40_spill] sm:$0xff] }
 0x641   : > { %v3993_v6 = vadd.f32 %v3992_v55, %v3909_v14  ;;  %v3933_v48 = vmul.f32 %v9760_v49, %v9760_v49  ;;  %v9763_v14 = vld [vmem:[#allocation25_spill] sm:$0xff] }
 0x642   : > { %v3964_v27 = vadd.f32 %v3963_v30, %v3924_v8  ;;  %v3935_v8 = vmul.f32 %v9761_v28, %v9761_v28  ;;  %v3939_v55 = vmul.f32 %v9763_v14, %v9763_v14 }
 0x643   : > { %v3994_v43 = vadd.f32 %v3993_v6, %v3911_v58  ;;  %v9764_v58 = vld [vmem:[#allocation26_spill] sm:$0xff] }
 0x644   : > { %v3965_v22 = vadd.f32 %v3964_v27, %v3926_v29  ;;  %v3937_v29 = vmul.f32 %v9762_v10, %v9762_v10  ;;  %v3941_v6 = vmul.f32 %v9764_v58, %v9764_v58 }
 0x645   : > { %v3995_v37 = vadd.f32 %v3994_v43, %v3913_v32 }
 0x646   : > { %v3966_v53 = vadd.f32 %v3965_v22, %v3928_v45 }
 0x647   : > { %v3996_v13 = vadd.f32 %v3995_v37, %v3915_v62 }
 0x648   : > { %v3967_v16 = vadd.f32 %v3966_v53, %v3930_v59 }
 0x649   : > { %v3997_v60 = vadd.f32 %v3996_v13, %v3917_v4 }
 0x64a   : > { %v3968_v52 = vadd.f32 %v3967_v16, %v3932_v31 }
 0x64b   : > { %v3998_v23 = vadd.f32 %v3997_v60, %v3919_v11 }
 0x64c   : > { %v3969_v21 = vadd.f32 %v3968_v52, %v3934_v34 }
 0x64d   : > { %v3999_v7 = vadd.f32 %v3998_v23, %v3921_v17 }
 0x64e   : > { %v3970_v2 = vadd.f32 %v3969_v21, %v3936_v26  ;;  %v4102_v21 = vrot.slane %v4095_v35, %v8863_v56 }
 0x64f   : > { %v4000_v54 = vadd.f32 %v3999_v7, %v3923_v15 }
 0x650   : > { %v3971_v18 = vadd.f32 %v3970_v2, %v3938_v50  ;;  %v4109_v57 = vrot.slane %v4102_v21, %v8863_v56 }
 0x651   : > { %v4001_v42 = vadd.f32 %v4000_v54, %v3925_v38 }
 0x652   : > { %v3972_v12 = vadd.f32 %v3971_v18, %v3940_v36 }
 0x653   : > { %v4002_v5 = vadd.f32 %v4001_v42, %v3927_v24 }
 0x654   : > { %v3973_v3 = vrot.slane %v3972_v12, 4 }
 0x655   : > { %v4003_v9 = vadd.f32 %v4002_v5, %v3929_v39 }
 0x656   : > { %v3974_v47 = vadd.f32 %v3973_v3, %v3972_v12 }
 0x657   : > { %v4004_v41 = vadd.f32 %v4003_v9, %v3931_v44 }
 0x658   : > { %v3975_v22 = vrot.slane %v3974_v47, 2 }
 0x659   : > { %v4005_v30 = vadd.f32 %v4004_v41, %v3933_v48 }
 0x65a   : > { %v3976_v32 = vadd.f32 %v3975_v22, %v3974_v47 }
 0x65b   : > { %v4006_v27 = vadd.f32 %v4005_v30, %v3935_v8 }
 0x65c   : > { %v3977_v16 = vrot.slane %v3976_v32, 1 }
 0x65d   : > { %v4007_v45 = vadd.f32 %v4006_v27, %v3937_v29 }
 0x65e   : > { %v3978_v34 = vadd.f32 %v3977_v16, %v3976_v32 }
 0x65f   : > { %v4008_v59 = vadd.f32 %v4007_v45, %v3939_v55 }
 0x661   : > { %v4009_v53 = vadd.f32 %v4008_v59, %v3941_v6 }
 0x663   : > { %v4010_v43 = vrot.slane %v4009_v53, 4 }
 0x665   : > { %v4011_v31 = vadd.f32 %v4010_v43, %v4009_v53 }
 0x667   : > { %v4012_v62 = vrot.slane %v4011_v31, 2 }
 0x669   : > { %v4013_v37 = vadd.f32 %v4012_v62, %v4011_v31 }
 0x66b   : > { %v4014_v52 = vrot.slane %v4013_v37, 1 }
 0x66d   : > { %v4015_v4 = vadd.f32 %v4014_v52, %v4013_v37 }
 0x66f   : > { %v4066_v13 = vcombine.low %v3978_v34, %v4015_v4 }
 0x671   : > { %v4073_v26 = vrot.slane %v4066_v13, %v8863_v56 }
 0x673   : > { %v4080_v11 = vrot.slane %v4073_v26, %v8863_v56 }
 0x675   : > { %v4082_v60 = vadd.f32 %v4080_v11, %v4063_v0 }
 0x677   : > { %v4111_v50 = vadd.f32 %v4109_v57, %v4082_v60 }
 0x679   : > { %4112 = vst.msk [vmem:[#allocation10] sm:$0x3] %vm8884_vm13, %v4111_v50 }
 0x67a PF: > { %p4981_p11 = scmp.ne.s32.totalorder %s5765_s20, 3 }
 0x67b   : > { %s4117_s16 = sshra.s32 (!%p4981_p11), %s6014_s6, 3  ;;  %v4192_v63 = vlaneseq (!%p4981_p11)  ;;  %v4190_v17 = vld [vmem:[#allocation9] sm:$0x3] (!%p4981_p11)  ;;  %s9765_s29 = sld [smem:[#allocation46_spill]] (!%p4981_p11) }
 0x67c   : > { %4116 = sbr.rel (%p4981_p11) target bundleno = 1781 (0x6f5), region = 84  ;;  %s4993_s10 = sshll.u32 (!%p4981_p11), %s4117_s16, 4 }
 0x67d   : > { %v4193_v1 = vshrl.u32 (!%p4981_p11), %v4192_v63, 7  ;;  %s8986_s30 = scalar_lea.vmem (!%p4981_p11), [#allocation4], %s4993_s10  ;;  %s9766_s12 = sld [smem:[#allocation47_spill]] (!%p4981_p11) }
 0x67e   : > { %v4122_v19 = vld [vmem:[%s8986_s30] sm:$0xff] (!%p4981_p11)  ;;  %v4123_v20 = vld [vmem:[%s8986_s30 + $0x8] sm:$0xff] (!%p4981_p11)  ;;  %v4124_v7 = vld [vmem:[%s8986_s30 + $0x10] sm:$0xff] (!%p4981_p11) }
 0x67f   : > { %v4194_v23 = vsub.s32 (!%p4981_p11), 0, %v4193_v1  ;;  %v4198_v51 = vsub.s32 (!%p4981_p11), 1, %v4193_v1  ;;  %v4125_v12 = vld [vmem:[%s8986_s30 + $0x18] sm:$0xff] (!%p4981_p11)  ;;  %v4126_v33 = vld [vmem:[%s8986_s30 + $0x20] sm:$0xff] (!%p4981_p11)  ;;  %v4127_v38 = vld [vmem:[%s8986_s30 + $0x28] sm:$0xff] (!%p4981_p11) }
 0x680   : > { %v4186_v2 = vld [vmem:[#allocation10] sm:$0x3] (!%p4981_p11)  ;;  %v4128_v54 = vld [vmem:[%s8986_s30 + $0x30] sm:$0xff] (!%p4981_p11)  ;;  %v4129_v25 = vld [vmem:[%s8986_s30 + $0x38] sm:$0xff] (!%p4981_p11) }
 0x681   : > { %v4187_v61 = vmul.f32 (!%p4981_p11), 0.001953125, %v4186_v2  ;;  %v4341_v56 = vld [vmem:[%s9765_s29] sm:$0x3] (!%p4981_p11)  ;;  %v8989_v36 = vrot.slane (!%p4981_p11), %v4190_v17, %v4194_v23  ;;  %v8995_v15 = vrot.slane (!%p4981_p11), %v4190_v17, %v4198_v51  ;;  %v9009_v46 = vld [vmem:[%s8986_s30 + $0x48] sm:$0xff] (!%p4981_p11)  ;;  %v9012_v39 = vld [vmem:[%s8986_s30 + $0x50] sm:$0xff] (!%p4981_p11) }
 0x682   : > { %v9003_v24 = vrot.slane (!%p4981_p11), %v4341_v56, %v4194_v23  ;;  %v9006_v42 = vld [vmem:[%s8986_s30 + $0x40] sm:$0xff] (!%p4981_p11)  ;;  %v9017_v44 = vrot.slane (!%p4981_p11), %v4341_v56, %v4198_v51  ;;  %v9022_v3 = vld [vmem:[%s8986_s30 + $0x58] sm:$0xff] (!%p4981_p11)  ;;  %v9028_v48 = vld [vmem:[%s8986_s30 + $0x68] sm:$0xff] (!%p4981_p11) }
 0x683   : > { %v4188_v35 = vadd.f32 1e-05, %v4187_v61  ;;  %v4417_v18 = vld [vmem:[%s9766_s12] sm:$0x3]  ;;  %v4202_v5 = vsub.f32 %v4122_v19, %v8989_v36  ;;  %v4203_v41 = vsub.f32 %v4123_v20, %v8995_v15  ;;  %v4204_v28 = vsub.f32 %v4124_v7, %v8989_v36  ;;  %v9035_v47 = vld [vmem:[%s8986_s30 + $0x70] sm:$0xff]  ;;  %v9038_v10 = vld [vmem:[%s8986_s30 + $0x78] sm:$0xff] }
 0x684   : > { %v9015_v40 = vrot.slane %v4417_v18, %v4194_v23  ;;  %v9019_v9 = vrot.slane %v4417_v18, %v4198_v51  ;;  %v9025_v49 = vld [vmem:[%s8986_s30 + $0x60] sm:$0xff]  ;;  %v4205_v8 = vsub.f32 %v4125_v12, %v8995_v15  ;;  %v4206_v30 = vsub.f32 %v4126_v33, %v8989_v36  ;;  %v9049_v22 = vld [vmem:[%s8986_s30 + $0x88] sm:$0xff]  ;;  %v9052_v58 = vld [vmem:[%s8986_s30 + $0x90] sm:$0xff] }
 0x685   : > { %5623 = vrsqrt.f32 %v4188_v35  ;;  %v9041_v29 = vld [vmem:[%s8986_s30 + $0x80] sm:$0xff]  ;;  %v4207_v27 = vsub.f32 %v4127_v38, %v8995_v15  ;;  %v4208_v14 = vsub.f32 %v4128_v54, %v8989_v36  ;;  %v4209_v55 = vsub.f32 %v4129_v25, %v8995_v15  ;;  %v9063_v43 = vld [vmem:[%s8986_s30 + $0x98] sm:$0xff]  ;;  %v9077_v4 = vld [vmem:[%s8986_s30 + $0xa8] sm:$0xff] }
 0x686   : > { %v4210_v45 = vsub.f32 %v9006_v42, %v8989_v36  ;;  %v4211_v6 = vsub.f32 %v9009_v46, %v8995_v15  ;;  %v4212_v59 = vsub.f32 %v9012_v39, %v8989_v36  ;;  %v4213_v53 = vsub.f32 %v9022_v3, %v8995_v15  ;;  %v9074_v52 = vld [vmem:[%s8986_s30 + $0xa0] sm:$0xff]  ;;  %v9088_v11 = vld [vmem:[%s8986_s30 + $0xb0] sm:$0xff]  ;;  %v4493_v18 = vld [vmem:[%s6006_s11] sm:$0xff] }
 0x687   : > { %v4214_v32 = vsub.f32 %v9025_v49, %v8989_v36  ;;  %v4215_v16 = vsub.f32 %v9028_v48, %v8995_v15  ;;  %v4216_v62 = vsub.f32 %v9035_v47, %v8989_v36  ;;  %v4217_v37 = vsub.f32 %v9038_v10, %v8995_v15  ;;  %v4494_v7 = vld [vmem:[%s6006_s11 + $0x8] sm:$0xff]  ;;  %v4495_v38 = vld [vmem:[%s6006_s11 + $0x10] sm:$0xff]  ;;  %v4496_v54 = vld [vmem:[%s6006_s11 + $0x18] sm:$0xff] }
 0x688   : > { %v4218_v34 = vsub.f32 %v9041_v29, %v8989_v36  ;;  %v4219_v21 = vsub.f32 %v9049_v22, %v8995_v15  ;;  %v4220_v0 = vsub.f32 %v9052_v58, %v8989_v36  ;;  %v4221_v60 = vsub.f32 %v9063_v43, %v8995_v15  ;;  %v4501_v49 = vld [vmem:[%s6006_s11 + $0x40] sm:$0xff]  ;;  %v4502_v48 = vld [vmem:[%s6006_s11 + $0x48] sm:$0xff] }
 0x689   : > { %v4505_v10 = vld [vmem:[%s6006_s11 + $0x60] sm:$0xff]  ;;  %v9767_v29 = vsub.f32 %v9074_v52, %v8989_v36  ;;  %v9768_v58 = vsub.f32 %v9077_v4, %v8995_v15  ;;  %v9769_v43 = vsub.f32 %v9088_v11, %v8989_v36 }
 0x68f   : > { %v5624_v31 = vpop.eup %5623 }
 0x690   : > { %v9079_v13 = vrot.slane %v5624_v31, %v4194_v23  ;;  %v9081_v26 = vrot.slane %v5624_v31, %v4198_v51  ;;  %v4498_v31 = vld [vmem:[%s6006_s11 + $0x28] sm:$0xff] }
 0x692   : > { %v4277_v63 = vmul.f32 %v9079_v13, %v4202_v5  ;;  %v4278_v61 = vmul.f32 %v9081_v26, %v4203_v41  ;;  %v4279_v1 = vmul.f32 %v9079_v13, %v4204_v28  ;;  %v4280_v35 = vmul.f32 %v9081_v26, %v4205_v8  ;;  %v4497_v5 = vld [vmem:[%s6006_s11 + $0x20] sm:$0xff] }
 0x693   : > { %v4281_v17 = vmul.f32 %v9079_v13, %v4206_v30  ;;  %v4282_v23 = vmul.f32 %v9081_v26, %v4207_v27  ;;  %v4283_v51 = vmul.f32 %v9079_v13, %v4208_v14  ;;  %v4284_v56 = vmul.f32 %v9081_v26, %v4209_v55 }
 0x694   : > { %v4353_v19 = vmul.f32 %v9003_v24, %v4277_v63  ;;  %v4354_v20 = vmul.f32 %v9017_v44, %v4278_v61  ;;  %v4355_v12 = vmul.f32 %v9003_v24, %v4279_v1  ;;  %v4356_v33 = vmul.f32 %v9017_v44, %v4280_v35  ;;  %v4499_v63 = vld [vmem:[%s6006_s11 + $0x30] sm:$0xff]  ;;  %v4500_v61 = vld [vmem:[%s6006_s11 + $0x38] sm:$0xff] }
 0x695   : > { %v4357_v25 = vmul.f32 %v9003_v24, %v4281_v17  ;;  %v4358_v41 = vmul.f32 %v9017_v44, %v4282_v23  ;;  %v4359_v28 = vmul.f32 %v9003_v24, %v4283_v51  ;;  %v4360_v8 = vmul.f32 %v9017_v44, %v4284_v56 }
 0x696   : > { %v4429_v30 = vadd.f32 %v9015_v40, %v4353_v19  ;;  %v4430_v27 = vadd.f32 %v9019_v9, %v4354_v20  ;;  %v4431_v14 = vadd.f32 %v9015_v40, %v4355_v12  ;;  %v4432_v55 = vadd.f32 %v9019_v9, %v4356_v33 }
 0x697   : > { %v4433_v1 = vadd.f32 %v9015_v40, %v4357_v25  ;;  %v4434_v35 = vadd.f32 %v9019_v9, %v4358_v41  ;;  %v4435_v17 = vadd.f32 %v9015_v40, %v4359_v28  ;;  %v4436_v23 = vadd.f32 %v9019_v9, %v4360_v8 }
 0x698   : > { %v4557_v51 = vadd.f32 %v4493_v18, %v4429_v30  ;;  %v4558_v56 = vadd.f32 %v4494_v7, %v4430_v27  ;;  %v4559_v19 = vadd.f32 %v4495_v38, %v4431_v14  ;;  %v4560_v20 = vadd.f32 %v4496_v54, %v4432_v55 }
 0x699   : > { %v4561_v12 = vadd.f32 %v4497_v5, %v4433_v1  ;;  %v4562_v33 = vadd.f32 %v4498_v31, %v4434_v35  ;;  %v4563_v2 = vadd.f32 %v4499_v63, %v4435_v17  ;;  %v4564_v50 = vadd.f32 %v4500_v61, %v4436_v23  ;;  %v4506_v31 = vld [vmem:[%s6006_s11 + $0x68] sm:$0xff]  ;;  %v4507_v63 = vld [vmem:[%s6006_s11 + $0x70] sm:$0xff]  ;;  %v4508_v61 = vld [vmem:[%s6006_s11 + $0x78] sm:$0xff] }
 0x69a   : > { %v4621_v57 = vmax.f32 %v4557_v51, 0.0  ;;  %v4622_v25 = vmax.f32 %v4558_v56, 0.0  ;;  %v4623_v41 = vmax.f32 %v4559_v19, 0.0  ;;  %v4624_v28 = vmax.f32 %v4560_v20, 0.0 }
 0x69b   : > { %v4625_v18 = vmax.f32 %v4561_v12, 0.0  ;;  %v4626_v8 = vmax.f32 %v4562_v33, 0.0  ;;  %v4627_v7 = vmax.f32 %v4563_v2, 0.0  ;;  %v4628_v30 = vmax.f32 %v4564_v50, 0.0 }
 0x69c   : > { %4685 = vst [vmem:[%s6020_s28] sm:$0xff] %v4621_v57  ;;  %4686 = vst [vmem:[%s6020_s28 + $0x8] sm:$0xff] %v4622_v25  ;;  %v4285_v38 = vmul.f32 %v9079_v13, %v4210_v45  ;;  %v4286_v54 = vmul.f32 %v9081_v26, %v4211_v6  ;;  %v4287_v57 = vmul.f32 %v9079_v13, %v4212_v59 }
 0x69d   : > { %4687 = vst [vmem:[%s6020_s28 + $0x10] sm:$0xff] %v4623_v41  ;;  %4688 = vst [vmem:[%s6020_s28 + $0x18] sm:$0xff] %v4624_v28  ;;  %v4288_v50 = vmul.f32 %v9081_v26, %v4213_v53  ;;  %v4289_v42 = vmul.f32 %v9079_v13, %v4214_v32  ;;  %v4290_v46 = vmul.f32 %v9081_v26, %v4215_v16  ;;  %v4503_v53 = vld [vmem:[%s6006_s11 + $0x50] sm:$0xff]  ;;  %v4504_v32 = vld [vmem:[%s6006_s11 + $0x58] sm:$0xff] }
 0x69e   : > { %4689 = vst [vmem:[%s6020_s28 + $0x20] sm:$0xff] %v4625_v18  ;;  %4690 = vst [vmem:[%s6020_s28 + $0x28] sm:$0xff] %v4626_v8  ;;  %v4291_v39 = vmul.f32 %v9079_v13, %v4216_v62  ;;  %v4292_v3 = vmul.f32 %v9081_v26, %v4217_v37  ;;  %v4361_v45 = vmul.f32 %v9003_v24, %v4285_v38 }
 0x69f   : > { %4691 = vst [vmem:[%s6020_s28 + $0x30] sm:$0xff] %v4627_v7  ;;  %4692 = vst [vmem:[%s6020_s28 + $0x38] sm:$0xff] %v4628_v30  ;;  %v4362_v6 = vmul.f32 %v9017_v44, %v4286_v54  ;;  %v4363_v59 = vmul.f32 %v9003_v24, %v4287_v57  ;;  %v4364_v47 = vmul.f32 %v9017_v44, %v4288_v50  ;;  %v4145_v30 = vld [vmem:[%s8986_s30 + $0xb8] sm:$0xff] }
 0x6a0   : > { %v4365_v16 = vmul.f32 %v9003_v24, %v4289_v42  ;;  %v4366_v62 = vmul.f32 %v9017_v44, %v4290_v46  ;;  %v4367_v37 = vmul.f32 %v9003_v24, %v4291_v39  ;;  %v4368_v2 = vmul.f32 %v9017_v44, %v4292_v3 }
 0x6a1   : > { %v4437_v5 = vadd.f32 %v9015_v40, %v4361_v45  ;;  %v4438_v27 = vadd.f32 %v9019_v9, %v4362_v6  ;;  %v4439_v14 = vadd.f32 %v9015_v40, %v4363_v59  ;;  %v4440_v55 = vadd.f32 %v9019_v9, %v4364_v47  ;;  %v4509_v45 = vld [vmem:[%s6006_s11 + $0x80] sm:$0xff]  ;;  %v4510_v6 = vld [vmem:[%s6006_s11 + $0x88] sm:$0xff]  ;;  %v4512_v59 = vld [vmem:[%s6006_s11 + $0x98] sm:$0xff] }
 0x6a2   : > { %v4441_v1 = vadd.f32 %v9015_v40, %v4365_v16  ;;  %v4442_v35 = vadd.f32 %v9019_v9, %v4366_v62  ;;  %v4443_v17 = vadd.f32 %v9015_v40, %v4367_v37  ;;  %v4444_v23 = vadd.f32 %v9019_v9, %v4368_v2  ;;  %v4513_v2 = vld [vmem:[%s6006_s11 + $0xa0] sm:$0xff] }
 0x6a3   : > { %v4565_v51 = vadd.f32 %v4501_v49, %v4437_v5  ;;  %v4566_v56 = vadd.f32 %v4502_v48, %v4438_v27  ;;  %v4567_v19 = vadd.f32 %v4503_v53, %v4439_v14  ;;  %v4568_v20 = vadd.f32 %v4504_v32, %v4440_v55  ;;  %v4511_v48 = vld [vmem:[%s6006_s11 + $0x90] sm:$0xff]  ;;  %v4514_v5 = vld [vmem:[%s6006_s11 + $0xa8] sm:$0xff] }
 0x6a4   : > { %v4569_v12 = vadd.f32 %v4505_v10, %v4441_v1  ;;  %v4570_v33 = vadd.f32 %v4506_v31, %v4442_v35  ;;  %v4571_v25 = vadd.f32 %v4507_v63, %v4443_v17  ;;  %v4572_v41 = vadd.f32 %v4508_v61, %v4444_v23  ;;  %v4515_v27 = vld [vmem:[%s6006_s11 + $0xb0] sm:$0xff]  ;;  %v4516_v23 = vld [vmem:[%s6006_s11 + $0xb8] sm:$0xff] }
 0x6a5   : > { %v4629_v28 = vmax.f32 %v4565_v51, 0.0  ;;  %v4630_v18 = vmax.f32 %v4566_v56, 0.0  ;;  %v4631_v8 = vmax.f32 %v4567_v19, 0.0  ;;  %v4632_v7 = vmax.f32 %v4568_v20, 0.0  ;;  %v4146_v51 = vld [vmem:[%s8986_s30 + $0xc0] sm:$0xff]  ;;  %v4147_v56 = vld [vmem:[%s8986_s30 + $0xc8] sm:$0xff] }
 0x6a6   : > { %v4633_v38 = vmax.f32 %v4569_v12, 0.0  ;;  %v4634_v54 = vmax.f32 %v4570_v33, 0.0  ;;  %v4635_v57 = vmax.f32 %v4571_v25, 0.0  ;;  %v4636_v50 = vmax.f32 %v4572_v41, 0.0  ;;  %v4148_v25 = vld [vmem:[%s8986_s30 + $0xd0] sm:$0xff]  ;;  %v4149_v41 = vld [vmem:[%s8986_s30 + $0xd8] sm:$0xff] }
 0x6a7   : > { %4693 = vst [vmem:[%s6020_s28 + $0x40] sm:$0xff] %v4629_v28  ;;  %4694 = vst [vmem:[%s6020_s28 + $0x48] sm:$0xff] %v4630_v18  ;;  %v4293_v42 = vmul.f32 %v9079_v13, %v4218_v34  ;;  %v4294_v46 = vmul.f32 %v9081_v26, %v4219_v21  ;;  %v4295_v39 = vmul.f32 %v9079_v13, %v4220_v0  ;;  %v4150_v28 = vld [vmem:[%s8986_s30 + $0xe0] sm:$0xff] }
 0x6a8   : > { %4695 = vst [vmem:[%s6020_s28 + $0x50] sm:$0xff] %v4631_v8  ;;  %4696 = vst [vmem:[%s6020_s28 + $0x58] sm:$0xff] %v4632_v7  ;;  %v4296_v3 = vmul.f32 %v9081_v26, %v4221_v60  ;;  %v4297_v22 = vmul.f32 %v9079_v13, %v9767_v29  ;;  %v4298_v34 = vmul.f32 %v9081_v26, %v9768_v58  ;;  %v4153_v58 = vld [vmem:[%s8986_s30 + $0xf8] sm:$0xff] }
 0x6a9   : > { %4697 = vst [vmem:[%s6020_s28 + $0x60] sm:$0xff] %v4633_v38  ;;  %4698 = vst [vmem:[%s6020_s28 + $0x68] sm:$0xff] %v4634_v54  ;;  %v4299_v21 = vmul.f32 %v9079_v13, %v9769_v43  ;;  %v4225_v0 = vsub.f32 %v4145_v30, %v8995_v15  ;;  %v4369_v60 = vmul.f32 %v9003_v24, %v4293_v42  ;;  %v4151_v38 = vld [vmem:[%s8986_s30 + $0xe8] sm:$0xff]  ;;  %v4152_v54 = vld [vmem:[%s8986_s30 + $0xf0] sm:$0xff] }
 0x6aa   : > { %4699 = vst [vmem:[%s6020_s28 + $0x70] sm:$0xff] %v4635_v57  ;;  %4700 = vst [vmem:[%s6020_s28 + $0x78] sm:$0xff] %v4636_v50  ;;  %v4370_v52 = vmul.f32 %v9017_v44, %v4294_v46  ;;  %v4371_v49 = vmul.f32 %v9003_v24, %v4295_v39  ;;  %v4372_v4 = vmul.f32 %v9017_v44, %v4296_v3 }
 0x6ab   : > { %v4373_v11 = vmul.f32 %v9003_v24, %v4297_v22  ;;  %v4374_v47 = vmul.f32 %v9017_v44, %v4298_v34  ;;  %v4375_v53 = vmul.f32 %v9003_v24, %v4299_v21  ;;  %v4300_v32 = vmul.f32 %v9081_v26, %v4225_v0 }
 0x6ac   : > { %v4445_v16 = vadd.f32 %v9015_v40, %v4369_v60  ;;  %v4446_v10 = vadd.f32 %v9019_v9, %v4370_v52  ;;  %v4447_v62 = vadd.f32 %v9015_v40, %v4371_v49  ;;  %v4448_v37 = vadd.f32 %v9019_v9, %v4372_v4 }
 0x6ad   : > { %v4449_v14 = vadd.f32 %v9015_v40, %v4373_v11  ;;  %v4450_v55 = vadd.f32 %v9019_v9, %v4374_v47  ;;  %v4451_v31 = vadd.f32 %v9015_v40, %v4375_v53  ;;  %v4376_v63 = vmul.f32 %v9017_v44, %v4300_v32  ;;  %v4517_v47 = vld [vmem:[%s6006_s11 + $0xc0] sm:$0xff] }
 0x6ae   : > { %v4573_v61 = vadd.f32 %v4509_v45, %v4445_v16  ;;  %v4574_v1 = vadd.f32 %v4510_v6, %v4446_v10  ;;  %v4575_v35 = vadd.f32 %v4511_v48, %v4447_v62  ;;  %v4576_v17 = vadd.f32 %v4512_v59, %v4448_v37  ;;  %v4518_v10 = vld [vmem:[%s6006_s11 + $0xc8] sm:$0xff]  ;;  %v4519_v62 = vld [vmem:[%s6006_s11 + $0xd0] sm:$0xff]  ;;  %v4520_v37 = vld [vmem:[%s6006_s11 + $0xd8] sm:$0xff] }
 0x6af   : > { %v4577_v19 = vadd.f32 %v4513_v2, %v4449_v14  ;;  %v4578_v20 = vadd.f32 %v4514_v5, %v4450_v55  ;;  %v4579_v12 = vadd.f32 %v4515_v27, %v4451_v31  ;;  %v4452_v33 = vadd.f32 %v9019_v9, %v4376_v63 }
 0x6b0   : > { %v4637_v18 = vmax.f32 %v4573_v61, 0.0  ;;  %v4638_v8 = vmax.f32 %v4574_v1, 0.0  ;;  %v4639_v7 = vmax.f32 %v4575_v35, 0.0  ;;  %v4640_v30 = vmax.f32 %v4576_v17, 0.0  ;;  %v4521_v1 = vld [vmem:[%s6006_s11 + $0xe0] sm:$0xff]  ;;  %v4522_v35 = vld [vmem:[%s6006_s11 + $0xe8] sm:$0xff] }
 0x6b1   : > { %v4641_v57 = vmax.f32 %v4577_v19, 0.0  ;;  %v4642_v50 = vmax.f32 %v4578_v20, 0.0  ;;  %v4643_v42 = vmax.f32 %v4579_v12, 0.0  ;;  %v4580_v46 = vadd.f32 %v4516_v23, %v4452_v33  ;;  %v4523_v17 = vld [vmem:[%s6006_s11 + $0xf0] sm:$0xff] }
 0x6b2   : > { %4701 = vst [vmem:[%s6020_s28 + $0x80] sm:$0xff] %v4637_v18  ;;  %4702 = vst [vmem:[%s6020_s28 + $0x88] sm:$0xff] %v4638_v8  ;;  %v4226_v39 = vsub.f32 %v4146_v51, %v8989_v36  ;;  %v4227_v3 = vsub.f32 %v4147_v56, %v8995_v15  ;;  %v4228_v29 = vsub.f32 %v4148_v25, %v8989_v36  ;;  %v4155_v18 = vld [vmem:[%s8986_s30 + $0x108] sm:$0xff] }
 0x6b3   : > { %4703 = vst [vmem:[%s6020_s28 + $0x90] sm:$0xff] %v4639_v7  ;;  %4704 = vst [vmem:[%s6020_s28 + $0x98] sm:$0xff] %v4640_v30  ;;  %v4229_v22 = vsub.f32 %v4149_v41, %v8995_v15  ;;  %v4644_v34 = vmax.f32 %v4580_v46, 0.0  ;;  %v4230_v43 = vsub.f32 %v4150_v28, %v8989_v36  ;;  %v4231_v21 = vsub.f32 %v4151_v38, %v8995_v15  ;;  %v4524_v41 = vld [vmem:[%s6006_s11 + $0xf8] sm:$0xff] }
 0x6b4   : > { %4705 = vst [vmem:[%s6020_s28 + $0xa0] sm:$0xff] %v4641_v57  ;;  %4706 = vst [vmem:[%s6020_s28 + $0xa8] sm:$0xff] %v4642_v50  ;;  %v4232_v0 = vsub.f32 %v4152_v54, %v8989_v36  ;;  %v4301_v60 = vmul.f32 %v9079_v13, %v4226_v39  ;;  %v4302_v45 = vmul.f32 %v9081_v26, %v4227_v3  ;;  %v4154_v28 = vld [vmem:[%s8986_s30 + $0x100] sm:$0xff]  ;;  %v4156_v54 = vld [vmem:[%s8986_s30 + $0x110] sm:$0xff] }
 0x6b5   : > { %4707 = vst [vmem:[%s6020_s28 + $0xb0] sm:$0xff] %v4643_v42  ;;  %v4303_v52 = vmul.f32 %v9079_v13, %v4228_v29  ;;  %v4304_v49 = vmul.f32 %v9081_v26, %v4229_v22  ;;  %4708 = vst [vmem:[%s6020_s28 + $0xb8] sm:$0xff] %v4644_v34  ;;  %v4305_v4 = vmul.f32 %v9079_v13, %v4230_v43  ;;  %v4157_v57 = vld [vmem:[%s8986_s30 + $0x118] sm:$0xff]  ;;  %v4158_v50 = vld [vmem:[%s8986_s30 + $0x120] sm:$0xff] }
 0x6b6   : > { %v4306_v6 = vmul.f32 %v9081_v26, %v4231_v21  ;;  %v4307_v48 = vmul.f32 %v9079_v13, %v4232_v0  ;;  %v4233_v59 = vsub.f32 %v4153_v58, %v8995_v15  ;;  %v4377_v11 = vmul.f32 %v9003_v24, %v4301_v60  ;;  %v4159_v29 = vld [vmem:[%s8986_s30 + $0x128] sm:$0xff]  ;;  %v4160_v22 = vld [vmem:[%s8986_s30 + $0x130] sm:$0xff] }
 0x6b7   : > { %v4378_v53 = vmul.f32 %v9017_v44, %v4302_v45  ;;  %v4379_v32 = vmul.f32 %v9003_v24, %v4303_v52  ;;  %v4380_v16 = vmul.f32 %v9017_v44, %v4304_v49  ;;  %v4381_v2 = vmul.f32 %v9003_v24, %v4305_v4  ;;  %v4161_v49 = vld [vmem:[%s8986_s30 + $0x138] sm:$0xff] }
 0x6b8   : > { %v4382_v5 = vmul.f32 %v9017_v44, %v4306_v6  ;;  %v4383_v27 = vmul.f32 %v9003_v24, %v4307_v48  ;;  %v4308_v14 = vmul.f32 %v9081_v26, %v4233_v59  ;;  %v4453_v55 = vadd.f32 %v9015_v40, %v4377_v11 }
 0x6b9   : > { %v4454_v31 = vadd.f32 %v9019_v9, %v4378_v53  ;;  %v4455_v63 = vadd.f32 %v9015_v40, %v4379_v32  ;;  %v4456_v61 = vadd.f32 %v9019_v9, %v4380_v16  ;;  %v4457_v23 = vadd.f32 %v9015_v40, %v4381_v2 }
 0x6ba   : > { %v4458_v51 = vadd.f32 %v9019_v9, %v4382_v5  ;;  %v4459_v56 = vadd.f32 %v9015_v40, %v4383_v27  ;;  %v4384_v19 = vmul.f32 %v9017_v44, %v4308_v14  ;;  %v4581_v20 = vadd.f32 %v4517_v47, %v4453_v55  ;;  %v4525_v5 = vld [vmem:[%s6006_s11 + $0x100] sm:$0xff] }
 0x6bb   : > { %v4582_v12 = vadd.f32 %v4518_v10, %v4454_v31  ;;  %v4583_v33 = vadd.f32 %v4519_v62, %v4455_v63  ;;  %v4584_v25 = vadd.f32 %v4520_v37, %v4456_v61  ;;  %v4585_v8 = vadd.f32 %v4521_v1, %v4457_v23  ;;  %v4526_v31 = vld [vmem:[%s6006_s11 + $0x108] sm:$0xff]  ;;  %v4527_v63 = vld [vmem:[%s6006_s11 + $0x110] sm:$0xff]  ;;  %v4528_v61 = vld [vmem:[%s6006_s11 + $0x118] sm:$0xff] }
 0x6bc   : > { %v4586_v7 = vadd.f32 %v4522_v35, %v4458_v51  ;;  %v4587_v30 = vadd.f32 %v4523_v17, %v4459_v56  ;;  %v4460_v38 = vadd.f32 %v9019_v9, %v4384_v19  ;;  %v4645_v42 = vmax.f32 %v4581_v20, 0.0 }
 0x6bd   : > { %v4646_v46 = vmax.f32 %v4582_v12, 0.0  ;;  %v4647_v39 = vmax.f32 %v4583_v33, 0.0  ;;  %v4648_v3 = vmax.f32 %v4584_v25, 0.0  ;;  %v4649_v58 = vmax.f32 %v4585_v8, 0.0  ;;  %v4529_v12 = vld [vmem:[%s6006_s11 + $0x120] sm:$0xff]  ;;  %v4530_v33 = vld [vmem:[%s6006_s11 + $0x128] sm:$0xff] }
 0x6be   : > { %v4650_v34 = vmax.f32 %v4586_v7, 0.0  ;;  %v4651_v43 = vmax.f32 %v4587_v30, 0.0  ;;  %v4588_v21 = vadd.f32 %v4524_v41, %v4460_v38  ;;  %4709 = vst [vmem:[%s6020_s28 + $0xc0] sm:$0xff] %v4645_v42  ;;  %v4234_v0 = vsub.f32 %v4154_v28, %v8989_v36  ;;  %v4531_v25 = vld [vmem:[%s6006_s11 + $0x130] sm:$0xff]  ;;  %v4163_v42 = vld [vmem:[%s8986_s30 + $0x148] sm:$0xff] }
 0x6bf   : > { %4710 = vst [vmem:[%s6020_s28 + $0xc8] sm:$0xff] %v4646_v46  ;;  %4711 = vst [vmem:[%s6020_s28 + $0xd0] sm:$0xff] %v4647_v39  ;;  %v4235_v60 = vsub.f32 %v4155_v18, %v8995_v15  ;;  %v4236_v45 = vsub.f32 %v4156_v54, %v8989_v36  ;;  %v4237_v52 = vsub.f32 %v4157_v57, %v8995_v15  ;;  %v4532_v57 = vld [vmem:[%s6006_s11 + $0x138] sm:$0xff] }
 0x6c0   : > { %4712 = vst [vmem:[%s6020_s28 + $0xd8] sm:$0xff] %v4648_v3  ;;  %4713 = vst [vmem:[%s6020_s28 + $0xe0] sm:$0xff] %v4649_v58  ;;  %v4652_v4 = vmax.f32 %v4588_v21, 0.0  ;;  %v4238_v6 = vsub.f32 %v4158_v50, %v8989_v36  ;;  %v4239_v48 = vsub.f32 %v4159_v29, %v8995_v15  ;;  %v4240_v59 = vsub.f32 %v4160_v22, %v8989_v36  ;;  %v4162_v50 = vld [vmem:[%s8986_s30 + $0x140] sm:$0xff]  ;;  %v4164_v22 = vld [vmem:[%s8986_s30 + $0x150] sm:$0xff] }
 0x6c1   : > { %4714 = vst [vmem:[%s6020_s28 + $0xe8] sm:$0xff] %v4650_v34  ;;  %4715 = vst [vmem:[%s6020_s28 + $0xf0] sm:$0xff] %v4651_v43  ;;  %v4309_v11 = vmul.f32 %v9079_v13, %v4234_v0  ;;  %v4310_v47 = vmul.f32 %v9081_v26, %v4235_v60  ;;  %v4311_v53 = vmul.f32 %v9079_v13, %v4236_v45  ;;  %v4165_v58 = vld [vmem:[%s8986_s30 + $0x158] sm:$0xff]  ;;  %v4166_v34 = vld [vmem:[%s8986_s30 + $0x160] sm:$0xff] }
 0x6c2   : > { %v4312_v32 = vmul.f32 %v9081_v26, %v4237_v52  ;;  %4716 = vst [vmem:[%s6020_s28 + $0xf8] sm:$0xff] %v4652_v4  ;;  %v4313_v16 = vmul.f32 %v9079_v13, %v4238_v6  ;;  %v4314_v10 = vmul.f32 %v9081_v26, %v4239_v48  ;;  %v4315_v62 = vmul.f32 %v9079_v13, %v4240_v59  ;;  %v4167_v45 = vld [vmem:[%s8986_s30 + $0x168] sm:$0xff]  ;;  %v4168_v52 = vld [vmem:[%s8986_s30 + $0x170] sm:$0xff] }
 0x6c3   : > { %v4241_v37 = vsub.f32 %v4161_v49, %v8995_v15  ;;  %v4385_v2 = vmul.f32 %v9003_v24, %v4309_v11  ;;  %v4386_v27 = vmul.f32 %v9017_v44, %v4310_v47  ;;  %v4387_v14 = vmul.f32 %v9003_v24, %v4311_v53 }
 0x6c4   : > { %v4388_v55 = vmul.f32 %v9017_v44, %v4312_v32  ;;  %v4389_v1 = vmul.f32 %v9003_v24, %v4313_v16  ;;  %v4390_v35 = vmul.f32 %v9017_v44, %v4314_v10  ;;  %v4391_v17 = vmul.f32 %v9003_v24, %v4315_v62  ;;  %v4169_v32 = vld [vmem:[%s8986_s30 + $0x178] sm:$0xff] }
 0x6c5   : > { %v4316_v23 = vmul.f32 %v9081_v26, %v4241_v37  ;;  %v4461_v51 = vadd.f32 %v9015_v40, %v4385_v2  ;;  %v4462_v56 = vadd.f32 %v9019_v9, %v4386_v27  ;;  %v4463_v19 = vadd.f32 %v9015_v40, %v4387_v14 }
 0x6c6   : > { %v4464_v20 = vadd.f32 %v9019_v9, %v4388_v55  ;;  %v4465_v41 = vadd.f32 %v9015_v40, %v4389_v1  ;;  %v4466_v28 = vadd.f32 %v9019_v9, %v4390_v35  ;;  %v4467_v18 = vadd.f32 %v9015_v40, %v4391_v17  ;;  %v4533_v35 = vld [vmem:[%s6006_s11 + $0x140] sm:$0xff] }
 0x6c7   : > { %v4392_v8 = vmul.f32 %v9017_v44, %v4316_v23  ;;  %v4589_v7 = vadd.f32 %v4525_v5, %v4461_v51  ;;  %v4590_v30 = vadd.f32 %v4526_v31, %v4462_v56  ;;  %v4591_v38 = vadd.f32 %v4527_v63, %v4463_v19  ;;  %v4534_v56 = vld [vmem:[%s6006_s11 + $0x148] sm:$0xff]  ;;  %v4535_v19 = vld [vmem:[%s6006_s11 + $0x150] sm:$0xff] }
 0x6c8   : > { %v4592_v54 = vadd.f32 %v4528_v61, %v4464_v20  ;;  %v4593_v46 = vadd.f32 %v4529_v12, %v4465_v41  ;;  %v4594_v39 = vadd.f32 %v4530_v33, %v4466_v28  ;;  %v4595_v3 = vadd.f32 %v4531_v25, %v4467_v18  ;;  %v4536_v20 = vld [vmem:[%s6006_s11 + $0x158] sm:$0xff] }
 0x6c9   : > { %v4468_v29 = vadd.f32 %v9019_v9, %v4392_v8  ;;  %v4653_v43 = vmax.f32 %v4589_v7, 0.0  ;;  %v4654_v21 = vmax.f32 %v4590_v30, 0.0  ;;  %v4655_v0 = vmax.f32 %v4591_v38, 0.0  ;;  %v4537_v30 = vld [vmem:[%s6006_s11 + $0x160] sm:$0xff]  ;;  %v4538_v38 = vld [vmem:[%s6006_s11 + $0x168] sm:$0xff] }
 0x6ca   : > { %v4656_v60 = vmax.f32 %v4592_v54, 0.0  ;;  %v4657_v49 = vmax.f32 %v4593_v46, 0.0  ;;  %v4658_v4 = vmax.f32 %v4594_v39, 0.0  ;;  %v4659_v6 = vmax.f32 %v4595_v3, 0.0  ;;  %v4539_v54 = vld [vmem:[%s6006_s11 + $0x170] sm:$0xff] }
 0x6cb   : > { %v4596_v48 = vadd.f32 %v4532_v57, %v4468_v29  ;;  %4717 = vst [vmem:[%s6020_s28 + $0x100] sm:$0xff] %v4653_v43  ;;  %4718 = vst [vmem:[%s6020_s28 + $0x108] sm:$0xff] %v4654_v21  ;;  %v4242_v59 = vsub.f32 %v4162_v50, %v8989_v36  ;;  %v4243_v11 = vsub.f32 %v4163_v42, %v8995_v15  ;;  %v4171_v43 = vld [vmem:[%s8986_s30 + $0x188] sm:$0xff] }
 0x6cc   : > { %4719 = vst [vmem:[%s6020_s28 + $0x110] sm:$0xff] %v4655_v0  ;;  %4720 = vst [vmem:[%s6020_s28 + $0x118] sm:$0xff] %v4656_v60  ;;  %v4244_v47 = vsub.f32 %v4164_v22, %v8989_v36  ;;  %v4245_v53 = vsub.f32 %v4165_v58, %v8995_v15  ;;  %v4246_v10 = vsub.f32 %v4166_v34, %v8989_v36  ;;  %v4540_v58 = vld [vmem:[%s6006_s11 + $0x178] sm:$0xff] }
 0x6cd   : > { %4721 = vst [vmem:[%s6020_s28 + $0x120] sm:$0xff] %v4657_v49  ;;  %4722 = vst [vmem:[%s6020_s28 + $0x128] sm:$0xff] %v4658_v4  ;;  %v4660_v16 = vmax.f32 %v4596_v48, 0.0  ;;  %v4247_v62 = vsub.f32 %v4167_v45, %v8995_v15  ;;  %v4248_v37 = vsub.f32 %v4168_v52, %v8989_v36  ;;  %v4317_v2 = vmul.f32 %v9079_v13, %v4242_v59  ;;  %v4170_v34 = vld [vmem:[%s8986_s30 + $0x180] sm:$0xff]  ;;  %v4172_v52 = vld [vmem:[%s8986_s30 + $0x190] sm:$0xff] }
 0x6ce   : > { %4723 = vst [vmem:[%s6020_s28 + $0x130] sm:$0xff] %v4659_v6  ;;  %v4318_v5 = vmul.f32 %v9081_v26, %v4243_v11  ;;  %v4319_v27 = vmul.f32 %v9079_v13, %v4244_v47  ;;  %v4320_v14 = vmul.f32 %v9081_v26, %v4245_v53  ;;  %v4321_v55 = vmul.f32 %v9079_v13, %v4246_v10  ;;  %v4173_v49 = vld [vmem:[%s8986_s30 + $0x198] sm:$0xff]  ;;  %v4174_v4 = vld [vmem:[%s8986_s30 + $0x1a0] sm:$0xff]  ;;  %v4175_v47 = vld [vmem:[%s8986_s30 + $0x1a8] sm:$0xff] }
 0x6cf   : > { %4724 = vst [vmem:[%s6020_s28 + $0x138] sm:$0xff] %v4660_v16  ;;  %v4322_v31 = vmul.f32 %v9081_v26, %v4247_v62  ;;  %v4323_v63 = vmul.f32 %v9079_v13, %v4248_v37  ;;  %v4249_v61 = vsub.f32 %v4169_v32, %v8995_v15  ;;  %v4393_v1 = vmul.f32 %v9003_v24, %v4317_v2  ;;  %v4176_v53 = vld [vmem:[%s8986_s30 + $0x1b0] sm:$0xff] }
 0x6d0   : > { %v4394_v17 = vmul.f32 %v9017_v44, %v4318_v5  ;;  %v4395_v23 = vmul.f32 %v9003_v24, %v4319_v27  ;;  %v4396_v51 = vmul.f32 %v9017_v44, %v4320_v14  ;;  %v4397_v12 = vmul.f32 %v9003_v24, %v4321_v55  ;;  %v4177_v14 = vld [vmem:[%s8986_s30 + $0x1b8] sm:$0xff] }
 0x6d1   : > { %v4398_v33 = vmul.f32 %v9017_v44, %v4322_v31  ;;  %v4399_v25 = vmul.f32 %v9003_v24, %v4323_v63  ;;  %v4324_v41 = vmul.f32 %v9081_v26, %v4249_v61  ;;  %v4469_v28 = vadd.f32 %v9015_v40, %v4393_v1 }
 0x6d2   : > { %v4470_v18 = vadd.f32 %v9019_v9, %v4394_v17  ;;  %v4471_v8 = vadd.f32 %v9015_v40, %v4395_v23  ;;  %v4472_v7 = vadd.f32 %v9019_v9, %v4396_v51  ;;  %v4473_v57 = vadd.f32 %v9015_v40, %v4397_v12 }
 0x6d3   : > { %v4474_v50 = vadd.f32 %v9019_v9, %v4398_v33  ;;  %v4475_v42 = vadd.f32 %v9015_v40, %v4399_v25  ;;  %v4400_v46 = vmul.f32 %v9017_v44, %v4324_v41  ;;  %v4597_v39 = vadd.f32 %v4533_v35, %v4469_v28  ;;  %v4541_v33 = vld [vmem:[%s6006_s11 + $0x180] sm:$0xff] }
 0x6d4   : > { %v4598_v3 = vadd.f32 %v4534_v56, %v4470_v18  ;;  %v4599_v29 = vadd.f32 %v4535_v19, %v4471_v8  ;;  %v4600_v22 = vadd.f32 %v4536_v20, %v4472_v7  ;;  %v4601_v21 = vadd.f32 %v4537_v30, %v4473_v57  ;;  %v4542_v18 = vld [vmem:[%s6006_s11 + $0x188] sm:$0xff]  ;;  %v4543_v8 = vld [vmem:[%s6006_s11 + $0x190] sm:$0xff]  ;;  %v4544_v7 = vld [vmem:[%s6006_s11 + $0x198] sm:$0xff] }
 0x6d5   : > { %v4602_v0 = vadd.f32 %v4538_v38, %v4474_v50  ;;  %v4603_v60 = vadd.f32 %v4539_v54, %v4475_v42  ;;  %v4476_v45 = vadd.f32 %v9019_v9, %v4400_v46  ;;  %v4661_v6 = vmax.f32 %v4597_v39, 0.0 }
 0x6d6   : > { %v4662_v48 = vmax.f32 %v4598_v3, 0.0  ;;  %v4663_v59 = vmax.f32 %v4599_v29, 0.0  ;;  %v4664_v11 = vmax.f32 %v4600_v22, 0.0  ;;  %v4665_v32 = vmax.f32 %v4601_v21, 0.0  ;;  %v4545_v3 = vld [vmem:[%s6006_s11 + $0x1a0] sm:$0xff]  ;;  %v4546_v29 = vld [vmem:[%s6006_s11 + $0x1a8] sm:$0xff] }
 0x6d7   : > { %v4666_v16 = vmax.f32 %v4602_v0, 0.0  ;;  %v4667_v10 = vmax.f32 %v4603_v60, 0.0  ;;  %v4604_v62 = vadd.f32 %v4540_v58, %v4476_v45  ;;  %4725 = vst [vmem:[%s6020_s28 + $0x140] sm:$0xff] %v4661_v6  ;;  %v4250_v37 = vsub.f32 %v4170_v34, %v8989_v36  ;;  %v4547_v22 = vld [vmem:[%s6006_s11 + $0x1b0] sm:$0xff]  ;;  %v4179_v6 = vld [vmem:[%s8986_s30 + $0x1c8] sm:$0xff] }
 0x6d8   : > { %4726 = vst [vmem:[%s6020_s28 + $0x148] sm:$0xff] %v4662_v48  ;;  %4727 = vst [vmem:[%s6020_s28 + $0x150] sm:$0xff] %v4663_v59  ;;  %v4251_v2 = vsub.f32 %v4171_v43, %v8995_v15  ;;  %v4252_v5 = vsub.f32 %v4172_v52, %v8989_v36  ;;  %v4253_v27 = vsub.f32 %v4173_v49, %v8995_v15  ;;  %v4548_v49 = vld [vmem:[%s6006_s11 + $0x1b8] sm:$0xff] }
 0x6d9   : > { %4728 = vst [vmem:[%s6020_s28 + $0x158] sm:$0xff] %v4664_v11  ;;  %4729 = vst [vmem:[%s6020_s28 + $0x160] sm:$0xff] %v4665_v32  ;;  %v4668_v55 = vmax.f32 %v4604_v62, 0.0  ;;  %v4254_v31 = vsub.f32 %v4174_v4, %v8989_v36  ;;  %v4255_v63 = vsub.f32 %v4175_v47, %v8995_v15  ;;  %v4256_v61 = vsub.f32 %v4176_v53, %v8989_v36  ;;  %v4178_v4 = vld [vmem:[%s8986_s30 + $0x1c0] sm:$0xff]  ;;  %v4180_v53 = vld [vmem:[%s8986_s30 + $0x1d0] sm:$0xff] }
 0x6da   : > { %4730 = vst [vmem:[%s6020_s28 + $0x168] sm:$0xff] %v4666_v16  ;;  %4731 = vst [vmem:[%s6020_s28 + $0x170] sm:$0xff] %v4667_v10  ;;  %v4325_v1 = vmul.f32 %v9079_v13, %v4250_v37  ;;  %v4326_v35 = vmul.f32 %v9081_v26, %v4251_v2  ;;  %v4327_v17 = vmul.f32 %v9079_v13, %v4252_v5  ;;  %v4181_v32 = vld [vmem:[%s8986_s30 + $0x1d8] sm:$0xff]  ;;  %v4182_v16 = vld [vmem:[%s8986_s30 + $0x1e0] sm:$0xff] }
 0x6db   : > { %v4328_v23 = vmul.f32 %v9081_v26, %v4253_v27  ;;  %4732 = vst [vmem:[%s6020_s28 + $0x178] sm:$0xff] %v4668_v55  ;;  %v4329_v51 = vmul.f32 %v9079_v13, %v4254_v31  ;;  %v4330_v56 = vmul.f32 %v9081_v26, %v4255_v63  ;;  %v4331_v19 = vmul.f32 %v9079_v13, %v4256_v61  ;;  %v4183_v5 = vld [vmem:[%s8986_s30 + $0x1e8] sm:$0xff]  ;;  %v4184_v27 = vld [vmem:[%s8986_s30 + $0x1f0] sm:$0xff] }
 0x6dc   : > { %v4257_v20 = vsub.f32 %v4177_v14, %v8995_v15  ;;  %v4401_v12 = vmul.f32 %v9003_v24, %v4325_v1  ;;  %v4402_v25 = vmul.f32 %v9017_v44, %v4326_v35  ;;  %v4403_v41 = vmul.f32 %v9003_v24, %v4327_v17 }
 0x6dd   : > { %v4404_v28 = vmul.f32 %v9017_v44, %v4328_v23  ;;  %v4405_v30 = vmul.f32 %v9003_v24, %v4329_v51  ;;  %v4406_v38 = vmul.f32 %v9017_v44, %v4330_v56  ;;  %v4407_v54 = vmul.f32 %v9003_v24, %v4331_v19  ;;  %v4185_v23 = vld [vmem:[%s8986_s30 + $0x1f8] sm:$0xff] }
 0x6de   : > { %v4332_v57 = vmul.f32 %v9081_v26, %v4257_v20  ;;  %v4477_v50 = vadd.f32 %v9015_v40, %v4401_v12  ;;  %v4478_v42 = vadd.f32 %v9019_v9, %v4402_v25  ;;  %v4479_v46 = vadd.f32 %v9015_v40, %v4403_v41 }
 0x6df   : > { %v4480_v39 = vadd.f32 %v9019_v9, %v4404_v28  ;;  %v4481_v58 = vadd.f32 %v9015_v40, %v4405_v30  ;;  %v4482_v34 = vadd.f32 %v9019_v9, %v4406_v38  ;;  %v4483_v43 = vadd.f32 %v9015_v40, %v4407_v54  ;;  %v4549_v30 = vld [vmem:[%s6006_s11 + $0x1c0] sm:$0xff] }
 0x6e0   : > { %v4408_v21 = vmul.f32 %v9017_v44, %v4332_v57  ;;  %v4605_v0 = vadd.f32 %v4541_v33, %v4477_v50  ;;  %v4606_v60 = vadd.f32 %v4542_v18, %v4478_v42  ;;  %v4607_v45 = vadd.f32 %v4543_v8, %v4479_v46  ;;  %v4550_v50 = vld [vmem:[%s6006_s11 + $0x1c8] sm:$0xff]  ;;  %v4551_v42 = vld [vmem:[%s6006_s11 + $0x1d0] sm:$0xff]  ;;  %v4552_v46 = vld [vmem:[%s6006_s11 + $0x1d8] sm:$0xff] }
 0x6e1   : > { %v4608_v52 = vadd.f32 %v4544_v7, %v4480_v39  ;;  %v4609_v48 = vadd.f32 %v4545_v3, %v4481_v58  ;;  %v4610_v59 = vadd.f32 %v4546_v29, %v4482_v34  ;;  %v4611_v11 = vadd.f32 %v4547_v22, %v4483_v43  ;;  %v4553_v43 = vld [vmem:[%s6006_s11 + $0x1e0] sm:$0xff] }
 0x6e2   : > { %v4484_v47 = vadd.f32 %v9019_v9, %v4408_v21  ;;  %v4669_v10 = vmax.f32 %v4605_v0, 0.0  ;;  %v4670_v62 = vmax.f32 %v4606_v60, 0.0  ;;  %v4671_v37 = vmax.f32 %v4607_v45, 0.0  ;;  %v4554_v21 = vld [vmem:[%s6006_s11 + $0x1e8] sm:$0xff]  ;;  %v4555_v0 = vld [vmem:[%s6006_s11 + $0x1f0] sm:$0xff] }
 0x6e3   : > { %v4672_v2 = vmax.f32 %v4608_v52, 0.0  ;;  %v4673_v14 = vmax.f32 %v4609_v48, 0.0  ;;  %v4674_v55 = vmax.f32 %v4610_v59, 0.0  ;;  %v4675_v31 = vmax.f32 %v4611_v11, 0.0  ;;  %v4556_v48 = vld [vmem:[%s6006_s11 + $0x1f8] sm:$0xff] }
 0x6e4   : > { %v4612_v63 = vadd.f32 %v4548_v49, %v4484_v47  ;;  %4733 = vst [vmem:[%s6020_s28 + $0x180] sm:$0xff] %v4669_v10  ;;  %4734 = vst [vmem:[%s6020_s28 + $0x188] sm:$0xff] %v4670_v62  ;;  %v4258_v61 = vsub.f32 %v4178_v4, %v8989_v36  ;;  %v4259_v1 = vsub.f32 %v4179_v6, %v8995_v15 }
 0x6e5   : > { %4735 = vst [vmem:[%s6020_s28 + $0x190] sm:$0xff] %v4671_v37  ;;  %4736 = vst [vmem:[%s6020_s28 + $0x198] sm:$0xff] %v4672_v2  ;;  %v4260_v35 = vsub.f32 %v4180_v53, %v8989_v36  ;;  %v4261_v17 = vsub.f32 %v4181_v32, %v8995_v15  ;;  %v4262_v56 = vsub.f32 %v4182_v16, %v8989_v36 }
 0x6e6   : > { %4737 = vst [vmem:[%s6020_s28 + $0x1a0] sm:$0xff] %v4673_v14  ;;  %4738 = vst [vmem:[%s6020_s28 + $0x1a8] sm:$0xff] %v4674_v55  ;;  %v4676_v51 = vmax.f32 %v4612_v63, 0.0  ;;  %v4263_v19 = vsub.f32 %v4183_v5, %v8995_v15  ;;  %v4264_v20 = vsub.f32 %v4184_v27, %v8989_v36  ;;  %v4333_v12 = vmul.f32 %v9079_v13, %v4258_v61 }
 0x6e7   : > { %4739 = vst [vmem:[%s6020_s28 + $0x1b0] sm:$0xff] %v4675_v31  ;;  %v4334_v33 = vmul.f32 %v9081_v26, %v4259_v1  ;;  %v4335_v25 = vmul.f32 %v9079_v13, %v4260_v35  ;;  %v4336_v41 = vmul.f32 %v9081_v26, %v4261_v17  ;;  %v4337_v28 = vmul.f32 %v9079_v13, %v4262_v56 }
 0x6e8   : > { %4740 = vst [vmem:[%s6020_s28 + $0x1b8] sm:$0xff] %v4676_v51  ;;  %v4338_v18 = vmul.f32 %v9081_v26, %v4263_v19  ;;  %v4339_v8 = vmul.f32 %v9079_v13, %v4264_v20  ;;  %v4265_v7 = vsub.f32 %v4185_v23, %v8995_v15  ;;  %v4409_v36 = vmul.f32 %v9003_v24, %v4333_v12 }
 0x6e9   : > { %v4410_v38 = vmul.f32 %v9017_v44, %v4334_v33  ;;  %v4411_v54 = vmul.f32 %v9003_v24, %v4335_v25  ;;  %v4412_v57 = vmul.f32 %v9017_v44, %v4336_v41  ;;  %v4413_v39 = vmul.f32 %v9003_v24, %v4337_v28 }
 0x6ea   : > { %v4414_v13 = vmul.f32 %v9017_v44, %v4338_v18  ;;  %v4415_v15 = vmul.f32 %v9003_v24, %v4339_v8  ;;  %v4340_v3 = vmul.f32 %v9081_v26, %v4265_v7  ;;  %v4485_v29 = vadd.f32 %v9015_v40, %v4409_v36 }
 0x6eb   : > { %v4486_v22 = vadd.f32 %v9019_v9, %v4410_v38  ;;  %v4487_v58 = vadd.f32 %v9015_v40, %v4411_v54  ;;  %v4488_v34 = vadd.f32 %v9019_v9, %v4412_v57  ;;  %v4489_v60 = vadd.f32 %v9015_v40, %v4413_v39 }
 0x6ec   : > { %v4490_v45 = vadd.f32 %v9019_v9, %v4414_v13  ;;  %v4491_v24 = vadd.f32 %v9015_v40, %v4415_v15  ;;  %v4416_v26 = vmul.f32 %v9017_v44, %v4340_v3  ;;  %v4613_v52 = vadd.f32 %v4549_v30, %v4485_v29 }
 0x6ed   : > { %v4614_v49 = vadd.f32 %v4550_v50, %v4486_v22  ;;  %v4615_v4 = vadd.f32 %v4551_v42, %v4487_v58  ;;  %v4616_v6 = vadd.f32 %v4552_v46, %v4488_v34  ;;  %v4617_v59 = vadd.f32 %v4553_v43, %v4489_v60 }
 0x6ee   : > { %v4618_v11 = vadd.f32 %v4554_v21, %v4490_v45  ;;  %v4619_v47 = vadd.f32 %v4555_v0, %v4491_v24  ;;  %v4492_v53 = vadd.f32 %v9019_v9, %v4416_v26  ;;  %v4677_v40 = vmax.f32 %v4613_v52, 0.0 }
 0x6ef   : > { %v4678_v44 = vmax.f32 %v4614_v49, 0.0  ;;  %v4679_v32 = vmax.f32 %v4615_v4, 0.0  ;;  %v4680_v16 = vmax.f32 %v4616_v6, 0.0  ;;  %v4681_v10 = vmax.f32 %v4617_v59, 0.0 }
 0x6f0   : > { %v4682_v62 = vmax.f32 %v4618_v11, 0.0  ;;  %v4683_v37 = vmax.f32 %v4619_v47, 0.0  ;;  %v4620_v2 = vadd.f32 %v4556_v48, %v4492_v53  ;;  %4741 = vst [vmem:[%s6020_s28 + $0x1c0] sm:$0xff] %v4677_v40 }
 0x6f1   : > { %4742 = vst [vmem:[%s6020_s28 + $0x1c8] sm:$0xff] %v4678_v44  ;;  %4743 = vst [vmem:[%s6020_s28 + $0x1d0] sm:$0xff] %v4679_v32 }
 0x6f2   : > { %4744 = vst [vmem:[%s6020_s28 + $0x1d8] sm:$0xff] %v4680_v16  ;;  %4745 = vst [vmem:[%s6020_s28 + $0x1e0] sm:$0xff] %v4681_v10  ;;  %v4684_v5 = vmax.f32 %v4620_v2, 0.0 }
 0x6f3   : > { %4746 = vst [vmem:[%s6020_s28 + $0x1e8] sm:$0xff] %v4682_v62  ;;  %4747 = vst [vmem:[%s6020_s28 + $0x1f0] sm:$0xff] %v4683_v37 }
 0x6f4   : > { %4748 = vst [vmem:[%s6020_s28 + $0x1f8] sm:$0xff] %v4684_v5 }
 0x6f5 PF: > { %s9770_s11 = sld [smem:[#allocation21_spill]]  ;;  %p4757_p13 = scmp.eq.s32.totalorder %s5765_s20, 3 }
 0x6f6   : > { %s4766_s21 = sshll.u32 %s6020_s28, 4  ;;  %s9771_s5 = sld [smem:[#allocation48_spill]]  ;;  %s9548_s21 = int_to_ptr.vmem [resolvable:$true] %s4766_s21 }
 0x6f7   : > { %s9791_s19 = smov (!%p4757_p13, %s5761_s19), 0  ;;  %s9557_s29 = scalar_lea.sflag [#allocation13], %s404_s26 }
 0x6f8   : > { %s4995_s22 = sshll.u32 %s9791_s19, 13  ;;  %s5655_s30 = scalar_lea.vmem %s9548_s21, 8192 }
 0x6f9   : > { %p5656_p7 = scmp.ne.s32.totalorder %s9548_s21, %s5655_s30  ;;  %s5787_s20 = smov [#allocation14]  }
 0x6fa   : > { %s5659_s28 = sshll.u32 %s5787_s20, 4  ;;  %s5660_s28 = int_to_ptr.vmem [resolvable:$false] %s5659_s28 }
 0x6fb   : > { %p9772_p4 = scmp.ne.s32.totalorder %s9770_s11, 0  ;;  %s5661_s6 = scalar_lea.vmem %s5660_s28, 16384 }
 0x6fc   : > { %s9553_s7 = scalar_lea.hbm %s9771_s5, %s4995_s22  ;;  %p5662_p1 = scmp.lt.s32.totalorder %s9548_s21, %s5660_s28 }
 0x6fd   : > { %p5657_p5 = pnand %p5656_p7, %p9772_p4  ;;  %p5663_p6 = scmp.lt.s32.totalorder %s5661_s6, %s5655_s30 }
 0x6ff   : > { %p5658_p12 = pneg %p5657_p5  ;;  %p5664_p3 = por %p5663_p6, %p5662_p1 }
 0x701   : > { %p5665_p9 = pnand %p5664_p3, %p5658_p12 }
 0x703   : > { %5668 = shalt.err (!%p5665_p9)
}
 0x704   : > { %s5669_s19 = scalar_lea.hbm %s9553_s7, 8192  ;;  %s5673_s12 = scalar_lea.hbm %s9771_s5, 16384 }
 0x705   : > { %p5670_p10 = scmp.ne.s32.totalorder %s9553_s7, %s5669_s19  ;;  %p5674_p2 = scmp.lt.u32.totalorder %s9553_s7, %s9771_s5 }
 0x706   : > { %p5675_p11 = scmp.lt.u32.totalorder %s5673_s12, %s5669_s19  ;;  %p5677_p7 = scmp.lt.u32.totalorder %s5669_s19, %s9553_s7 }
 0x707   : > { %p5671_p0 = pnand %p5670_p10, %p9772_p4 }
 0x708   : > { %p5676_p13 = por %p5675_p11, %p5674_p2 }
 0x709   : > { %p5672_p8 = pneg %p5671_p0 }
 0x70a   : > { %p5678_p5 = por %p5677_p7, %p5676_p13 }
 0x70c   : > { %p5679_p12 = pnand %p5678_p5, %p5672_p8 }
 0x70e   : > { %5682 = shalt.err (!%p5679_p12)
}
 0x70f   : > { %s5788_s10 = smov 256   ;;  %s5789_s30 = smov 16  }
 0x710   : > { %5440 = dma.vmem_to_hbm [thread:$0]  (%p9772_p4), %s9548_s21, 8192, %s9553_s7, %s9557_s29, %s5788_s10, %s5788_s10, %s5789_s30  }
 0x711 PF: > { %p5451_p1 = scmp.ge.s32.totalorder %s5777_s23, 2  ;;  %s4781_s20 = sand.u32 1, %s5737_s13  }
 0x712   : > { %p9773_p6 = scmp.ne.s32.totalorder %s9675_s24, 0  ;;  %s4782_s28 = scalar_lea.sflag [#allocation13], %s4781_s20 }
 0x714   : > { %p5447_p3 = pnand %p5451_p1, %p9773_p6 }
 0x716   : > { %5732 = dma.done.wait (!%p5447_p3), %s4782_s28, 8192  }
 0x717   : > { %5734 = vsyncadd (!%p5447_p3), %s4782_s28, 4294959104  ;;  %s26_s23 = sadd.s32 1, %s5777_s23   ;;  %s9774_s19 = sld [smem:[#allocation17_spill]] }
 0x718   : > { %p23_p9 = scmp.ge.s32.totalorder %s26_s23, 10   ;;  %s9775_s20 = sld [smem:[#allocation18_spill]] }
 0x719   : > { %s9776_s21 = sld [smem:[#allocation19_spill]]  ;;  %s9777_s22 = sld [smem:[#allocation20_spill]] }
 0x71a   : > { %s9778_s13 = smov %s5741_s14  ;;  %s9779_s14 = smov %s5745_s15 }
 0x71b   : > { %s9780_s15 = smov %s5958_s25  ;;  %s9781_s16 = smov %s5753_s17 }
 0x71c   : > { %s9782_s17 = smov %s5757_s18  ;;  %s9783_s18 = smov %s5948_s8 }
 0x71d   :  { %25 = sbr.rel (!%p23_p9) target bundleno = 16 (0x10), region = 131 }
 0x724   :  { %4787 = vsyncpa [#allocation12], 1 }
 0x725   :  { %4789 = vsyncpa [#allocation12 + $0x1], 1 }
 0x726   :  { %4790 = vsyncpa [#allocation13], 1 }
 0x727   :  { %4792 = vsyncpa [#allocation13 + $0x1], 1 }

</bundles_post_ra>
